<compile_context>
chip_gen: v6e
topology: v6e:2x2x1
jax: 0.10.0
libtpu: 0.0.40
codegen_flags: <defaults>
</compile_context>

<pallas_src>
import functools

import jax
import jax.numpy as jnp
from jax.experimental import pallas as pl
from jax.experimental.pallas import tpu as pltpu

LANES = 128
MXU_DTYPE = jnp.bfloat16       # full-rate MXU path on v5e / v6e / v7x
INTER_DTYPE = jnp.bfloat16     # inter-stage activation storage in HBM
VMEM_LIMIT_BYTES = 48 * 1024 * 1024   # < 64 MiB (v7x per-TC), < 128 MiB (v5e/v6e)
_TILE_VMEM_BUDGET = 24 * 1024 * 1024  # target working set per grid step


def _round_up(x, m):
    return (x + m - 1) // m * m


def _pick_tile_h(height, width, cin_p, cout_p):
    # Rough per-output-row VMEM bytes while one tile is in flight:
    #   mid input block (f32 worst case, double-buffered), the assembled bf16
    #   window + one live shifted copy, the f32 accumulator, and the bf16
    #   output block (double-buffered).
    bytes_per_row = width * (cin_p * (4 * 2 + 2 * 2) + cout_p * (4 + 2 * 2))
    const = 9 * cin_p * cout_p * 2 * 2            # bf16 weights, double-buffered
    t = max(1, (_TILE_VMEM_BUDGET - const) // max(bytes_per_row, 1))
    t = max(1, min(t, height, 256))
    while height % t:
        t -= 1
    return t


def _pick_tile_rows(rows, cap=4096):
    t = min(cap, rows)
    t -= t % 8
    t = max(t, 8)
    while t > 8 and rows % t:
        t -= 8
    if rows % t:
        t = rows
    return t


# --------------------------------------------------------------------------- #
# Kernel 1/2: 3x3 conv as 9 per-tap MXU matmuls + per-tile centered BN partials.
# Optionally applies the previous stage's BN scale/shift + ReLU to its input
# (stage-2 call), so the intermediate activation makes one bf16 HBM round trip.
# --------------------------------------------------------------------------- #
def _conv_stats_kernel(top_ref, mid_ref, bot_ref, w_ref, scale_ref, shift_ref,
                       y_ref, stats_ref,
                       *, tile_h, width, cin_p, cout_p, fuse_input_bn):
    h = pl.program_id(1)
    n_h = pl.num_programs(1)
    top_valid = jnp.where(h > 0, 1.0, 0.0)          # rows outside the image -> 0
    bot_valid = jnp.where(h < n_h - 1, 1.0, 0.0)

    def prep(v, valid=None):
        v = v.astype(jnp.float32)
        if fuse_input_bn:
            # Previous stage's BatchNorm + ReLU fused into this stage's input.
            v = jnp.maximum(v * scale_ref[...] + shift_ref[...], 0.0)
        if valid is not None:
            v = v * valid
        return v.astype(MXU_DTYPE)

    top = prep(top_ref[...].reshape(1, width, cin_p), top_valid)
    mid = prep(mid_ref[...].reshape(tile_h, width, cin_p))
    bot = prep(bot_ref[...].reshape(1, width, cin_p), bot_valid)

    # (tile_h + 2, W, Cin_p) halo window (no column-padded scratch, no slab).
    win = jnp.concatenate([top, mid, bot], axis=0)

    # Conv's left/right zero padding: two +/-1 column-shifted copies.
    zero_col = jnp.zeros((tile_h + 2, 1, cin_p), MXU_DTYPE)
    shifted = (
        jnp.concatenate([zero_col, win[:, :width - 1, :]], axis=1),  # dx = 0
        win,                                                         # dx = 1
        jnp.concatenate([win[:, 1:, :], zero_col], axis=1),          # dx = 2
    )

    # Per-tap accumulation: 9 matmuls with K = Cin_p into one f32 accumulator.
    acc = jnp.zeros((tile_h * width, cout_p), jnp.float32)
    for dx in range(3):
        sh = shifted[dx]
        for dy in range(3):
            patch = sh[dy:dy + tile_h].reshape(tile_h * width, cin_p)
            acc = acc + jnp.dot(patch, w_ref[dy * 3 + dx],
                                preferred_element_type=jnp.float32)

    # Raw (pre-BN) conv output, bf16, lane-dense store.
    y_ref[...] = acc.reshape(1, tile_h, width, cout_p).astype(y_ref.dtype)

    # Per-tile centered BatchNorm partials (Chan combine happens in XLA glue).
    inv_cnt = 1.0 / (tile_h * width)
    tile_mean = jnp.sum(acc, axis=0, keepdims=True) * inv_cnt
    centered = acc - tile_mean
    m2 = jnp.sum(centered * centered, axis=0, keepdims=True)
    stats_ref[...] = jnp.concatenate([tile_mean, m2],
                                     axis=0).reshape(1, 1, 2, cout_p)


def _conv_bn_stage(x, w_packed, scale_in, shift_in, *, tile_h, fuse_input_bn):
    n, height, width, cin_p = x.shape
    cout_p = w_packed.shape[2]
    n_h = height // tile_h

    # Halo rows as single-row blocks (block size 1 -> block index == row index),
    # clamped at the image border and masked to zero inside the kernel.
    row_top = lambda i, j: (i, jnp.maximum(j * tile_h - 1, 0), 0, 0)
    row_mid = lambda i, j: (i, j, 0, 0)
    row_bot = lambda i, j: (i, jnp.minimum((j + 1) * tile_h, height - 1), 0, 0)

    kernel = functools.partial(
        _conv_stats_kernel, tile_h=tile_h, width=width,
        cin_p=cin_p, cout_p=cout_p, fuse_input_bn=fuse_input_bn)

    y_raw, stats = pl.pallas_call(
        kernel,
        grid=(n, n_h),
        in_specs=[
            pl.BlockSpec((1, 1, width, cin_p), row_top),
            pl.BlockSpec((1, tile_h, width, cin_p), row_mid),
            pl.BlockSpec((1, 1, width, cin_p), row_bot),
            pl.BlockSpec((9, cin_p, cout_p), lambda i, j: (0, 0, 0)),
            pl.BlockSpec((1, cin_p), lambda i, j: (0, 0)),
            pl.BlockSpec((1, cin_p), lambda i, j: (0, 0)),
        ],
        out_specs=[
            pl.BlockSpec((1, tile_h, width, cout_p), lambda i, j: (i, j, 0, 0)),
            pl.BlockSpec((1, 1, 2, cout_p), lambda i, j: (i, j, 0, 0)),
        ],
        out_shape=[
            jax.ShapeDtypeStruct((n, height, width, cout_p), INTER_DTYPE),
            jax.ShapeDtypeStruct((n, n_h, 2, cout_p), jnp.float32),
        ],
        compiler_params=pltpu.CompilerParams(
            dimension_semantics=("parallel", "parallel"),
            vmem_limit_bytes=VMEM_LIMIT_BYTES),
    )(x, x, x, w_packed, scale_in, shift_in)
    return y_raw, stats


# --------------------------------------------------------------------------- #
# Kernel 3: final BatchNorm scale/shift + ReLU over a flattened (rows, C) view
# with a large row tile; writes only the real `cout` channels.
# --------------------------------------------------------------------------- #
def _bn_relu_kernel(y_ref, scale_ref, shift_ref, o_ref, *, cout):
    y = y_ref[...].astype(jnp.float32)
    y = jnp.maximum(y * scale_ref[...] + shift_ref[...], 0.0)
    o_ref[...] = y[:, :cout]


def _bn_relu(y_flat, scale, shift, *, cout):
    rows, c_p = y_flat.shape
    tile_rows = _pick_tile_rows(rows)
    return pl.pallas_call(
        functools.partial(_bn_relu_kernel, cout=cout),
        grid=(rows // tile_rows,),
        in_specs=[
            pl.BlockSpec((tile_rows, c_p), lambda r: (r, 0)),
            pl.BlockSpec((1, c_p), lambda r: (0, 0)),
            pl.BlockSpec((1, c_p), lambda r: (0, 0)),
        ],
        out_specs=pl.BlockSpec((tile_rows, cout), lambda r: (r, 0)),
        out_shape=jax.ShapeDtypeStruct((rows, cout), jnp.float32),
        compiler_params=pltpu.CompilerParams(
            dimension_semantics=("parallel",),
            vmem_limit_bytes=VMEM_LIMIT_BYTES),
    )(y_flat, scale, shift)


# --------------------------------------------------------------------------- #
# Tiny XLA glue: combine per-tile (mean, M2) -> per-channel scale / shift
# (Chan's parallel-variance combine, all tiles have equal element counts).
# --------------------------------------------------------------------------- #
def _bn_scale_shift(stats, gamma, beta, tile_count, total_count, c_pad):
    means = stats[:, :, 0, :]                      # (n, n_h, c_pad)
    m2s = stats[:, :, 1, :]
    mean = jnp.mean(means, axis=(0, 1))
    m2 = (jnp.sum(m2s, axis=(0, 1))
          + tile_count * jnp.sum(jnp.square(means - mean), axis=(0, 1)))
    var = jnp.maximum(m2 / total_count, 0.0)       # biased variance (BN training)
    inv_std = jax.lax.rsqrt(var + 1e-5)
    g = jnp.pad(gamma, (0, c_pad - gamma.shape[0]))
    b = jnp.pad(beta, (0, c_pad - beta.shape[0]))
    scale = g * inv_std
    shift = b - mean * scale
    return scale.reshape(1, c_pad), shift.reshape(1, c_pad)


# --------------------------------------------------------------------------- #
# Forward pass (ConvBlock.forward equivalent, NCHW in / NCHW out).
# --------------------------------------------------------------------------- #
def conv_block_forward(x_nchw, params, *, tile_h=None):
    n, cin, height, width = x_nchw.shape
    if width % 8:
        # TODO(synk): pad W to a multiple of 8 and mask BN stats for general W.
        raise ValueError("width must be a multiple of 8")

    w1, w2 = params["w1"], params["w2"]            # (9, Cin_p, Cmid_p), (9, Cmid_p, Cout_p)
    cin_p, cmid_p = w1.shape[1], w1.shape[2]
    cout_p = w2.shape[2]
    cout = params["g2"].shape[0]

    if tile_h is None:
        tile_h = _pick_tile_h(height, width, cin_p, max(cmid_p, cout_p))
    assert height % tile_h == 0

    # Single layout change at the boundary: NCHW -> NHWC, pad channels to 128.
    x = jnp.transpose(x_nchw, (0, 2, 3, 1)).astype(jnp.float32)
    x = jnp.pad(x, ((0, 0), (0, 0), (0, 0), (0, cin_p - cin)))

    ones = jnp.ones((1, cin_p), jnp.float32)
    zeros = jnp.zeros((1, cin_p), jnp.float32)
    tile_count = tile_h * width
    total_count = n * height * width

    # Stage 1: conv1 (raw, bf16) + centered BN1 partials.
    y1_raw, st1 = _conv_bn_stage(x, w1, ones, zeros,
                                 tile_h=tile_h, fuse_input_bn=False)
    sc1, sh1 = _bn_scale_shift(st1, params["g1"], params["b1"],
                               tile_count, total_count, cmid_p)

    # Stage 2: BN1+ReLU fused into conv2's input path; conv2 (raw) + BN2 stats.
    y2_raw, st2 = _conv_bn_stage(y1_raw, w2, sc1, sh1,
                                 tile_h=tile_h, fuse_input_bn=True)
    sc2, sh2 = _bn_scale_shift(st2, params["g2"], params["b2"],
                               tile_count, total_count, cout_p)

    # Final BN2 + ReLU over a flattened lane-dense view; writes only `cout` chans.
    y = _bn_relu(y2_raw.reshape(n * height * width, cout_p), sc2, sh2, cout=cout)
    y = y.reshape(n, height, width, cout)
    # TODO(synk): keep NHWC for a fused consumer to avoid this extra HBM pass.
    return jnp.transpose(y, (0, 3, 1, 2))


# --------------------------------------------------------------------------- #
# Parameters: raw PyTorch-layout weights + host-side bf16 packing (9, Cin_p, Cout_p).
# --------------------------------------------------------------------------- #
def init_params(key, in_channels, out_channels, mid_channels=None):
    if not mid_channels:
        mid_channels = out_channels
    k1, k2 = jax.random.split(key)

    def conv_w(k, cin, cout):
        return jax.random.normal(k, (cout, cin, 3, 3), jnp.float32) * 0.1

    return {
        "w1": conv_w(k1, in_channels, mid_channels),
        "g1": jnp.ones((mid_channels,), jnp.float32),
        "b1": jnp.zeros((mid_channels,), jnp.float32),
        "w2": conv_w(k2, mid_channels, out_channels),
        "g2": jnp.ones((out_channels,), jnp.float32),
        "b2": jnp.zeros((out_channels,), jnp.float32),
    }
    # TODO(synk): BatchNorm running_mean/running_var momentum updates (training
    # side effect; does not change the forward output) are not materialized.


def pack_params(raw):
    def pack_w(w):
        cout, cin = w.shape[0], w.shape[1]
        cin_p, cout_p = _round_up(cin, LANES), _round_up(cout, LANES)
        w = jnp.transpose(w, (2, 3, 1, 0))                    # (dy, dx, Cin, Cout)
        w = jnp.pad(w, ((0, 0), (0, 0), (0, cin_p - cin), (0, cout_p - cout)))
        return w.reshape(9, cin_p, cout_p).astype(MXU_DTYPE)  # tap-major, bf16

    return {"w1": pack_w(raw["w1"]), "g1": raw["g1"], "b1": raw["b1"],
            "w2": pack_w(raw["w2"]), "g2": raw["g2"], "b2": raw["b2"]}


# --------------------------------------------------------------------------- #
# Pure-JAX reference (PyTorch semantics) for validation.
# --------------------------------------------------------------------------- #
def _ref_stage(x_nchw, w_oihw, gamma, beta):
    y = jax.lax.conv_general_dilated(
        x_nchw, w_oihw, (1, 1), ((1, 1), (1, 1)),
        dimension_numbers=("NCHW", "OIHW", "NCHW"))
    mean = jnp.mean(y, axis=(0, 2, 3), keepdims=True)
    var = jnp.mean((y - mean) ** 2, axis=(0, 2, 3), keepdims=True)
    y = (y - mean) * jax.lax.rsqrt(var + 1e-5)
    y = y * gamma.reshape(1, -1, 1, 1) + beta.reshape(1, -1, 1, 1)
    return jnp.maximum(y, 0.0)


def _reference(x_nchw, raw):
    y = _ref_stage(x_nchw, raw["w1"], raw["g1"], raw["b1"])
    return _ref_stage(y, raw["w2"], raw["g2"], raw["b2"])


if __name__ == "__main__":
    key = jax.random.PRNGKey(0)
    kx, kp = jax.random.split(key)

    N, Cin, H, W = 2, 4, 16, 16
    Cout = 8
    x = jax.random.normal(kx, (N, Cin, H, W), jnp.float32)
    raw = init_params(kp, in_channels=Cin, out_channels=Cout)
    params = pack_params(raw)

    fwd = jax.jit(functools.partial(conv_block_forward, tile_h=8))
    out = jax.block_until_ready(fwd(x, params))
    assert out.shape == (N, Cout, H, W), out.shape

    ref = jax.block_until_ready(_reference(x, raw))
    assert jnp.allclose(out, ref, atol=5e-2, rtol=5e-2), (
        float(jnp.max(jnp.abs(out - ref))))

    print("KERNEL_OK")
</pallas_src>

<mosaic_0001>
module attributes {stable_mosaic.version = 11 : i64} {
  func.func @_conv_stats_kernel(%arg0: i32, %arg1: i32, %arg2: memref<1x1x16x128xf32, #tpu.memory_space<vmem>>, %arg3: memref<1x8x16x128xf32, #tpu.memory_space<vmem>>, %arg4: memref<1x1x16x128xf32, #tpu.memory_space<vmem>>, %arg5: memref<9x128x128xbf16, #tpu.memory_space<vmem>>, %arg6: memref<1x128xf32, #tpu.memory_space<vmem>>, %arg7: memref<1x128xf32, #tpu.memory_space<vmem>>, %arg8: memref<1x8x16x128xbf16, #tpu.memory_space<vmem>>, %arg9: memref<1x1x2x128xf32, #tpu.memory_space<vmem>>) attributes {dimension_semantics = [#tpu.dimension_semantics<parallel>, #tpu.dimension_semantics<parallel>], iteration_bounds = array<i64: 2, 2>, scalar_prefetch = 0 : i64, scratch_operands = 0 : i64, tpu.core_type = #tpu.core_type<tc>, window_params = [{transform_indices = @transform_0, window_bounds = array<i64: 1, 1, 16, 128>}, {transform_indices = @transform_1, window_bounds = array<i64: 1, 8, 16, 128>}, {transform_indices = @transform_2, window_bounds = array<i64: 1, 1, 16, 128>}, {pipeline_mode = #tpu.pipeline_mode<synchronous>, transform_indices = @transform_3, window_bounds = array<i64: 9, 128, 128>}, {pipeline_mode = #tpu.pipeline_mode<synchronous>, transform_indices = @transform_4, window_bounds = array<i64: 1, 128>}, {pipeline_mode = #tpu.pipeline_mode<synchronous>, transform_indices = @transform_5, window_bounds = array<i64: 1, 128>}, {transform_indices = @transform_6, window_bounds = array<i64: 1, 8, 16, 128>}, {transform_indices = @transform_7, window_bounds = array<i64: 1, 1, 2, 128>}]} {
    %c0_i32 = arith.constant 0 : i32
    %0 = arith.cmpi sgt, %arg1, %c0_i32 : i32
    %cst = arith.constant 1.000000e+00 : f32
    %cst_0 = arith.constant 0.000000e+00 : f32
    %1 = arith.select %0, %cst, %cst_0 : f32
    %c1_i32 = arith.constant 1 : i32
    %2 = arith.cmpi slt, %arg1, %c1_i32 : i32
    %cst_1 = arith.constant 1.000000e+00 : f32
    %cst_2 = arith.constant 0.000000e+00 : f32
    %3 = arith.select %2, %cst_1, %cst_2 : f32
    %c0 = arith.constant 0 : index
    %c0_3 = arith.constant 0 : index
    %c0_4 = arith.constant 0 : index
    %c0_5 = arith.constant 0 : index
    %4 = vector.load %arg2[%c0, %c0_3, %c0_4, %c0_5] : memref<1x1x16x128xf32, #tpu.memory_space<vmem>>, vector<1x1x16x128xf32>
    %5 = vector.shape_cast %4 : vector<1x1x16x128xf32> to vector<1x16x128xf32>
    %6 = vector.broadcast %1 : f32 to vector<1x16x128xf32>
    %7 = arith.mulf %5, %6 : vector<1x16x128xf32>
    %8 = arith.truncf %7 : vector<1x16x128xf32> to vector<1x16x128xbf16>
    %c0_6 = arith.constant 0 : index
    %c0_7 = arith.constant 0 : index
    %c0_8 = arith.constant 0 : index
    %c0_9 = arith.constant 0 : index
    %9 = vector.load %arg3[%c0_6, %c0_7, %c0_8, %c0_9] : memref<1x8x16x128xf32, #tpu.memory_space<vmem>>, vector<1x8x16x128xf32>
    %10 = vector.shape_cast %9 : vector<1x8x16x128xf32> to vector<8x16x128xf32>
    %11 = arith.truncf %10 : vector<8x16x128xf32> to vector<8x16x128xbf16>
    %c0_10 = arith.constant 0 : index
    %c0_11 = arith.constant 0 : index
    %c0_12 = arith.constant 0 : index
    %c0_13 = arith.constant 0 : index
    %12 = vector.load %arg4[%c0_10, %c0_11, %c0_12, %c0_13] : memref<1x1x16x128xf32, #tpu.memory_space<vmem>>, vector<1x1x16x128xf32>
    %13 = vector.shape_cast %12 : vector<1x1x16x128xf32> to vector<1x16x128xf32>
    %14 = vector.broadcast %3 : f32 to vector<1x16x128xf32>
    %15 = arith.mulf %13, %14 : vector<1x16x128xf32>
    %16 = arith.truncf %15 : vector<1x16x128xf32> to vector<1x16x128xbf16>
    %17 = tpu.concatenate %8, %11, %16 in 0 : vector<1x16x128xbf16>, vector<8x16x128xbf16>, vector<1x16x128xbf16> -> vector<10x16x128xbf16>
    %cst_14 = arith.constant 0.000000e+00 : bf16
    %18 = vector.broadcast %cst_14 : bf16 to vector<10x1x128xbf16>
    %19 = vector.extract_strided_slice %17 {offsets = [0, 0, 0], sizes = [10, 15, 128], strides = [1, 1, 1]} : vector<10x16x128xbf16> to vector<10x15x128xbf16>
    %20 = tpu.concatenate %18, %19 in 1 : vector<10x1x128xbf16>, vector<10x15x128xbf16> -> vector<10x16x128xbf16>
    %21 = vector.extract_strided_slice %17 {offsets = [0, 1, 0], sizes = [10, 15, 128], strides = [1, 1, 1]} : vector<10x16x128xbf16> to vector<10x15x128xbf16>
    %22 = tpu.concatenate %21, %18 in 1 : vector<10x15x128xbf16>, vector<10x1x128xbf16> -> vector<10x16x128xbf16>
    %cst_15 = arith.constant 0.000000e+00 : f32
    %23 = vector.broadcast %cst_15 : f32 to vector<128x128xf32>
    %24 = vector.extract_strided_slice %20 {offsets = [0, 0, 0], sizes = [8, 16, 128], strides = [1, 1, 1]} : vector<10x16x128xbf16> to vector<8x16x128xbf16>
    %25 = vector.shape_cast %24 : vector<8x16x128xbf16> to vector<128x128xbf16>
    %c0_16 = arith.constant 0 : index
    %c0_17 = arith.constant 0 : index
    %c0_18 = arith.constant 0 : index
    %26 = vector.load %arg5[%c0_16, %c0_17, %c0_18] : memref<9x128x128xbf16, #tpu.memory_space<vmem>>, vector<1x128x128xbf16>
    %27 = vector.shape_cast %26 : vector<1x128x128xbf16> to vector<128x128xbf16>
    %cst_19 = arith.constant dense<0.000000e+00> : vector<128x128xf32>
    %28 = tpu.matmul %25, %27, %cst_19 {dimension_numbers = #tpu.dot_dimension_numbers<[1], [0], [0], [1], [0, 0, 1, 1], [], []>} : vector<128x128xbf16>, vector<128x128xbf16>, vector<128x128xf32> -> vector<128x128xf32>
    %29 = arith.addf %23, %28 : vector<128x128xf32>
    %30 = vector.extract_strided_slice %20 {offsets = [1, 0, 0], sizes = [8, 16, 128], strides = [1, 1, 1]} : vector<10x16x128xbf16> to vector<8x16x128xbf16>
    %31 = vector.shape_cast %30 : vector<8x16x128xbf16> to vector<128x128xbf16>
    %c3 = arith.constant 3 : index
    %c0_20 = arith.constant 0 : index
    %c0_21 = arith.constant 0 : index
    %32 = vector.load %arg5[%c3, %c0_20, %c0_21] : memref<9x128x128xbf16, #tpu.memory_space<vmem>>, vector<1x128x128xbf16>
    %33 = vector.shape_cast %32 : vector<1x128x128xbf16> to vector<128x128xbf16>
    %cst_22 = arith.constant dense<0.000000e+00> : vector<128x128xf32>
    %34 = tpu.matmul %31, %33, %cst_22 {dimension_numbers = #tpu.dot_dimension_numbers<[1], [0], [0], [1], [0, 0, 1, 1], [], []>} : vector<128x128xbf16>, vector<128x128xbf16>, vector<128x128xf32> -> vector<128x128xf32>
    %35 = arith.addf %29, %34 : vector<128x128xf32>
    %36 = vector.extract_strided_slice %20 {offsets = [2, 0, 0], sizes = [8, 16, 128], strides = [1, 1, 1]} : vector<10x16x128xbf16> to vector<8x16x128xbf16>
    %37 = vector.shape_cast %36 : vector<8x16x128xbf16> to vector<128x128xbf16>
    %c6 = arith.constant 6 : index
    %c0_23 = arith.constant 0 : index
    %c0_24 = arith.constant 0 : index
    %38 = vector.load %arg5[%c6, %c0_23, %c0_24] : memref<9x128x128xbf16, #tpu.memory_space<vmem>>, vector<1x128x128xbf16>
    %39 = vector.shape_cast %38 : vector<1x128x128xbf16> to vector<128x128xbf16>
    %cst_25 = arith.constant dense<0.000000e+00> : vector<128x128xf32>
    %40 = tpu.matmul %37, %39, %cst_25 {dimension_numbers = #tpu.dot_dimension_numbers<[1], [0], [0], [1], [0, 0, 1, 1], [], []>} : vector<128x128xbf16>, vector<128x128xbf16>, vector<128x128xf32> -> vector<128x128xf32>
    %41 = arith.addf %35, %40 : vector<128x128xf32>
    %42 = vector.extract_strided_slice %17 {offsets = [0, 0, 0], sizes = [8, 16, 128], strides = [1, 1, 1]} : vector<10x16x128xbf16> to vector<8x16x128xbf16>
    %43 = vector.shape_cast %42 : vector<8x16x128xbf16> to vector<128x128xbf16>
    %c1 = arith.constant 1 : index
    %c0_26 = arith.constant 0 : index
    %c0_27 = arith.constant 0 : index
    %44 = vector.load %arg5[%c1, %c0_26, %c0_27] : memref<9x128x128xbf16, #tpu.memory_space<vmem>>, vector<1x128x128xbf16>
    %45 = vector.shape_cast %44 : vector<1x128x128xbf16> to vector<128x128xbf16>
    %cst_28 = arith.constant dense<0.000000e+00> : vector<128x128xf32>
    %46 = tpu.matmul %43, %45, %cst_28 {dimension_numbers = #tpu.dot_dimension_numbers<[1], [0], [0], [1], [0, 0, 1, 1], [], []>} : vector<128x128xbf16>, vector<128x128xbf16>, vector<128x128xf32> -> vector<128x128xf32>
    %47 = arith.addf %41, %46 : vector<128x128xf32>
    %48 = vector.extract_strided_slice %17 {offsets = [1, 0, 0], sizes = [8, 16, 128], strides = [1, 1, 1]} : vector<10x16x128xbf16> to vector<8x16x128xbf16>
    %49 = vector.shape_cast %48 : vector<8x16x128xbf16> to vector<128x128xbf16>
    %c4 = arith.constant 4 : index
    %c0_29 = arith.constant 0 : index
    %c0_30 = arith.constant 0 : index
    %50 = vector.load %arg5[%c4, %c0_29, %c0_30] : memref<9x128x128xbf16, #tpu.memory_space<vmem>>, vector<1x128x128xbf16>
    %51 = vector.shape_cast %50 : vector<1x128x128xbf16> to vector<128x128xbf16>
    %cst_31 = arith.constant dense<0.000000e+00> : vector<128x128xf32>
    %52 = tpu.matmul %49, %51, %cst_31 {dimension_numbers = #tpu.dot_dimension_numbers<[1], [0], [0], [1], [0, 0, 1, 1], [], []>} : vector<128x128xbf16>, vector<128x128xbf16>, vector<128x128xf32> -> vector<128x128xf32>
    %53 = arith.addf %47, %52 : vector<128x128xf32>
    %54 = vector.extract_strided_slice %17 {offsets = [2, 0, 0], sizes = [8, 16, 128], strides = [1, 1, 1]} : vector<10x16x128xbf16> to vector<8x16x128xbf16>
    %55 = vector.shape_cast %54 : vector<8x16x128xbf16> to vector<128x128xbf16>
    %c7 = arith.constant 7 : index
    %c0_32 = arith.constant 0 : index
    %c0_33 = arith.constant 0 : index
    %56 = vector.load %arg5[%c7, %c0_32, %c0_33] : memref<9x128x128xbf16, #tpu.memory_space<vmem>>, vector<1x128x128xbf16>
    %57 = vector.shape_cast %56 : vector<1x128x128xbf16> to vector<128x128xbf16>
    %cst_34 = arith.constant dense<0.000000e+00> : vector<128x128xf32>
    %58 = tpu.matmul %55, %57, %cst_34 {dimension_numbers = #tpu.dot_dimension_numbers<[1], [0], [0], [1], [0, 0, 1, 1], [], []>} : vector<128x128xbf16>, vector<128x128xbf16>, vector<128x128xf32> -> vector<128x128xf32>
    %59 = arith.addf %53, %58 : vector<128x128xf32>
    %60 = vector.extract_strided_slice %22 {offsets = [0, 0, 0], sizes = [8, 16, 128], strides = [1, 1, 1]} : vector<10x16x128xbf16> to vector<8x16x128xbf16>
    %61 = vector.shape_cast %60 : vector<8x16x128xbf16> to vector<128x128xbf16>
    %c2 = arith.constant 2 : index
    %c0_35 = arith.constant 0 : index
    %c0_36 = arith.constant 0 : index
    %62 = vector.load %arg5[%c2, %c0_35, %c0_36] : memref<9x128x128xbf16, #tpu.memory_space<vmem>>, vector<1x128x128xbf16>
    %63 = vector.shape_cast %62 : vector<1x128x128xbf16> to vector<128x128xbf16>
    %cst_37 = arith.constant dense<0.000000e+00> : vector<128x128xf32>
    %64 = tpu.matmul %61, %63, %cst_37 {dimension_numbers = #tpu.dot_dimension_numbers<[1], [0], [0], [1], [0, 0, 1, 1], [], []>} : vector<128x128xbf16>, vector<128x128xbf16>, vector<128x128xf32> -> vector<128x128xf32>
    %65 = arith.addf %59, %64 : vector<128x128xf32>
    %66 = vector.extract_strided_slice %22 {offsets = [1, 0, 0], sizes = [8, 16, 128], strides = [1, 1, 1]} : vector<10x16x128xbf16> to vector<8x16x128xbf16>
    %67 = vector.shape_cast %66 : vector<8x16x128xbf16> to vector<128x128xbf16>
    %c5 = arith.constant 5 : index
    %c0_38 = arith.constant 0 : index
    %c0_39 = arith.constant 0 : index
    %68 = vector.load %arg5[%c5, %c0_38, %c0_39] : memref<9x128x128xbf16, #tpu.memory_space<vmem>>, vector<1x128x128xbf16>
    %69 = vector.shape_cast %68 : vector<1x128x128xbf16> to vector<128x128xbf16>
    %cst_40 = arith.constant dense<0.000000e+00> : vector<128x128xf32>
    %70 = tpu.matmul %67, %69, %cst_40 {dimension_numbers = #tpu.dot_dimension_numbers<[1], [0], [0], [1], [0, 0, 1, 1], [], []>} : vector<128x128xbf16>, vector<128x128xbf16>, vector<128x128xf32> -> vector<128x128xf32>
    %71 = arith.addf %65, %70 : vector<128x128xf32>
    %72 = vector.extract_strided_slice %22 {offsets = [2, 0, 0], sizes = [8, 16, 128], strides = [1, 1, 1]} : vector<10x16x128xbf16> to vector<8x16x128xbf16>
    %73 = vector.shape_cast %72 : vector<8x16x128xbf16> to vector<128x128xbf16>
    %c8 = arith.constant 8 : index
    %c0_41 = arith.constant 0 : index
    %c0_42 = arith.constant 0 : index
    %74 = vector.load %arg5[%c8, %c0_41, %c0_42] : memref<9x128x128xbf16, #tpu.memory_space<vmem>>, vector<1x128x128xbf16>
    %75 = vector.shape_cast %74 : vector<1x128x128xbf16> to vector<128x128xbf16>
    %cst_43 = arith.constant dense<0.000000e+00> : vector<128x128xf32>
    %76 = tpu.matmul %73, %75, %cst_43 {dimension_numbers = #tpu.dot_dimension_numbers<[1], [0], [0], [1], [0, 0, 1, 1], [], []>} : vector<128x128xbf16>, vector<128x128xbf16>, vector<128x128xf32> -> vector<128x128xf32>
    %77 = arith.addf %71, %76 : vector<128x128xf32>
    %78 = vector.shape_cast %77 : vector<128x128xf32> to vector<1x8x16x128xf32>
    %79 = arith.truncf %78 : vector<1x8x16x128xf32> to vector<1x8x16x128xbf16>
    %c0_44 = arith.constant 0 : index
    %c0_45 = arith.constant 0 : index
    %c0_46 = arith.constant 0 : index
    %c0_47 = arith.constant 0 : index
    %80 = vector.load %arg8[%c0_44, %c0_45, %c0_46, %c0_47] : memref<1x8x16x128xbf16, #tpu.memory_space<vmem>>, vector<1x8x16x128xbf16>
    tpu.vector_store %arg8[%c0_44, %c0_45, %c0_46, %c0_47], %79 {strides = array<i32>} : memref<1x8x16x128xbf16, #tpu.memory_space<vmem>>, vector<1x8x16x128xbf16>,
    %cst_48 = arith.constant dense<0.000000e+00> : vector<128xf32>
    %81 = vector.multi_reduction <add>, %77, %cst_48 [0] : vector<128x128xf32> to vector<128xf32>
    %82 = vector.shape_cast %81 : vector<128xf32> to vector<1x128xf32>
    %cst_49 = arith.constant 7.812500e-03 : f32
    %83 = vector.broadcast %cst_49 : f32 to vector<1x128xf32>
    %84 = arith.mulf %82, %83 : vector<1x128xf32>
    %85 = vector.broadcast %84 : vector<1x128xf32> to vector<128x128xf32>
    %86 = arith.subf %77, %85 : vector<128x128xf32>
    %87 = arith.mulf %86, %86 : vector<128x128xf32>
    %cst_50 = arith.constant dense<0.000000e+00> : vector<128xf32>
    %88 = vector.multi_reduction <add>, %87, %cst_50 [0] : vector<128x128xf32> to vector<128xf32>
    %89 = vector.shape_cast %88 : vector<128xf32> to vector<1x128xf32>
    %90 = tpu.concatenate %84, %89 in 0 : vector<1x128xf32>, vector<1x128xf32> -> vector<2x128xf32>
    %91 = vector.shape_cast %90 : vector<2x128xf32> to vector<1x1x2x128xf32>
    %c0_51 = arith.constant 0 : index
    %c0_52 = arith.constant 0 : index
    %c0_53 = arith.constant 0 : index
    %c0_54 = arith.constant 0 : index
    %92 = vector.load %arg9[%c0_51, %c0_52, %c0_53, %c0_54] : memref<1x1x2x128xf32, #tpu.memory_space<vmem>>, vector<1x1x2x128xf32>
    tpu.vector_store %arg9[%c0_51, %c0_52, %c0_53, %c0_54], %91 {strides = array<i32>} : memref<1x1x2x128xf32, #tpu.memory_space<vmem>>, vector<1x1x2x128xf32>,
    return
  }
  func.func @transform_0(%arg0: i32, %arg1: i32) -> (i32, i32, i32, i32) {
    %c8_i32 = arith.constant 8 : i32
    %0 = arith.muli %arg1, %c8_i32 : i32
    %c1_i32 = arith.constant 1 : i32
    %1 = arith.subi %0, %c1_i32 : i32
    %c0_i32 = arith.constant 0 : i32
    %2 = arith.maxsi %1, %c0_i32 : i32
    %c0_i32_0 = arith.constant 0 : i32
    %c0_i32_1 = arith.constant 0 : i32
    %c0_i32_2 = arith.constant 0 : i32
    return %arg0, %2, %c0_i32_0, %c0_i32_1 : i32, i32, i32, i32
  }
  func.func @transform_1(%arg0: i32, %arg1: i32) -> (i32, i32, i32, i32) {
    %c0_i32 = arith.constant 0 : i32
    %c0_i32_0 = arith.constant 0 : i32
    %c0_i32_1 = arith.constant 0 : i32
    return %arg0, %arg1, %c0_i32, %c0_i32_0 : i32, i32, i32, i32
  }
  func.func @transform_2(%arg0: i32, %arg1: i32) -> (i32, i32, i32, i32) {
    %c1_i32 = arith.constant 1 : i32
    %0 = arith.addi %arg1, %c1_i32 : i32
    %c8_i32 = arith.constant 8 : i32
    %1 = arith.muli %0, %c8_i32 : i32
    %c15_i32 = arith.constant 15 : i32
    %2 = arith.minsi %1, %c15_i32 : i32
    %c0_i32 = arith.constant 0 : i32
    %c0_i32_0 = arith.constant 0 : i32
    %c0_i32_1 = arith.constant 0 : i32
    return %arg0, %2, %c0_i32, %c0_i32_0 : i32, i32, i32, i32
  }
  func.func @transform_3(%arg0: i32, %arg1: i32) -> (i32, i32, i32) {
    %c0_i32 = arith.constant 0 : i32
    %c0_i32_0 = arith.constant 0 : i32
    %c0_i32_1 = arith.constant 0 : i32
    %c0_i32_2 = arith.constant 0 : i32
    return %c0_i32, %c0_i32_0, %c0_i32_1 : i32, i32, i32
  }
  func.func @transform_4(%arg0: i32, %arg1: i32) -> (i32, i32) {
    %c0_i32 = arith.constant 0 : i32
    %c0_i32_0 = arith.constant 0 : i32
    %c0_i32_1 = arith.constant 0 : i32
    return %c0_i32, %c0_i32_0 : i32, i32
  }
  func.func @transform_5(%arg0: i32, %arg1: i32) -> (i32, i32) {
    %c0_i32 = arith.constant 0 : i32
    %c0_i32_0 = arith.constant 0 : i32
    %c0_i32_1 = arith.constant 0 : i32
    return %c0_i32, %c0_i32_0 : i32, i32
  }
  func.func @transform_6(%arg0: i32, %arg1: i32) -> (i32, i32, i32, i32) {
    %c0_i32 = arith.constant 0 : i32
    %c0_i32_0 = arith.constant 0 : i32
    %c0_i32_1 = arith.constant 0 : i32
    return %arg0, %arg1, %c0_i32, %c0_i32_0 : i32, i32, i32, i32
  }
  func.func @transform_7(%arg0: i32, %arg1: i32) -> (i32, i32, i32, i32) {
    %c0_i32 = arith.constant 0 : i32
    %c0_i32_0 = arith.constant 0 : i32
    %c0_i32_1 = arith.constant 0 : i32
    return %arg0, %arg1, %c0_i32, %c0_i32_0 : i32, i32, i32, i32
  }
}

module attributes {stable_mosaic.version = 11 : i64} {
  func.func @_bn_relu_kernel(%arg0: i32, %arg1: memref<512x128xbf16, #tpu.memory_space<vmem>>, %arg2: memref<1x128xf32, #tpu.memory_space<vmem>>, %arg3: memref<1x128xf32, #tpu.memory_space<vmem>>, %arg4: memref<512x8xf32, #tpu.memory_space<vmem>>) attributes {dimension_semantics = [#tpu.dimension_semantics<parallel>], iteration_bounds = array<i64: 1>, scalar_prefetch = 0 : i64, scratch_operands = 0 : i64, tpu.core_type = #tpu.core_type<tc>, window_params = [{transform_indices = @transform_0, window_bounds = array<i64: 512, 128>}, {pipeline_mode = #tpu.pipeline_mode<synchronous>, transform_indices = @transform_1, window_bounds = array<i64: 1, 128>}, {pipeline_mode = #tpu.pipeline_mode<synchronous>, transform_indices = @transform_2, window_bounds = array<i64: 1, 128>}, {transform_indices = @transform_3, window_bounds = array<i64: 512, 8>}]} {
    %c0 = arith.constant 0 : index
    %c0_0 = arith.constant 0 : index
    %0 = vector.load %arg1[%c0, %c0_0] : memref<512x128xbf16, #tpu.memory_space<vmem>>, vector<512x128xbf16>
    %1 = arith.extf %0 : vector<512x128xbf16> to vector<512x128xf32>
    %c0_1 = arith.constant 0 : index
    %c0_2 = arith.constant 0 : index
    %2 = vector.load %arg2[%c0_1, %c0_2] : memref<1x128xf32, #tpu.memory_space<vmem>>, vector<1x128xf32>
    %3 = vector.broadcast %2 : vector<1x128xf32> to vector<512x128xf32>
    %4 = arith.mulf %1, %3 : vector<512x128xf32>
    %c0_3 = arith.constant 0 : index
    %c0_4 = arith.constant 0 : index
    %5 = vector.load %arg3[%c0_3, %c0_4] : memref<1x128xf32, #tpu.memory_space<vmem>>, vector<1x128xf32>
    %6 = vector.broadcast %5 : vector<1x128xf32> to vector<512x128xf32>
    %7 = arith.addf %4, %6 : vector<512x128xf32>
    %cst = arith.constant 0.000000e+00 : f32
    %8 = vector.broadcast %cst : f32 to vector<512x128xf32>
    %9 = arith.maximumf %7, %8 : vector<512x128xf32>
    %10 = vector.extract_strided_slice %9 {offsets = [0, 0], sizes = [512, 8], strides = [1, 1]} : vector<512x128xf32> to vector<512x8xf32>
    %c0_5 = arith.constant 0 : index
    %c0_6 = arith.constant 0 : index
    %11 = vector.load %arg4[%c0_5, %c0_6] : memref<512x8xf32, #tpu.memory_space<vmem>>, vector<512x8xf32>
    tpu.vector_store %arg4[%c0_5, %c0_6], %10 {strides = array<i32>} : memref<512x8xf32, #tpu.memory_space<vmem>>, vector<512x8xf32>,
    return
  }
  func.func @transform_0(%arg0: i32) -> (i32, i32) {
    %c0_i32 = arith.constant 0 : i32
    %c0_i32_0 = arith.constant 0 : i32
    return %arg0, %c0_i32 : i32, i32
  }
  func.func @transform_1(%arg0: i32) -> (i32, i32) {
    %c0_i32 = arith.constant 0 : i32
    %c0_i32_0 = arith.constant 0 : i32
    %c0_i32_1 = arith.constant 0 : i32
    return %c0_i32, %c0_i32_0 : i32, i32
  }
  func.func @transform_2(%arg0: i32) -> (i32, i32) {
    %c0_i32 = arith.constant 0 : i32
    %c0_i32_0 = arith.constant 0 : i32
    %c0_i32_1 = arith.constant 0 : i32
    return %c0_i32, %c0_i32_0 : i32, i32
  }
  func.func @transform_3(%arg0: i32) -> (i32, i32) {
    %c0_i32 = arith.constant 0 : i32
    %c0_i32_0 = arith.constant 0 : i32
    return %arg0, %c0_i32 : i32, i32
  }
}

module attributes {stable_mosaic.version = 11 : i64} {
  func.func @_conv_stats_kernel(%arg0: i32, %arg1: i32, %arg2: memref<1x1x16x128xbf16, #tpu.memory_space<vmem>>, %arg3: memref<1x8x16x128xbf16, #tpu.memory_space<vmem>>, %arg4: memref<1x1x16x128xbf16, #tpu.memory_space<vmem>>, %arg5: memref<9x128x128xbf16, #tpu.memory_space<vmem>>, %arg6: memref<1x128xf32, #tpu.memory_space<vmem>>, %arg7: memref<1x128xf32, #tpu.memory_space<vmem>>, %arg8: memref<1x8x16x128xbf16, #tpu.memory_space<vmem>>, %arg9: memref<1x1x2x128xf32, #tpu.memory_space<vmem>>) attributes {dimension_semantics = [#tpu.dimension_semantics<parallel>, #tpu.dimension_semantics<parallel>], iteration_bounds = array<i64: 2, 2>, scalar_prefetch = 0 : i64, scratch_operands = 0 : i64, tpu.core_type = #tpu.core_type<tc>, window_params = [{transform_indices = @transform_0, window_bounds = array<i64: 1, 1, 16, 128>}, {transform_indices = @transform_1, window_bounds = array<i64: 1, 8, 16, 128>}, {transform_indices = @transform_2, window_bounds = array<i64: 1, 1, 16, 128>}, {pipeline_mode = #tpu.pipeline_mode<synchronous>, transform_indices = @transform_3, window_bounds = array<i64: 9, 128, 128>}, {pipeline_mode = #tpu.pipeline_mode<synchronous>, transform_indices = @transform_4, window_bounds = array<i64: 1, 128>}, {pipeline_mode = #tpu.pipeline_mode<synchronous>, transform_indices = @transform_5, window_bounds = array<i64: 1, 128>}, {transform_indices = @transform_6, window_bounds = array<i64: 1, 8, 16, 128>}, {transform_indices = @transform_7, window_bounds = array<i64: 1, 1, 2, 128>}]} {
    %c0_i32 = arith.constant 0 : i32
    %0 = arith.cmpi sgt, %arg1, %c0_i32 : i32
    %cst = arith.constant 1.000000e+00 : f32
    %cst_0 = arith.constant 0.000000e+00 : f32
    %1 = arith.select %0, %cst, %cst_0 : f32
    %c1_i32 = arith.constant 1 : i32
    %2 = arith.cmpi slt, %arg1, %c1_i32 : i32
    %cst_1 = arith.constant 1.000000e+00 : f32
    %cst_2 = arith.constant 0.000000e+00 : f32
    %3 = arith.select %2, %cst_1, %cst_2 : f32
    %c0 = arith.constant 0 : index
    %c0_3 = arith.constant 0 : index
    %c0_4 = arith.constant 0 : index
    %c0_5 = arith.constant 0 : index
    %4 = vector.load %arg2[%c0, %c0_3, %c0_4, %c0_5] : memref<1x1x16x128xbf16, #tpu.memory_space<vmem>>, vector<1x1x16x128xbf16>
    %5 = vector.shape_cast %4 : vector<1x1x16x128xbf16> to vector<1x16x128xbf16>
    %6 = arith.extf %5 : vector<1x16x128xbf16> to vector<1x16x128xf32>
    %c0_6 = arith.constant 0 : index
    %c0_7 = arith.constant 0 : index
    %7 = vector.load %arg6[%c0_6, %c0_7] : memref<1x128xf32, #tpu.memory_space<vmem>>, vector<1x128xf32>
    %8 = vector.shape_cast %7 : vector<1x128xf32> to vector<1x1x128xf32>
    %9 = vector.broadcast %8 : vector<1x1x128xf32> to vector<1x16x128xf32>
    %10 = arith.mulf %6, %9 : vector<1x16x128xf32>
    %c0_8 = arith.constant 0 : index
    %c0_9 = arith.constant 0 : index
    %11 = vector.load %arg7[%c0_8, %c0_9] : memref<1x128xf32, #tpu.memory_space<vmem>>, vector<1x128xf32>
    %12 = vector.shape_cast %11 : vector<1x128xf32> to vector<1x1x128xf32>
    %13 = vector.broadcast %12 : vector<1x1x128xf32> to vector<1x16x128xf32>
    %14 = arith.addf %10, %13 : vector<1x16x128xf32>
    %cst_10 = arith.constant 0.000000e+00 : f32
    %15 = vector.broadcast %cst_10 : f32 to vector<1x16x128xf32>
    %16 = arith.maximumf %14, %15 : vector<1x16x128xf32>
    %17 = vector.broadcast %1 : f32 to vector<1x16x128xf32>
    %18 = arith.mulf %16, %17 : vector<1x16x128xf32>
    %19 = arith.truncf %18 : vector<1x16x128xf32> to vector<1x16x128xbf16>
    %c0_11 = arith.constant 0 : index
    %c0_12 = arith.constant 0 : index
    %c0_13 = arith.constant 0 : index
    %c0_14 = arith.constant 0 : index
    %20 = vector.load %arg3[%c0_11, %c0_12, %c0_13, %c0_14] : memref<1x8x16x128xbf16, #tpu.memory_space<vmem>>, vector<1x8x16x128xbf16>
    %21 = vector.shape_cast %20 : vector<1x8x16x128xbf16> to vector<8x16x128xbf16>
    %22 = arith.extf %21 : vector<8x16x128xbf16> to vector<8x16x128xf32>
    %c0_15 = arith.constant 0 : index
    %c0_16 = arith.constant 0 : index
    %23 = vector.load %arg6[%c0_15, %c0_16] : memref<1x128xf32, #tpu.memory_space<vmem>>, vector<1x128xf32>
    %24 = vector.shape_cast %23 : vector<1x128xf32> to vector<1x1x128xf32>
    %25 = vector.broadcast %24 : vector<1x1x128xf32> to vector<8x16x128xf32>
    %26 = arith.mulf %22, %25 : vector<8x16x128xf32>
    %c0_17 = arith.constant 0 : index
    %c0_18 = arith.constant 0 : index
    %27 = vector.load %arg7[%c0_17, %c0_18] : memref<1x128xf32, #tpu.memory_space<vmem>>, vector<1x128xf32>
    %28 = vector.shape_cast %27 : vector<1x128xf32> to vector<1x1x128xf32>
    %29 = vector.broadcast %28 : vector<1x1x128xf32> to vector<8x16x128xf32>
    %30 = arith.addf %26, %29 : vector<8x16x128xf32>
    %cst_19 = arith.constant 0.000000e+00 : f32
    %31 = vector.broadcast %cst_19 : f32 to vector<8x16x128xf32>
    %32 = arith.maximumf %30, %31 : vector<8x16x128xf32>
    %33 = arith.truncf %32 : vector<8x16x128xf32> to vector<8x16x128xbf16>
    %c0_20 = arith.constant 0 : index
    %c0_21 = arith.constant 0 : index
    %c0_22 = arith.constant 0 : index
    %c0_23 = arith.constant 0 : index
    %34 = vector.load %arg4[%c0_20, %c0_21, %c0_22, %c0_23] : memref<1x1x16x128xbf16, #tpu.memory_space<vmem>>, vector<1x1x16x128xbf16>
    %35 = vector.shape_cast %34 : vector<1x1x16x128xbf16> to vector<1x16x128xbf16>
    %36 = arith.extf %35 : vector<1x16x128xbf16> to vector<1x16x128xf32>
    %c0_24 = arith.constant 0 : index
    %c0_25 = arith.constant 0 : index
    %37 = vector.load %arg6[%c0_24, %c0_25] : memref<1x128xf32, #tpu.memory_space<vmem>>, vector<1x128xf32>
    %38 = vector.shape_cast %37 : vector<1x128xf32> to vector<1x1x128xf32>
    %39 = vector.broadcast %38 : vector<1x1x128xf32> to vector<1x16x128xf32>
    %40 = arith.mulf %36, %39 : vector<1x16x128xf32>
    %c0_26 = arith.constant 0 : index
    %c0_27 = arith.constant 0 : index
    %41 = vector.load %arg7[%c0_26, %c0_27] : memref<1x128xf32, #tpu.memory_space<vmem>>, vector<1x128xf32>
    %42 = vector.shape_cast %41 : vector<1x128xf32> to vector<1x1x128xf32>
    %43 = vector.broadcast %42 : vector<1x1x128xf32> to vector<1x16x128xf32>
    %44 = arith.addf %40, %43 : vector<1x16x128xf32>
    %cst_28 = arith.constant 0.000000e+00 : f32
    %45 = vector.broadcast %cst_28 : f32 to vector<1x16x128xf32>
    %46 = arith.maximumf %44, %45 : vector<1x16x128xf32>
    %47 = vector.broadcast %3 : f32 to vector<1x16x128xf32>
    %48 = arith.mulf %46, %47 : vector<1x16x128xf32>
    %49 = arith.truncf %48 : vector<1x16x128xf32> to vector<1x16x128xbf16>
    %50 = tpu.concatenate %19, %33, %49 in 0 : vector<1x16x128xbf16>, vector<8x16x128xbf16>, vector<1x16x128xbf16> -> vector<10x16x128xbf16>
    %cst_29 = arith.constant 0.000000e+00 : bf16
    %51 = vector.broadcast %cst_29 : bf16 to vector<10x1x128xbf16>
    %52 = vector.extract_strided_slice %50 {offsets = [0, 0, 0], sizes = [10, 15, 128], strides = [1, 1, 1]} : vector<10x16x128xbf16> to vector<10x15x128xbf16>
    %53 = tpu.concatenate %51, %52 in 1 : vector<10x1x128xbf16>, vector<10x15x128xbf16> -> vector<10x16x128xbf16>
    %54 = vector.extract_strided_slice %50 {offsets = [0, 1, 0], sizes = [10, 15, 128], strides = [1, 1, 1]} : vector<10x16x128xbf16> to vector<10x15x128xbf16>
    %55 = tpu.concatenate %54, %51 in 1 : vector<10x15x128xbf16>, vector<10x1x128xbf16> -> vector<10x16x128xbf16>
    %cst_30 = arith.constant 0.000000e+00 : f32
    %56 = vector.broadcast %cst_30 : f32 to vector<128x128xf32>
    %57 = vector.extract_strided_slice %53 {offsets = [0, 0, 0], sizes = [8, 16, 128], strides = [1, 1, 1]} : vector<10x16x128xbf16> to vector<8x16x128xbf16>
    %58 = vector.shape_cast %57 : vector<8x16x128xbf16> to vector<128x128xbf16>
    %c0_31 = arith.constant 0 : index
    %c0_32 = arith.constant 0 : index
    %c0_33 = arith.constant 0 : index
    %59 = vector.load %arg5[%c0_31, %c0_32, %c0_33] : memref<9x128x128xbf16, #tpu.memory_space<vmem>>, vector<1x128x128xbf16>
    %60 = vector.shape_cast %59 : vector<1x128x128xbf16> to vector<128x128xbf16>
    %cst_34 = arith.constant dense<0.000000e+00> : vector<128x128xf32>
    %61 = tpu.matmul %58, %60, %cst_34 {dimension_numbers = #tpu.dot_dimension_numbers<[1], [0], [0], [1], [0, 0, 1, 1], [], []>} : vector<128x128xbf16>, vector<128x128xbf16>, vector<128x128xf32> -> vector<128x128xf32>
    %62 = arith.addf %56, %61 : vector<128x128xf32>
    %63 = vector.extract_strided_slice %53 {offsets = [1, 0, 0], sizes = [8, 16, 128], strides = [1, 1, 1]} : vector<10x16x128xbf16> to vector<8x16x128xbf16>
    %64 = vector.shape_cast %63 : vector<8x16x128xbf16> to vector<128x128xbf16>
    %c3 = arith.constant 3 : index
    %c0_35 = arith.constant 0 : index
    %c0_36 = arith.constant 0 : index
    %65 = vector.load %arg5[%c3, %c0_35, %c0_36] : memref<9x128x128xbf16, #tpu.memory_space<vmem>>, vector<1x128x128xbf16>
    %66 = vector.shape_cast %65 : vector<1x128x128xbf16> to vector<128x128xbf16>
    %cst_37 = arith.constant dense<0.000000e+00> : vector<128x128xf32>
    %67 = tpu.matmul %64, %66, %cst_37 {dimension_numbers = #tpu.dot_dimension_numbers<[1], [0], [0], [1], [0, 0, 1, 1], [], []>} : vector<128x128xbf16>, vector<128x128xbf16>, vector<128x128xf32> -> vector<128x128xf32>
    %68 = arith.addf %62, %67 : vector<128x128xf32>
    %69 = vector.extract_strided_slice %53 {offsets = [2, 0, 0], sizes = [8, 16, 128], strides = [1, 1, 1]} : vector<10x16x128xbf16> to vector<8x16x128xbf16>
    %70 = vector.shape_cast %69 : vector<8x16x128xbf16> to vector<128x128xbf16>
    %c6 = arith.constant 6 : index
    %c0_38 = arith.constant 0 : index
    %c0_39 = arith.constant 0 : index
    %71 = vector.load %arg5[%c6, %c0_38, %c0_39] : memref<9x128x128xbf16, #tpu.memory_space<vmem>>, vector<1x128x128xbf16>
    %72 = vector.shape_cast %71 : vector<1x128x128xbf16> to vector<128x128xbf16>
    %cst_40 = arith.constant dense<0.000000e+00> : vector<128x128xf32>
    %73 = tpu.matmul %70, %72, %cst_40 {dimension_numbers = #tpu.dot_dimension_numbers<[1], [0], [0], [1], [0, 0, 1, 1], [], []>} : vector<128x128xbf16>, vector<128x128xbf16>, vector<128x128xf32> -> vector<128x128xf32>
    %74 = arith.addf %68, %73 : vector<128x128xf32>
    %75 = vector.extract_strided_slice %50 {offsets = [0, 0, 0], sizes = [8, 16, 128], strides = [1, 1, 1]} : vector<10x16x128xbf16> to vector<8x16x128xbf16>
    %76 = vector.shape_cast %75 : vector<8x16x128xbf16> to vector<128x128xbf16>
    %c1 = arith.constant 1 : index
    %c0_41 = arith.constant 0 : index
    %c0_42 = arith.constant 0 : index
    %77 = vector.load %arg5[%c1, %c0_41, %c0_42] : memref<9x128x128xbf16, #tpu.memory_space<vmem>>, vector<1x128x128xbf16>
    %78 = vector.shape_cast %77 : vector<1x128x128xbf16> to vector<128x128xbf16>
    %cst_43 = arith.constant dense<0.000000e+00> : vector<128x128xf32>
    %79 = tpu.matmul %76, %78, %cst_43 {dimension_numbers = #tpu.dot_dimension_numbers<[1], [0], [0], [1], [0, 0, 1, 1], [], []>} : vector<128x128xbf16>, vector<128x128xbf16>, vector<128x128xf32> -> vector<128x128xf32>
    %80 = arith.addf %74, %79 : vector<128x128xf32>
    %81 = vector.extract_strided_slice %50 {offsets = [1, 0, 0], sizes = [8, 16, 128], strides = [1, 1, 1]} : vector<10x16x128xbf16> to vector<8x16x128xbf16>
    %82 = vector.shape_cast %81 : vector<8x16x128xbf16> to vector<128x128xbf16>
    %c4 = arith.constant 4 : index
    %c0_44 = arith.constant 0 : index
    %c0_45 = arith.constant 0 : index
    %83 = vector.load %arg5[%c4, %c0_44, %c0_45] : memref<9x128x128xbf16, #tpu.memory_space<vmem>>, vector<1x128x128xbf16>
    %84 = vector.shape_cast %83 : vector<1x128x128xbf16> to vector<128x128xbf16>
    %cst_46 = arith.constant dense<0.000000e+00> : vector<128x128xf32>
    %85 = tpu.matmul %82, %84, %cst_46 {dimension_numbers = #tpu.dot_dimension_numbers<[1], [0], [0], [1], [0, 0, 1, 1], [], []>} : vector<128x128xbf16>, vector<128x128xbf16>, vector<128x128xf32> -> vector<128x128xf32>
    %86 = arith.addf %80, %85 : vector<128x128xf32>
    %87 = vector.extract_strided_slice %50 {offsets = [2, 0, 0], sizes = [8, 16, 128], strides = [1, 1, 1]} : vector<10x16x128xbf16> to vector<8x16x128xbf16>
    %88 = vector.shape_cast %87 : vector<8x16x128xbf16> to vector<128x128xbf16>
    %c7 = arith.constant 7 : index
    %c0_47 = arith.constant 0 : index
    %c0_48 = arith.constant 0 : index
    %89 = vector.load %arg5[%c7, %c0_47, %c0_48] : memref<9x128x128xbf16, #tpu.memory_space<vmem>>, vector<1x128x128xbf16>
    %90 = vector.shape_cast %89 : vector<1x128x128xbf16> to vector<128x128xbf16>
    %cst_49 = arith.constant dense<0.000000e+00> : vector<128x128xf32>
    %91 = tpu.matmul %88, %90, %cst_49 {dimension_numbers = #tpu.dot_dimension_numbers<[1], [0], [0], [1], [0, 0, 1, 1], [], []>} : vector<128x128xbf16>, vector<128x128xbf16>, vector<128x128xf32> -> vector<128x128xf32>
    %92 = arith.addf %86, %91 : vector<128x128xf32>
    %93 = vector.extract_strided_slice %55 {offsets = [0, 0, 0], sizes = [8, 16, 128], strides = [1, 1, 1]} : vector<10x16x128xbf16> to vector<8x16x128xbf16>
    %94 = vector.shape_cast %93 : vector<8x16x128xbf16> to vector<128x128xbf16>
    %c2 = arith.constant 2 : index
    %c0_50 = arith.constant 0 : index
    %c0_51 = arith.constant 0 : index
    %95 = vector.load %arg5[%c2, %c0_50, %c0_51] : memref<9x128x128xbf16, #tpu.memory_space<vmem>>, vector<1x128x128xbf16>
    %96 = vector.shape_cast %95 : vector<1x128x128xbf16> to vector<128x128xbf16>
    %cst_52 = arith.constant dense<0.000000e+00> : vector<128x128xf32>
    %97 = tpu.matmul %94, %96, %cst_52 {dimension_numbers = #tpu.dot_dimension_numbers<[1], [0], [0], [1], [0, 0, 1, 1], [], []>} : vector<128x128xbf16>, vector<128x128xbf16>, vector<128x128xf32> -> vector<128x128xf32>
    %98 = arith.addf %92, %97 : vector<128x128xf32>
    %99 = vector.extract_strided_slice %55 {offsets = [1, 0, 0], sizes = [8, 16, 128], strides = [1, 1, 1]} : vector<10x16x128xbf16> to vector<8x16x128xbf16>
    %100 = vector.shape_cast %99 : vector<8x16x128xbf16> to vector<128x128xbf16>
    %c5 = arith.constant 5 : index
    %c0_53 = arith.constant 0 : index
    %c0_54 = arith.constant 0 : index
    %101 = vector.load %arg5[%c5, %c0_53, %c0_54] : memref<9x128x128xbf16, #tpu.memory_space<vmem>>, vector<1x128x128xbf16>
    %102 = vector.shape_cast %101 : vector<1x128x128xbf16> to vector<128x128xbf16>
    %cst_55 = arith.constant dense<0.000000e+00> : vector<128x128xf32>
    %103 = tpu.matmul %100, %102, %cst_55 {dimension_numbers = #tpu.dot_dimension_numbers<[1], [0], [0], [1], [0, 0, 1, 1], [], []>} : vector<128x128xbf16>, vector<128x128xbf16>, vector<128x128xf32> -> vector<128x128xf32>
    %104 = arith.addf %98, %103 : vector<128x128xf32>
    %105 = vector.extract_strided_slice %55 {offsets = [2, 0, 0], sizes = [8, 16, 128], strides = [1, 1, 1]} : vector<10x16x128xbf16> to vector<8x16x128xbf16>
    %106 = vector.shape_cast %105 : vector<8x16x128xbf16> to vector<128x128xbf16>
    %c8 = arith.constant 8 : index
    %c0_56 = arith.constant 0 : index
    %c0_57 = arith.constant 0 : index
    %107 = vector.load %arg5[%c8, %c0_56, %c0_57] : memref<9x128x128xbf16, #tpu.memory_space<vmem>>, vector<1x128x128xbf16>
    %108 = vector.shape_cast %107 : vector<1x128x128xbf16> to vector<128x128xbf16>
    %cst_58 = arith.constant dense<0.000000e+00> : vector<128x128xf32>
    %109 = tpu.matmul %106, %108, %cst_58 {dimension_numbers = #tpu.dot_dimension_numbers<[1], [0], [0], [1], [0, 0, 1, 1], [], []>} : vector<128x128xbf16>, vector<128x128xbf16>, vector<128x128xf32> -> vector<128x128xf32>
    %110 = arith.addf %104, %109 : vector<128x128xf32>
    %111 = vector.shape_cast %110 : vector<128x128xf32> to vector<1x8x16x128xf32>
    %112 = arith.truncf %111 : vector<1x8x16x128xf32> to vector<1x8x16x128xbf16>
    %c0_59 = arith.constant 0 : index
    %c0_60 = arith.constant 0 : index
    %c0_61 = arith.constant 0 : index
    %c0_62 = arith.constant 0 : index
    %113 = vector.load %arg8[%c0_59, %c0_60, %c0_61, %c0_62] : memref<1x8x16x128xbf16, #tpu.memory_space<vmem>>, vector<1x8x16x128xbf16>
    tpu.vector_store %arg8[%c0_59, %c0_60, %c0_61, %c0_62], %112 {strides = array<i32>} : memref<1x8x16x128xbf16, #tpu.memory_space<vmem>>, vector<1x8x16x128xbf16>,
    %cst_63 = arith.constant dense<0.000000e+00> : vector<128xf32>
    %114 = vector.multi_reduction <add>, %110, %cst_63 [0] : vector<128x128xf32> to vector<128xf32>
    %115 = vector.shape_cast %114 : vector<128xf32> to vector<1x128xf32>
    %cst_64 = arith.constant 7.812500e-03 : f32
    %116 = vector.broadcast %cst_64 : f32 to vector<1x128xf32>
    %117 = arith.mulf %115, %116 : vector<1x128xf32>
    %118 = vector.broadcast %117 : vector<1x128xf32> to vector<128x128xf32>
    %119 = arith.subf %110, %118 : vector<128x128xf32>
    %120 = arith.mulf %119, %119 : vector<128x128xf32>
    %cst_65 = arith.constant dense<0.000000e+00> : vector<128xf32>
    %121 = vector.multi_reduction <add>, %120, %cst_65 [0] : vector<128x128xf32> to vector<128xf32>
    %122 = vector.shape_cast %121 : vector<128xf32> to vector<1x128xf32>
    %123 = tpu.concatenate %117, %122 in 0 : vector<1x128xf32>, vector<1x128xf32> -> vector<2x128xf32>
    %124 = vector.shape_cast %123 : vector<2x128xf32> to vector<1x1x2x128xf32>
    %c0_66 = arith.constant 0 : index
    %c0_67 = arith.constant 0 : index
    %c0_68 = arith.constant 0 : index
    %c0_69 = arith.constant 0 : index
    %125 = vector.load %arg9[%c0_66, %c0_67, %c0_68, %c0_69] : memref<1x1x2x128xf32, #tpu.memory_space<vmem>>, vector<1x1x2x128xf32>
    tpu.vector_store %arg9[%c0_66, %c0_67, %c0_68, %c0_69], %124 {strides = array<i32>} : memref<1x1x2x128xf32, #tpu.memory_space<vmem>>, vector<1x1x2x128xf32>,
    return
  }
  func.func @transform_0(%arg0: i32, %arg1: i32) -> (i32, i32, i32, i32) {
    %c8_i32 = arith.constant 8 : i32
    %0 = arith.muli %arg1, %c8_i32 : i32
    %c1_i32 = arith.constant 1 : i32
    %1 = arith.subi %0, %c1_i32 : i32
    %c0_i32 = arith.constant 0 : i32
    %2 = arith.maxsi %1, %c0_i32 : i32
    %c0_i32_0 = arith.constant 0 : i32
    %c0_i32_1 = arith.constant 0 : i32
    %c0_i32_2 = arith.constant 0 : i32
    return %arg0, %2, %c0_i32_0, %c0_i32_1 : i32, i32, i32, i32
  }
  func.func @transform_1(%arg0: i32, %arg1: i32) -> (i32, i32, i32, i32) {
    %c0_i32 = arith.constant 0 : i32
    %c0_i32_0 = arith.constant 0 : i32
    %c0_i32_1 = arith.constant 0 : i32
    return %arg0, %arg1, %c0_i32, %c0_i32_0 : i32, i32, i32, i32
  }
  func.func @transform_2(%arg0: i32, %arg1: i32) -> (i32, i32, i32, i32) {
    %c1_i32 = arith.constant 1 : i32
    %0 = arith.addi %arg1, %c1_i32 : i32
    %c8_i32 = arith.constant 8 : i32
    %1 = arith.muli %0, %c8_i32 : i32
    %c15_i32 = arith.constant 15 : i32
    %2 = arith.minsi %1, %c15_i32 : i32
    %c0_i32 = arith.constant 0 : i32
    %c0_i32_0 = arith.constant 0 : i32
    %c0_i32_1 = arith.constant 0 : i32
    return %arg0, %2, %c0_i32, %c0_i32_0 : i32, i32, i32, i32
  }
  func.func @transform_3(%arg0: i32, %arg1: i32) -> (i32, i32, i32) {
    %c0_i32 = arith.constant 0 : i32
    %c0_i32_0 = arith.constant 0 : i32
    %c0_i32_1 = arith.constant 0 : i32
    %c0_i32_2 = arith.constant 0 : i32
    return %c0_i32, %c0_i32_0, %c0_i32_1 : i32, i32, i32
  }
  func.func @transform_4(%arg0: i32, %arg1: i32) -> (i32, i32) {
    %c0_i32 = arith.constant 0 : i32
    %c0_i32_0 = arith.constant 0 : i32
    %c0_i32_1 = arith.constant 0 : i32
    return %c0_i32, %c0_i32_0 : i32, i32
  }
  func.func @transform_5(%arg0: i32, %arg1: i32) -> (i32, i32) {
    %c0_i32 = arith.constant 0 : i32
    %c0_i32_0 = arith.constant 0 : i32
    %c0_i32_1 = arith.constant 0 : i32
    return %c0_i32, %c0_i32_0 : i32, i32
  }
  func.func @transform_6(%arg0: i32, %arg1: i32) -> (i32, i32, i32, i32) {
    %c0_i32 = arith.constant 0 : i32
    %c0_i32_0 = arith.constant 0 : i32
    %c0_i32_1 = arith.constant 0 : i32
    return %arg0, %arg1, %c0_i32, %c0_i32_0 : i32, i32, i32, i32
  }
  func.func @transform_7(%arg0: i32, %arg1: i32) -> (i32, i32, i32, i32) {
    %c0_i32 = arith.constant 0 : i32
    %c0_i32_0 = arith.constant 0 : i32
    %c0_i32_1 = arith.constant 0 : i32
    return %arg0, %arg1, %c0_i32, %c0_i32_0 : i32, i32, i32, i32
  }
}

</mosaic_0001>

<bundles_post_ra>
// kernel: conv_block_forward.5
= control target key start
LH: loop header
LB: loop body
LE: loop exit
PB: predicated region body
PF: predicated region fallthrough
CT: control target
= control target key end

     0   :  { %vm348_vm0 = vcmask 64512   ;;  %s1088_s0 = inlined_call_operand.vmem [shape: bf16[512,128], index: 0, kind: input, shape index: {}]   ;;  %s1089_s1 = inlined_call_operand.vmem [shape: f32[1,128], index: 1, kind: input, shape index: {}]   ;;  %s1090_s2 = inlined_call_operand.vmem [shape: f32[1,128], index: 2, kind: input, shape index: {}]   ;;  %s1091_s3 = inlined_call_operand.vmem [shape: f32[512,8], index: 3, kind: output, shape index: {}]  }
   0x1   :  { %v420_v0 = vld [vmem:[%s1088_s0] sm:$0xff]   ;;  %v547_v4 = vld [vmem:[%s1088_s0 + $0x8] sm:$0xff]   ;;  %v548_v5 = vld [vmem:[%s1088_s0 + $0x10] sm:$0xff]  }
   0x2   :  { %v604_v1 = vld [vmem:[%s1089_s1] ss:$0 sm:$0xff]  ;;  %v421_v2 = vunpack.c.l.bf16 %v420_v0  ;;  %v422_v3 = vunpack.c.h.bf16 %v420_v0  ;;  %v549_v6 = vld [vmem:[%s1088_s0 + $0x18] sm:$0xff]   ;;  %v425_v8 = vunpack.c.l.bf16 %v547_v4  ;;  %v426_v9 = vunpack.c.h.bf16 %v547_v4  ;;  %v551_v33 = vld [vmem:[%s1088_s0 + $0x28] sm:$0xff]  }
   0x3   :  { %v618_v7 = vld [vmem:[%s1090_s2] ss:$0 sm:$0xff]  ;;  %v429_v10 = vunpack.c.l.bf16 %v548_v5  ;;  %v430_v11 = vunpack.c.h.bf16 %v548_v5  ;;  %v433_v14 = vunpack.c.l.bf16 %v549_v6  ;;  %v434_v15 = vunpack.c.h.bf16 %v549_v6  ;;  %v552_v34 = vld [vmem:[%s1088_s0 + $0x30] sm:$0xff]   ;;  %v553_v39 = vld [vmem:[%s1088_s0 + $0x38] sm:$0xff]  }
   0x4   :  { %v149_v12 = vmul.f32 %v421_v2, %v604_v1  ;;  %v150_v13 = vmul.f32 %v422_v3, %v604_v1  ;;  %v151_v16 = vmul.f32 %v425_v8, %v604_v1  ;;  %v152_v17 = vmul.f32 %v426_v9, %v604_v1  ;;  %v550_v28 = vld [vmem:[%s1088_s0 + $0x20] sm:$0xff]   ;;  %v555_v6 = vld [vmem:[%s1088_s0 + $0x48] sm:$0xff]   ;;  %v556_v8 = vld [vmem:[%s1088_s0 + $0x50] sm:$0xff]  }
   0x5   :  { %v153_v18 = vmul.f32 %v429_v10, %v604_v1  ;;  %v154_v19 = vmul.f32 %v430_v11, %v604_v1  ;;  %v155_v22 = vmul.f32 %v433_v14, %v604_v1  ;;  %v156_v23 = vmul.f32 %v434_v15, %v604_v1  ;;  %v554_v0 = vld [vmem:[%s1088_s0 + $0x40] sm:$0xff]  }
   0x6   :  { %v220_v20 = vadd.f32 %v618_v7, %v149_v12  ;;  %v221_v21 = vadd.f32 %v618_v7, %v150_v13  ;;  %v222_v24 = vadd.f32 %v618_v7, %v151_v16  ;;  %v223_v25 = vadd.f32 %v618_v7, %v152_v17  ;;  %v557_v13 = vld [vmem:[%s1088_s0 + $0x58] sm:$0xff]  }
   0x7   :  { %v224_v26 = vadd.f32 %v618_v7, %v153_v18  ;;  %v225_v27 = vadd.f32 %v618_v7, %v154_v19  ;;  %v226_v31 = vadd.f32 %v618_v7, %v155_v22  ;;  %v227_v32 = vadd.f32 %v618_v7, %v156_v23 }
   0x8   :  { %v284_v29 = vmax.f32 %v220_v20, 0.0  ;;  %v285_v30 = vmax.f32 %v221_v21, 0.0  ;;  %v286_v35 = vmax.f32 %v222_v24, 0.0  ;;  %v287_v36 = vmax.f32 %v223_v25, 0.0 }
   0x9   :  { %v288_v37 = vmax.f32 %v224_v26, 0.0  ;;  %v289_v38 = vmax.f32 %v225_v27, 0.0  ;;  %v290_v40 = vmax.f32 %v226_v31, 0.0  ;;  %v291_v41 = vmax.f32 %v227_v32, 0.0 }
   0xa   :  { %349 = vst.msk [vmem:[%s1091_s3] sm:$0xff] %vm348_vm0, %v284_v29  ;;  %350 = vst.msk [vmem:[%s1091_s3 + $0x8] sm:$0xff] %vm348_vm0, %v285_v30  ;;  %v437_v42 = vunpack.c.l.bf16 %v550_v28  ;;  %v438_v43 = vunpack.c.h.bf16 %v550_v28  ;;  %v441_v44 = vunpack.c.l.bf16 %v551_v33  ;;  %v442_v45 = vunpack.c.h.bf16 %v551_v33 }
   0xb   :  { %351 = vst.msk [vmem:[%s1091_s3 + $0x10] sm:$0xff] %vm348_vm0, %v286_v35  ;;  %352 = vst.msk [vmem:[%s1091_s3 + $0x18] sm:$0xff] %vm348_vm0, %v287_v36  ;;  %v445_v46 = vunpack.c.l.bf16 %v552_v34  ;;  %v446_v47 = vunpack.c.h.bf16 %v552_v34  ;;  %v449_v50 = vunpack.c.l.bf16 %v553_v39  ;;  %v450_v51 = vunpack.c.h.bf16 %v553_v39 }
   0xc   :  { %353 = vst.msk [vmem:[%s1091_s3 + $0x20] sm:$0xff] %vm348_vm0, %v288_v37  ;;  %354 = vst.msk [vmem:[%s1091_s3 + $0x28] sm:$0xff] %vm348_vm0, %v289_v38  ;;  %v157_v48 = vmul.f32 %v437_v42, %v604_v1  ;;  %v158_v49 = vmul.f32 %v438_v43, %v604_v1  ;;  %v159_v52 = vmul.f32 %v441_v44, %v604_v1  ;;  %v453_v16 = vunpack.c.l.bf16 %v554_v0  ;;  %v558_v38 = vld [vmem:[%s1088_s0 + $0x60] sm:$0xff]   ;;  %v559_v43 = vld [vmem:[%s1088_s0 + $0x68] sm:$0xff]  }
   0xd   :  { %355 = vst.msk [vmem:[%s1091_s3 + $0x30] sm:$0xff] %vm348_vm0, %v290_v40  ;;  %356 = vst.msk [vmem:[%s1091_s3 + $0x38] sm:$0xff] %vm348_vm0, %v291_v41  ;;  %v160_v53 = vmul.f32 %v442_v45, %v604_v1  ;;  %v161_v54 = vmul.f32 %v445_v46, %v604_v1  ;;  %v162_v55 = vmul.f32 %v446_v47, %v604_v1  ;;  %v454_v17 = vunpack.c.h.bf16 %v554_v0  ;;  %v560_v44 = vld [vmem:[%s1088_s0 + $0x70] sm:$0xff]  }
   0xe   :  { %v228_v56 = vadd.f32 %v618_v7, %v157_v48  ;;  %v229_v57 = vadd.f32 %v618_v7, %v158_v49  ;;  %v163_v58 = vmul.f32 %v449_v50, %v604_v1  ;;  %v164_v59 = vmul.f32 %v450_v51, %v604_v1  ;;  %v561_v49 = vld [vmem:[%s1088_s0 + $0x78] sm:$0xff]  }
   0xf   :  { %v230_v60 = vadd.f32 %v618_v7, %v159_v52  ;;  %v231_v61 = vadd.f32 %v618_v7, %v160_v53  ;;  %v232_v62 = vadd.f32 %v618_v7, %v161_v54  ;;  %v233_v63 = vadd.f32 %v618_v7, %v162_v55 }
  0x10   :  { %v292_v2 = vmax.f32 %v228_v56, 0.0  ;;  %v293_v3 = vmax.f32 %v229_v57, 0.0  ;;  %v234_v4 = vadd.f32 %v618_v7, %v163_v58  ;;  %v235_v5 = vadd.f32 %v618_v7, %v164_v59 }
  0x11   :  { %v294_v9 = vmax.f32 %v230_v60, 0.0  ;;  %v295_v10 = vmax.f32 %v231_v61, 0.0  ;;  %v296_v11 = vmax.f32 %v232_v62, 0.0  ;;  %v297_v12 = vmax.f32 %v233_v63, 0.0 }
  0x12   :  { %357 = vst.msk [vmem:[%s1091_s3 + $0x40] sm:$0xff] %vm348_vm0, %v292_v2  ;;  %358 = vst.msk [vmem:[%s1091_s3 + $0x48] sm:$0xff] %vm348_vm0, %v293_v3  ;;  %v298_v14 = vmax.f32 %v234_v4, 0.0  ;;  %v299_v15 = vmax.f32 %v235_v5, 0.0  ;;  %v457_v18 = vunpack.c.l.bf16 %v555_v6  ;;  %v458_v19 = vunpack.c.h.bf16 %v555_v6 }
  0x13   :  { %359 = vst.msk [vmem:[%s1091_s3 + $0x50] sm:$0xff] %vm348_vm0, %v294_v9  ;;  %360 = vst.msk [vmem:[%s1091_s3 + $0x58] sm:$0xff] %vm348_vm0, %v295_v10  ;;  %v461_v20 = vunpack.c.l.bf16 %v556_v8  ;;  %v462_v21 = vunpack.c.h.bf16 %v556_v8  ;;  %v165_v22 = vmul.f32 %v453_v16, %v604_v1  ;;  %v166_v23 = vmul.f32 %v454_v17, %v604_v1  ;;  %v563_v17 = vld [vmem:[%s1088_s0 + $0x88] sm:$0xff]  }
  0x14   :  { %361 = vst.msk [vmem:[%s1091_s3 + $0x60] sm:$0xff] %vm348_vm0, %v296_v11  ;;  %362 = vst.msk [vmem:[%s1091_s3 + $0x68] sm:$0xff] %vm348_vm0, %v297_v12  ;;  %v465_v24 = vunpack.c.l.bf16 %v557_v13  ;;  %v466_v25 = vunpack.c.h.bf16 %v557_v13  ;;  %v167_v26 = vmul.f32 %v457_v18, %v604_v1  ;;  %v168_v27 = vmul.f32 %v458_v19, %v604_v1  ;;  %v562_v12 = vld [vmem:[%s1088_s0 + $0x80] sm:$0xff]   ;;  %v564_v18 = vld [vmem:[%s1088_s0 + $0x90] sm:$0xff]  }
  0x15   :  { %363 = vst.msk [vmem:[%s1091_s3 + $0x70] sm:$0xff] %vm348_vm0, %v298_v14  ;;  %364 = vst.msk [vmem:[%s1091_s3 + $0x78] sm:$0xff] %vm348_vm0, %v299_v15  ;;  %v169_v28 = vmul.f32 %v461_v20, %v604_v1  ;;  %v170_v29 = vmul.f32 %v462_v21, %v604_v1  ;;  %v236_v30 = vadd.f32 %v618_v7, %v165_v22  ;;  %v469_v52 = vunpack.c.l.bf16 %v558_v38 }
  0x16   :  { %v237_v31 = vadd.f32 %v618_v7, %v166_v23  ;;  %v171_v32 = vmul.f32 %v465_v24, %v604_v1  ;;  %v172_v33 = vmul.f32 %v466_v25, %v604_v1  ;;  %v238_v34 = vadd.f32 %v618_v7, %v167_v26  ;;  %v565_v23 = vld [vmem:[%s1088_s0 + $0x98] sm:$0xff]  }
  0x17   :  { %v239_v35 = vadd.f32 %v618_v7, %v168_v27  ;;  %v240_v36 = vadd.f32 %v618_v7, %v169_v28  ;;  %v241_v37 = vadd.f32 %v618_v7, %v170_v29  ;;  %v300_v39 = vmax.f32 %v236_v30, 0.0 }
  0x18   :  { %v301_v40 = vmax.f32 %v237_v31, 0.0  ;;  %v242_v41 = vadd.f32 %v618_v7, %v171_v32  ;;  %v243_v42 = vadd.f32 %v618_v7, %v172_v33  ;;  %v302_v45 = vmax.f32 %v238_v34, 0.0 }
  0x19   :  { %v303_v46 = vmax.f32 %v239_v35, 0.0  ;;  %v304_v47 = vmax.f32 %v240_v36, 0.0  ;;  %v305_v48 = vmax.f32 %v241_v37, 0.0  ;;  %365 = vst.msk [vmem:[%s1091_s3 + $0x80] sm:$0xff] %vm348_vm0, %v300_v39  ;;  %v470_v53 = vunpack.c.h.bf16 %v558_v38 }
  0x1a   :  { %366 = vst.msk [vmem:[%s1091_s3 + $0x88] sm:$0xff] %vm348_vm0, %v301_v40  ;;  %v306_v50 = vmax.f32 %v242_v41, 0.0  ;;  %v307_v51 = vmax.f32 %v243_v42, 0.0  ;;  %367 = vst.msk [vmem:[%s1091_s3 + $0x90] sm:$0xff] %vm348_vm0, %v302_v45  ;;  %v473_v54 = vunpack.c.l.bf16 %v559_v43  ;;  %v474_v55 = vunpack.c.h.bf16 %v559_v43 }
  0x1b   :  { %368 = vst.msk [vmem:[%s1091_s3 + $0x98] sm:$0xff] %vm348_vm0, %v303_v46  ;;  %369 = vst.msk [vmem:[%s1091_s3 + $0xa0] sm:$0xff] %vm348_vm0, %v304_v47  ;;  %v477_v56 = vunpack.c.l.bf16 %v560_v44  ;;  %v478_v57 = vunpack.c.h.bf16 %v560_v44  ;;  %v173_v58 = vmul.f32 %v469_v52, %v604_v1  ;;  %v174_v59 = vmul.f32 %v470_v53, %v604_v1  ;;  %v567_v53 = vld [vmem:[%s1088_s0 + $0xa8] sm:$0xff]  }
  0x1c   :  { %370 = vst.msk [vmem:[%s1091_s3 + $0xa8] sm:$0xff] %vm348_vm0, %v305_v48  ;;  %371 = vst.msk [vmem:[%s1091_s3 + $0xb0] sm:$0xff] %vm348_vm0, %v306_v50  ;;  %v481_v60 = vunpack.c.l.bf16 %v561_v49  ;;  %v482_v61 = vunpack.c.h.bf16 %v561_v49  ;;  %v175_v62 = vmul.f32 %v473_v54, %v604_v1  ;;  %v176_v63 = vmul.f32 %v474_v55, %v604_v1  ;;  %v566_v48 = vld [vmem:[%s1088_s0 + $0xa0] sm:$0xff]   ;;  %v568_v54 = vld [vmem:[%s1088_s0 + $0xb0] sm:$0xff]  }
  0x1d   :  { %372 = vst.msk [vmem:[%s1091_s3 + $0xb8] sm:$0xff] %vm348_vm0, %v307_v51  ;;  %v177_v0 = vmul.f32 %v477_v56, %v604_v1  ;;  %v178_v2 = vmul.f32 %v478_v57, %v604_v1  ;;  %v244_v3 = vadd.f32 %v618_v7, %v173_v58  ;;  %v245_v4 = vadd.f32 %v618_v7, %v174_v59  ;;  %v569_v59 = vld [vmem:[%s1088_s0 + $0xb8] sm:$0xff]  }
  0x1e   :  { %v179_v5 = vmul.f32 %v481_v60, %v604_v1  ;;  %v180_v6 = vmul.f32 %v482_v61, %v604_v1  ;;  %v246_v8 = vadd.f32 %v618_v7, %v175_v62  ;;  %v247_v9 = vadd.f32 %v618_v7, %v176_v63 }
  0x1f   :  { %v248_v10 = vadd.f32 %v618_v7, %v177_v0  ;;  %v249_v11 = vadd.f32 %v618_v7, %v178_v2  ;;  %v308_v13 = vmax.f32 %v244_v3, 0.0  ;;  %v309_v14 = vmax.f32 %v245_v4, 0.0 }
  0x20   :  { %v250_v15 = vadd.f32 %v618_v7, %v179_v5  ;;  %v251_v16 = vadd.f32 %v618_v7, %v180_v6  ;;  %v310_v19 = vmax.f32 %v246_v8, 0.0  ;;  %v311_v20 = vmax.f32 %v247_v9, 0.0 }
  0x21   :  { %v312_v21 = vmax.f32 %v248_v10, 0.0  ;;  %v313_v22 = vmax.f32 %v249_v11, 0.0  ;;  %373 = vst.msk [vmem:[%s1091_s3 + $0xc0] sm:$0xff] %vm348_vm0, %v308_v13  ;;  %374 = vst.msk [vmem:[%s1091_s3 + $0xc8] sm:$0xff] %vm348_vm0, %v309_v14  ;;  %v485_v26 = vunpack.c.l.bf16 %v562_v12  ;;  %v486_v27 = vunpack.c.h.bf16 %v562_v12 }
  0x22   :  { %v314_v24 = vmax.f32 %v250_v15, 0.0  ;;  %v315_v25 = vmax.f32 %v251_v16, 0.0  ;;  %375 = vst.msk [vmem:[%s1091_s3 + $0xd0] sm:$0xff] %vm348_vm0, %v310_v19  ;;  %376 = vst.msk [vmem:[%s1091_s3 + $0xd8] sm:$0xff] %vm348_vm0, %v311_v20  ;;  %v489_v28 = vunpack.c.l.bf16 %v563_v17  ;;  %v490_v29 = vunpack.c.h.bf16 %v563_v17 }
  0x23   :  { %377 = vst.msk [vmem:[%s1091_s3 + $0xe0] sm:$0xff] %vm348_vm0, %v312_v21  ;;  %378 = vst.msk [vmem:[%s1091_s3 + $0xe8] sm:$0xff] %vm348_vm0, %v313_v22  ;;  %v493_v30 = vunpack.c.l.bf16 %v564_v18  ;;  %v494_v31 = vunpack.c.h.bf16 %v564_v18  ;;  %v181_v32 = vmul.f32 %v485_v26, %v604_v1  ;;  %v182_v33 = vmul.f32 %v486_v27, %v604_v1  ;;  %v570_v22 = vld [vmem:[%s1088_s0 + $0xc0] sm:$0xff]   ;;  %v571_v27 = vld [vmem:[%s1088_s0 + $0xc8] sm:$0xff]  }
  0x24   :  { %379 = vst.msk [vmem:[%s1091_s3 + $0xf0] sm:$0xff] %vm348_vm0, %v314_v24  ;;  %380 = vst.msk [vmem:[%s1091_s3 + $0xf8] sm:$0xff] %vm348_vm0, %v315_v25  ;;  %v497_v34 = vunpack.c.l.bf16 %v565_v23  ;;  %v498_v35 = vunpack.c.h.bf16 %v565_v23  ;;  %v183_v36 = vmul.f32 %v489_v28, %v604_v1  ;;  %v184_v37 = vmul.f32 %v490_v29, %v604_v1  ;;  %v572_v28 = vld [vmem:[%s1088_s0 + $0xd0] sm:$0xff]  }
  0x25   :  { %v185_v38 = vmul.f32 %v493_v30, %v604_v1  ;;  %v186_v39 = vmul.f32 %v494_v31, %v604_v1  ;;  %v252_v40 = vadd.f32 %v618_v7, %v181_v32  ;;  %v253_v41 = vadd.f32 %v618_v7, %v182_v33  ;;  %v573_v33 = vld [vmem:[%s1088_s0 + $0xd8] sm:$0xff]  }
  0x26   :  { %v187_v42 = vmul.f32 %v497_v34, %v604_v1  ;;  %v188_v43 = vmul.f32 %v498_v35, %v604_v1  ;;  %v254_v44 = vadd.f32 %v618_v7, %v183_v36  ;;  %v255_v45 = vadd.f32 %v618_v7, %v184_v37 }
  0x27   :  { %v256_v46 = vadd.f32 %v618_v7, %v185_v38  ;;  %v257_v47 = vadd.f32 %v618_v7, %v186_v39  ;;  %v316_v49 = vmax.f32 %v252_v40, 0.0  ;;  %v317_v50 = vmax.f32 %v253_v41, 0.0 }
  0x28   :  { %v258_v51 = vadd.f32 %v618_v7, %v187_v42  ;;  %v259_v52 = vadd.f32 %v618_v7, %v188_v43  ;;  %v318_v55 = vmax.f32 %v254_v44, 0.0  ;;  %v319_v56 = vmax.f32 %v255_v45, 0.0 }
  0x29   :  { %v320_v57 = vmax.f32 %v256_v46, 0.0  ;;  %v321_v58 = vmax.f32 %v257_v47, 0.0  ;;  %381 = vst.msk [vmem:[%s1091_s3 + $0x100] sm:$0xff] %vm348_vm0, %v316_v49  ;;  %382 = vst.msk [vmem:[%s1091_s3 + $0x108] sm:$0xff] %vm348_vm0, %v317_v50  ;;  %v501_v62 = vunpack.c.l.bf16 %v566_v48  ;;  %v502_v63 = vunpack.c.h.bf16 %v566_v48 }
  0x2a   :  { %v322_v60 = vmax.f32 %v258_v51, 0.0  ;;  %v323_v61 = vmax.f32 %v259_v52, 0.0  ;;  %383 = vst.msk [vmem:[%s1091_s3 + $0x110] sm:$0xff] %vm348_vm0, %v318_v55  ;;  %384 = vst.msk [vmem:[%s1091_s3 + $0x118] sm:$0xff] %vm348_vm0, %v319_v56  ;;  %v505_v0 = vunpack.c.l.bf16 %v567_v53  ;;  %v506_v2 = vunpack.c.h.bf16 %v567_v53 }
  0x2b   :  { %385 = vst.msk [vmem:[%s1091_s3 + $0x120] sm:$0xff] %vm348_vm0, %v320_v57  ;;  %386 = vst.msk [vmem:[%s1091_s3 + $0x128] sm:$0xff] %vm348_vm0, %v321_v58  ;;  %v509_v3 = vunpack.c.l.bf16 %v568_v54  ;;  %v510_v4 = vunpack.c.h.bf16 %v568_v54  ;;  %v189_v5 = vmul.f32 %v501_v62, %v604_v1  ;;  %v190_v6 = vmul.f32 %v502_v63, %v604_v1  ;;  %v574_v58 = vld [vmem:[%s1088_s0 + $0xe0] sm:$0xff]   ;;  %v575_v63 = vld [vmem:[%s1088_s0 + $0xe8] sm:$0xff]  }
  0x2c   :  { %387 = vst.msk [vmem:[%s1091_s3 + $0x130] sm:$0xff] %vm348_vm0, %v322_v60  ;;  %388 = vst.msk [vmem:[%s1091_s3 + $0x138] sm:$0xff] %vm348_vm0, %v323_v61  ;;  %v513_v8 = vunpack.c.l.bf16 %v569_v59  ;;  %v514_v9 = vunpack.c.h.bf16 %v569_v59  ;;  %v191_v10 = vmul.f32 %v505_v0, %v604_v1  ;;  %v192_v11 = vmul.f32 %v506_v2, %v604_v1  ;;  %v576_v0 = vld [vmem:[%s1088_s0 + $0xf0] sm:$0xff]  }
  0x2d   :  { %v193_v12 = vmul.f32 %v509_v3, %v604_v1  ;;  %v194_v13 = vmul.f32 %v510_v4, %v604_v1  ;;  %v260_v14 = vadd.f32 %v618_v7, %v189_v5  ;;  %v261_v15 = vadd.f32 %v618_v7, %v190_v6  ;;  %v577_v6 = vld [vmem:[%s1088_s0 + $0xf8] sm:$0xff]  }
  0x2e   :  { %v195_v16 = vmul.f32 %v513_v8, %v604_v1  ;;  %v196_v17 = vmul.f32 %v514_v9, %v604_v1  ;;  %v262_v18 = vadd.f32 %v618_v7, %v191_v10  ;;  %v263_v19 = vadd.f32 %v618_v7, %v192_v11 }
  0x2f   :  { %v264_v20 = vadd.f32 %v618_v7, %v193_v12  ;;  %v265_v21 = vadd.f32 %v618_v7, %v194_v13  ;;  %v324_v23 = vmax.f32 %v260_v14, 0.0  ;;  %v325_v24 = vmax.f32 %v261_v15, 0.0 }
  0x30   :  { %v266_v25 = vadd.f32 %v618_v7, %v195_v16  ;;  %v267_v26 = vadd.f32 %v618_v7, %v196_v17  ;;  %v326_v29 = vmax.f32 %v262_v18, 0.0  ;;  %v327_v30 = vmax.f32 %v263_v19, 0.0 }
  0x31   :  { %v328_v31 = vmax.f32 %v264_v20, 0.0  ;;  %v329_v32 = vmax.f32 %v265_v21, 0.0  ;;  %389 = vst.msk [vmem:[%s1091_s3 + $0x140] sm:$0xff] %vm348_vm0, %v324_v23  ;;  %390 = vst.msk [vmem:[%s1091_s3 + $0x148] sm:$0xff] %vm348_vm0, %v325_v24  ;;  %v517_v36 = vunpack.c.l.bf16 %v570_v22  ;;  %v518_v37 = vunpack.c.h.bf16 %v570_v22 }
  0x32   :  { %v330_v34 = vmax.f32 %v266_v25, 0.0  ;;  %v331_v35 = vmax.f32 %v267_v26, 0.0  ;;  %391 = vst.msk [vmem:[%s1091_s3 + $0x150] sm:$0xff] %vm348_vm0, %v326_v29  ;;  %392 = vst.msk [vmem:[%s1091_s3 + $0x158] sm:$0xff] %vm348_vm0, %v327_v30  ;;  %v521_v38 = vunpack.c.l.bf16 %v571_v27  ;;  %v522_v39 = vunpack.c.h.bf16 %v571_v27 }
  0x33   :  { %393 = vst.msk [vmem:[%s1091_s3 + $0x160] sm:$0xff] %vm348_vm0, %v328_v31  ;;  %394 = vst.msk [vmem:[%s1091_s3 + $0x168] sm:$0xff] %vm348_vm0, %v329_v32  ;;  %v525_v40 = vunpack.c.l.bf16 %v572_v28  ;;  %v526_v41 = vunpack.c.h.bf16 %v572_v28  ;;  %v197_v42 = vmul.f32 %v517_v36, %v604_v1  ;;  %v198_v43 = vmul.f32 %v518_v37, %v604_v1 }
  0x34   :  { %395 = vst.msk [vmem:[%s1091_s3 + $0x170] sm:$0xff] %vm348_vm0, %v330_v34  ;;  %396 = vst.msk [vmem:[%s1091_s3 + $0x178] sm:$0xff] %vm348_vm0, %v331_v35  ;;  %v529_v44 = vunpack.c.l.bf16 %v573_v33  ;;  %v530_v45 = vunpack.c.h.bf16 %v573_v33  ;;  %v199_v46 = vmul.f32 %v521_v38, %v604_v1  ;;  %v200_v47 = vmul.f32 %v522_v39, %v604_v1 }
  0x35   :  { %v201_v48 = vmul.f32 %v525_v40, %v604_v1  ;;  %v202_v49 = vmul.f32 %v526_v41, %v604_v1  ;;  %v268_v50 = vadd.f32 %v618_v7, %v197_v42  ;;  %v269_v51 = vadd.f32 %v618_v7, %v198_v43 }
  0x36   :  { %v203_v52 = vmul.f32 %v529_v44, %v604_v1  ;;  %v204_v53 = vmul.f32 %v530_v45, %v604_v1  ;;  %v270_v54 = vadd.f32 %v618_v7, %v199_v46  ;;  %v271_v55 = vadd.f32 %v618_v7, %v200_v47 }
  0x37   :  { %v272_v56 = vadd.f32 %v618_v7, %v201_v48  ;;  %v273_v57 = vadd.f32 %v618_v7, %v202_v49  ;;  %v332_v59 = vmax.f32 %v268_v50, 0.0  ;;  %v333_v60 = vmax.f32 %v269_v51, 0.0 }
  0x38   :  { %v274_v61 = vadd.f32 %v618_v7, %v203_v52  ;;  %v275_v62 = vadd.f32 %v618_v7, %v204_v53  ;;  %v334_v2 = vmax.f32 %v270_v54, 0.0  ;;  %v335_v3 = vmax.f32 %v271_v55, 0.0 }
  0x39   :  { %v336_v4 = vmax.f32 %v272_v56, 0.0  ;;  %v337_v5 = vmax.f32 %v273_v57, 0.0  ;;  %397 = vst.msk [vmem:[%s1091_s3 + $0x180] sm:$0xff] %vm348_vm0, %v332_v59  ;;  %398 = vst.msk [vmem:[%s1091_s3 + $0x188] sm:$0xff] %vm348_vm0, %v333_v60  ;;  %v533_v10 = vunpack.c.l.bf16 %v574_v58  ;;  %v534_v11 = vunpack.c.h.bf16 %v574_v58 }
  0x3a   :  { %v338_v8 = vmax.f32 %v274_v61, 0.0  ;;  %v339_v9 = vmax.f32 %v275_v62, 0.0  ;;  %399 = vst.msk [vmem:[%s1091_s3 + $0x190] sm:$0xff] %vm348_vm0, %v334_v2  ;;  %400 = vst.msk [vmem:[%s1091_s3 + $0x198] sm:$0xff] %vm348_vm0, %v335_v3  ;;  %v537_v12 = vunpack.c.l.bf16 %v575_v63  ;;  %v538_v13 = vunpack.c.h.bf16 %v575_v63 }
  0x3b   :  { %401 = vst.msk [vmem:[%s1091_s3 + $0x1a0] sm:$0xff] %vm348_vm0, %v336_v4  ;;  %402 = vst.msk [vmem:[%s1091_s3 + $0x1a8] sm:$0xff] %vm348_vm0, %v337_v5  ;;  %v541_v14 = vunpack.c.l.bf16 %v576_v0  ;;  %v542_v15 = vunpack.c.h.bf16 %v576_v0  ;;  %v205_v16 = vmul.f32 %v533_v10, %v604_v1  ;;  %v206_v17 = vmul.f32 %v534_v11, %v604_v1 }
  0x3c   :  { %403 = vst.msk [vmem:[%s1091_s3 + $0x1b0] sm:$0xff] %vm348_vm0, %v338_v8  ;;  %404 = vst.msk [vmem:[%s1091_s3 + $0x1b8] sm:$0xff] %vm348_vm0, %v339_v9  ;;  %v545_v18 = vunpack.c.l.bf16 %v577_v6  ;;  %v546_v19 = vunpack.c.h.bf16 %v577_v6  ;;  %v207_v20 = vmul.f32 %v537_v12, %v604_v1  ;;  %v208_v21 = vmul.f32 %v538_v13, %v604_v1 }
  0x3d   :  { %v209_v22 = vmul.f32 %v541_v14, %v604_v1  ;;  %v210_v23 = vmul.f32 %v542_v15, %v604_v1  ;;  %v276_v24 = vadd.f32 %v618_v7, %v205_v16  ;;  %v277_v25 = vadd.f32 %v618_v7, %v206_v17 }
  0x3e   :  { %v211_v26 = vmul.f32 %v545_v18, %v604_v1  ;;  %v212_v27 = vmul.f32 %v546_v19, %v604_v1  ;;  %v278_v28 = vadd.f32 %v618_v7, %v207_v20  ;;  %v279_v29 = vadd.f32 %v618_v7, %v208_v21 }
  0x3f   :  { %v280_v30 = vadd.f32 %v618_v7, %v209_v22  ;;  %v281_v31 = vadd.f32 %v618_v7, %v210_v23  ;;  %v340_v32 = vmax.f32 %v276_v24, 0.0  ;;  %v341_v33 = vmax.f32 %v277_v25, 0.0 }
  0x40   :  { %v282_v34 = vadd.f32 %v618_v7, %v211_v26  ;;  %v283_v35 = vadd.f32 %v618_v7, %v212_v27  ;;  %v342_v36 = vmax.f32 %v278_v28, 0.0  ;;  %v343_v37 = vmax.f32 %v279_v29, 0.0 }
  0x41   :  { %v344_v38 = vmax.f32 %v280_v30, 0.0  ;;  %v345_v39 = vmax.f32 %v281_v31, 0.0  ;;  %405 = vst.msk [vmem:[%s1091_s3 + $0x1c0] sm:$0xff] %vm348_vm0, %v340_v32  ;;  %406 = vst.msk [vmem:[%s1091_s3 + $0x1c8] sm:$0xff] %vm348_vm0, %v341_v33 }
  0x42   :  { %v346_v1 = vmax.f32 %v282_v34, 0.0  ;;  %v347_v40 = vmax.f32 %v283_v35, 0.0  ;;  %407 = vst.msk [vmem:[%s1091_s3 + $0x1d0] sm:$0xff] %vm348_vm0, %v342_v36  ;;  %408 = vst.msk [vmem:[%s1091_s3 + $0x1d8] sm:$0xff] %vm348_vm0, %v343_v37 }
  0x43   :  { %409 = vst.msk [vmem:[%s1091_s3 + $0x1e0] sm:$0xff] %vm348_vm0, %v344_v38  ;;  %410 = vst.msk [vmem:[%s1091_s3 + $0x1e8] sm:$0xff] %vm348_vm0, %v345_v39 }
  0x44   :  { %411 = vst.msk [vmem:[%s1091_s3 + $0x1f0] sm:$0xff] %vm348_vm0, %v346_v1  ;;  %412 = vst.msk [vmem:[%s1091_s3 + $0x1f8] sm:$0xff] %vm348_vm0, %v347_v40 }

// kernel: conv_block_forward.3
= control target key start
LH: loop header
LB: loop body
LE: loop exit
PB: predicated region body
PF: predicated region fallthrough
CT: control target
= control target key end

     0   :  { %s3527_s24 = smov 0   ;;  %s3529_s25 = smov 0   ;;  %s4300_s0 = inlined_call_operand.vmem [shape: f32[2,16,16,128], index: 0, kind: input, shape index: {}, may-alias: {0,1,2}]   ;;  %s4301_s1 = inlined_call_operand.vmem [shape: f32[2,16,16,128], index: 1, kind: input, shape index: {}, may-alias: {0,1,2}]   ;;  %s4302_s2 = inlined_call_operand.vmem [shape: f32[2,16,16,128], index: 2, kind: input, shape index: {}, may-alias: {0,1,2}]   ;;  %s4303_s3 = inlined_call_operand.vmem [shape: bf16[9,128,128], index: 3, kind: input, shape index: {}]   ;;  %s4304_s4 = inlined_call_operand.vmem [shape: f32[1,128], index: 4, kind: input, shape index: {}]   ;;  %s4305_s5 = inlined_call_operand.vmem [shape: f32[1,128], index: 5, kind: input, shape index: {}]   ;;  %s4306_s6 = inlined_call_operand.vmem [shape: bf16[2,16,16,128], index: 6, kind: output, shape index: {0}]   ;;  %s4307_s7 = inlined_call_operand.vmem [shape: f32[2,2,2,128], index: 7, kind: output, shape index: {1}]  }
   0x1   :  { %s3531_s26 = smov 0   ;;  %s3533_s27 = smov 0  }
   0x2   :  { %s3535_s28 = smov 0  }
   0x3 LB: > { %s27_s4 = sadd.s32 1, %s3477_s26  ;;  %s30_s5 = sadd.s32 1, %s3481_s27  ;;  %s3485_s28 = sphi %s3535_s28, %s18_s28   ;;  %s3481_s27 = sphi %s3533_s27, %s4350_s27   ;;  %s3477_s26 = sphi %s3531_s26, %s4349_s26   ;;  %s3473_s25 = sphi %s3529_s25, %s4348_s25   ;;  %s3469_s24 = sphi %s3527_s24, %s4347_s24  }
   0x4   : > { %p28_p0 = scmp.ge.s32.totalorder %s27_s4, 2  ;;  %p2570_p1 = scmp.ge.s32.totalorder %s3485_s28, 1 }
   0x5   : > { %p328_p2 = scmp.lt.s32.totalorder %s3485_s28, 5 }
   0x6   : > { %s4352_s4 = smov (%p28_p0, %s27_s4), 0  ;;  %s4354_s5 = smov (!%p28_p0, %s30_s5), %s3481_s27 }
   0x7   : > { %p329_p3 = pnand %p2570_p1, %p328_p2  ;;  %p32_p4 = scmp.ge.s32.totalorder %s4354_s5, 2 }
   0x9   : > { %s4356_s5 = smov (%p32_p4, %s4354_s5), 0  ;;  %332 = sbr.rel (%p329_p3) target bundleno = 470 (0x1d6), region = 44 }
   0xe   : > { %v3375_v0 = vld [vmem:[%s4303_s3 + $0xf8] sm:$0xff]   ;;  %s3563_s8 = sshll.u32 %s3469_s24, 3  ;;  %p408_p5 = scmp.lt.s32.totalorder %s3473_s25, 1  ;;  %v3377_v2 = vld [vmem:[%s4303_s3 + $0xf0] sm:$0xff]   ;;  %v3379_v4 = vld [vmem:[%s4303_s3 + $0xe8] sm:$0xff]   ;;  %vm589_vm0 = vcmask 1040384  }
   0xf   : > { %v3376_v1 = vld [vmem:[%s4303_s3 + $0x38] sm:$0xff]   ;;  %3031 = vmatprep.subr.bf16.mxu0 %v3375_v0  ;;  %p424_p6 = scmp.lt.s32.totalorder %s3563_s8, 15  ;;  %v3378_v3 = vld [vmem:[%s4303_s3 + $0x30] sm:$0xff]   ;;  %v3380_v5 = vld [vmem:[%s4303_s3 + $0x28] sm:$0xff]   ;;  %s2572_s10 = sadd.s32 4294967295, %s3563_s8  ;;  %vm632_vm3 = vcmask 1047552  }
  0x10   : > { %3063 = vmatprep.subr.bf16.mxu1 %v3376_v1  ;;  %3032 = vmatpush3.bf16.msra.mxu0 %v3375_v0  ;;  %s4358_s25 = smov (!%p408_p5, %s3473_s25), 1  ;;  %v3381_v6 = vld [vmem:[%s4303_s3 + $0xe0] sm:$0xff]   ;;  %p406_p7 = scmp.gt.s32.totalorder %s2572_s10, 0  ;;  %v3383_v8 = vld [vmem:[%s4303_s3 + $0xd8] sm:$0xff]   ;;  %v3385_v10 = vld [vmem:[%s4303_s3 + $0xd0] sm:$0xff]  }
  0x11   : > { %3064 = vmatpush3.bf16.msra.mxu1 %v3376_v1  ;;  %3033 = vmatprep.subr.bf16.mxu0 %v3377_v2  ;;  %s425_s17 = scalar_select %p424_p6, %s3563_s8, 15  ;;  %v3382_v7 = vld [vmem:[%s4303_s3 + $0x20] sm:$0xff]   ;;  %v3384_v9 = vld [vmem:[%s4303_s3 + $0x18] sm:$0xff]   ;;  %v3386_v14 = vld [vmem:[%s4303_s3 + $0x10] sm:$0xff]   ;;  %vm590_vm1 = vsmask.f32 256 }
  0x12   : > { %3065 = vmatprep.subr.bf16.mxu1 %v3378_v3  ;;  %s3585_s20 = sshll.u32 %s4358_s25, 5  ;;  %p2573_p8 = scmp.lt.s32.totalorder %s2572_s10, 15  ;;  %v3387_v17 = vld [vmem:[%s4303_s3 + $0xc8] sm:$0xff]   ;;  %v3389_v27 = vld [vmem:[%s4303_s3 + $0xc0] sm:$0xff]   ;;  %vm3647_vm2 = vmand %vm589_vm0, %vm590_vm1  ;;  %vm633_vm4 = vsmask.f32 7424 }
  0x13   : > { %s2582_s21 = sshll.u32 %s425_s17, 1  ;;  %s4360_s10 = smov (!%p406_p7, %s2572_s10), 0  ;;  %v3388_v19 = vld [vmem:[%s4303_s3 + $0x8] sm:$0xff]   ;;  %v3390_v41 = vld [vmem:[%s4303_s3] sm:$0xff]   ;;  %v3391_v50 = vld [vmem:[%s4303_s3 + $0x1b8] sm:$0xff]  }
  0x14   : > { %3034 = vmatpush3.bf16.msra.mxu0 %v3377_v2  ;;  %s3588_s22 = sadd.s32 %s2582_s21, %s3585_s20  ;;  %s4362_s10 = smov (!%p2573_p8, %s4360_s10), 15  ;;  %v3392_v54 = vld [vmem:[%s4303_s3 + $0x78] sm:$0xff]   ;;  %vm3998_vm5 = vmand %vm632_vm3, %vm633_vm4 }
  0x15   : > { %3066 = vmatpush3.bf16.msra.mxu1 %v3378_v3  ;;  %3035 = vmatprep.subr.bf16.mxu0 %v3379_v4  ;;  %s2584_s11 = sshll.u32 %s3588_s22, 3  ;;  %s2578_s23 = sshll.u32 %s4362_s10, 1  ;;  %v3393_v3 = vld [vmem:[%s4303_s3 + $0x1b0] sm:$0xff]   ;;  %v3423_v28 = vld [vmem:[%s4303_s3 + $0xb8] sm:$0xff]  }
  0x16   : > { %3067 = vmatprep.subr.bf16.mxu1 %v3380_v5  ;;  %s3607_s18 = scalar_lea.vmem %s4301_s1, %s2584_s11  ;;  %p469_p9 = scmp.gt.s32.totalorder %s3469_s24, 0 }
  0x17   : > { %v479_v11 = vld [vmem:[%s3607_s18] sm:$0xff]  ;;  %v480_v12 = vld [vmem:[%s3607_s18 + $0x8] sm:$0xff]  ;;  %v481_v13 = vld [vmem:[%s3607_s18 + $0x10] sm:$0xff]  ;;  %s414_s9 = sadd.s32 %s3585_s20, %s2578_s23  ;;  %s2823_s21 = sadd.s32 8, %s3563_s8 }
  0x18   : > { %3036 = vmatpush3.bf16.msra.mxu0 %v3379_v4  ;;  %v3619_v15 = vpack.c.bf16 %v480_v12, %v479_v11  ;;  %v482_v16 = vld [vmem:[%s3607_s18 + $0x18] sm:$0xff]  ;;  %s2580_s13 = sshll.u32 %s414_s9, 3  ;;  %v483_v35 = vld [vmem:[%s3607_s18 + $0x20] sm:$0xff]  ;;  %v484_v36 = vld [vmem:[%s3607_s18 + $0x28] sm:$0xff]  ;;  %p3661_p10 = scmp.lt.s32.totalorder %s2823_s21, 15 }
  0x19   : > { %3068 = vmatpush3.bf16.msra.mxu1 %v3380_v5  ;;  %3037 = vmatprep.subr.bf16.mxu0 %v3381_v6  ;;  %v3626_v18 = vpack.c.bf16 %v482_v16, %v481_v13  ;;  %s416_s17 = scalar_lea.vmem %s4300_s0, %s2580_s13  ;;  %v485_v37 = vld [vmem:[%s3607_s18 + $0x30] sm:$0xff]  ;;  %v3656_v38 = vpack.c.bf16 %v484_v36, %v483_v35  ;;  %v486_v39 = vld [vmem:[%s3607_s18 + $0x38] sm:$0xff]  ;;  %v487_v55 = vld [vmem:[%s3607_s18 + $0x40] sm:$0xff]  ;;  %p462_p11 = scmp.lt.s32.totalorder %s3469_s24, 1 }
  0x1a   : > { %3069 = vmatprep.subr.bf16.mxu1 %v3382_v7  ;;  %v517_v20 = vshrl.u32 %v3619_v15, 16  ;;  %v520_v21 = vshll.u32 %v3619_v15, 16  ;;  %s470_s19 = scalar_select %p469_p9, 1.0, 0.0  ;;  %v473_v22 = vld [vmem:[%s416_s17] sm:$0xff]  ;;  %v474_v23 = vld [vmem:[%s416_s17 + $0x8] sm:$0xff]  ;;  %v3674_v44 = vpack.c.bf16 %v486_v39, %v485_v37 }
  0x1b   : > { %v524_v24 = vshrl.u32 %v3626_v18, 16  ;;  %v527_v25 = vshll.u32 %v3626_v18, 16  ;;  %v531_v46 = vshrl.u32 %v3656_v38, 16  ;;  %v534_v47 = vshll.u32 %v3656_v38, 16  ;;  %s4364_s21 = smov (!%p3661_p10, %s2823_s21), 15  ;;  %v488_v56 = vld [vmem:[%s3607_s18 + $0x48] sm:$0xff] }
  0x1c   : > { %3038 = vmatpush3.bf16.msra.mxu0 %v3381_v6  ;;  %v519_v26 = vrot.slane %v517_v20, 7  ;;  %v475_v29 = vstv %s470_s19  ;;  %v538_v51 = vshrl.u32 %v3674_v44, 16  ;;  %v3704_v59 = vpack.c.bf16 %v488_v56, %v487_v55  ;;  %v489_v60 = vld [vmem:[%s3607_s18 + $0x50] sm:$0xff]  ;;  %v490_v61 = vld [vmem:[%s3607_s18 + $0x58] sm:$0xff]  ;;  %s463_s19 = scalar_select %p462_p11, %s3469_s24, 1  ;;  %v3395_v11 = vld [vmem:[%s4303_s3 + $0x1a8] sm:$0xff]  }
  0x1d   : > { %3070 = vmatpush3.bf16.msra.mxu1 %v3382_v7  ;;  %3039 = vmatprep.subr.bf16.mxu0 %v3383_v8  ;;  %v526_v30 = vrot.slane %v524_v24, 7  ;;  %v606_v31 = vrot.slane %v527_v25, 1  ;;  %v476_v33 = vmul.f32 %v475_v29, %v473_v22  ;;  %v477_v34 = vmul.f32 %v475_v29, %v474_v23  ;;  %v3394_v4 = vld [vmem:[%s4303_s3 + $0x70] sm:$0xff]   ;;  %v491_v16 = vld [vmem:[%s3607_s18 + $0x60] sm:$0xff]  ;;  %s4366_s21 = smov (!%p3661_p10, %s4364_s21), 15  ;;  %v494_v22 = vld [vmem:[%s3607_s18 + $0x78] sm:$0xff] }
  0x1e   : > { %3071 = vmatprep.subr.bf16.mxu1 %v3384_v9  ;;  %v522_v32 = vor.u32 %v520_v21, %v519_v26  ;;  %v533_v52 = vrot.slane %v531_v46, 7  ;;  %v540_v0 = vrot.slane %v538_v51, 7  ;;  %v541_v1 = vshll.u32 %v3674_v44, 16  ;;  %s2596_s12 = sshll.u32 %s4358_s25, 1  ;;  %s2589_s25 = sshll.u32 %s4366_s21, 1  ;;  %v3399_v39 = vld [vmem:[%s4303_s3 + $0x198] sm:$0xff]  }
  0x1f   : > { %v3665_v40 = vor.u32 %v606_v31, %v524_v24  ;;  %v3672_v43 = vpack.c.bf16 %v477_v34, %v476_v33  ;;  %v529_v45 = vor.u32 %v527_v25, %v526_v30  ;;  %v3711_v2 = vpack.c.bf16 %v490_v61, %v489_v60  ;;  %s3762_s30 = sadd.s32 %s2596_s12, %s463_s19  ;;  %s442_s21 = sadd.s32 %s2589_s25, %s3585_s20 }
  0x20   : > { %3040 = vmatpush3.bf16.msra.mxu0 %v3383_v8  ;;  %v593_v42 = vsel %vm3647_vm2, 0, %v522_v32  ;;  %v536_v58 = vor.u32 %v534_v47, %v533_v52  ;;  %v545_v5 = vshrl.u32 %v3704_v59, 16  ;;  %v548_v8 = vshll.u32 %v3704_v59, 16  ;;  %v3397_v32 = vld [vmem:[%s4303_s3 + $0x1a0] sm:$0xff]   ;;  %s2591_s17 = sshll.u32 %s442_s21, 3  ;;  %v3401_v52 = vld [vmem:[%s4303_s3 + $0x190] sm:$0xff]  }
  0x21   : > { %3072 = vmatpush3.bf16.msra.mxu1 %v3384_v9  ;;  %3041 = vmatprep.subr.bf16.mxu0 %v3385_v10  ;;  %v510_v48 = vshrl.u32 %v3672_v43, 16  ;;  %v513_v49 = vshll.u32 %v3672_v43, 16  ;;  %v3700_v57 = vsel %vm3647_vm2, 0, %v529_v45  ;;  %v552_v9 = vshrl.u32 %v3711_v2, 16  ;;  %s444_s25 = scalar_lea.vmem %s4302_s2, %s2591_s17  ;;  %s2597_s10 = sshll.u32 %s3762_s30, 1 }
  0x22   : > { %3073 = vmatprep.subr.bf16.mxu1 %v3386_v14  ;;  %3047 = vmatprep.mubr.bf16.mxu0 %v593_v42  ;;  %v547_v12 = vrot.slane %v545_v5, 7  ;;  %v543_v13 = vor.u32 %v541_v1, %v540_v0  ;;  %v604_v23 = vrot.slane %v520_v21, 1  ;;  %v555_v26 = vshll.u32 %v3711_v2, 16  ;;  %s472_s21 = scalar_select %p462_p11, 1.0, 0.0  ;;  %v503_v0 = vld [vmem:[%s444_s25] sm:$0xff] }
  0x23   : > { %v512_v53 = vrot.slane %v510_v48, 7  ;;  %v602_v62 = vrot.slane %v513_v49, 1  ;;  %v554_v25 = vrot.slane %v552_v9, 7  ;;  %s467_s8 = scalar_lea.vmem %s4307_s7, %s2597_s10 }
  0x24   : > { %3042 = vmatpush3.bf16.msra.mxu0 %v3385_v10  ;;  %v3732_v10 = vsel %vm3647_vm2, 0, %v536_v58  ;;  %v550_v24 = vor.u32 %v548_v8, %v547_v12  ;;  %v3767_v21 = vor.u32 %v604_v23, %v517_v20  ;;  %v3771_v29 = vsel %vm3647_vm2, 0, %v543_v13  ;;  %v3398_v20 = vld [vmem:[%s4303_s3 + $0x60] sm:$0xff]  }
  0x25   : > { %3074 = vmatpush3.bf16.msra.mxu1 %v3386_v14  ;;  %3043 = vmatprep.subr.bf16.mxu0 %v3387_v17  ;;  %v515_v63 = vor.u32 %v513_v49, %v512_v53  ;;  %v3720_v6 = vor.u32 %v602_v62, %v510_v48  ;;  %v3396_v14 = vld [vmem:[%s4303_s3 + $0x68] sm:$0xff]   ;;  %v557_v34 = vor.u32 %v555_v26, %v554_v25  ;;  %v610_v53 = vrot.slane %v541_v1, 1 }
  0x26   : > { %3075 = vmatprep.subr.bf16.mxu1 %v3388_v19  ;;  %v3784_v33 = vsel %vm3647_vm2, 0, %v550_v24  ;;  %v3403_v62 = vld [vmem:[%s4303_s3 + $0x188] sm:$0xff]   ;;  %v3410_v24 = vld [vmem:[%s4303_s3 + $0x1f0] sm:$0xff]  }
  0x27   : > { %v592_v7 = vsel %vm3647_vm2, 0, %v515_v63  ;;  %v3832_v58 = vor.u32 %v610_v53, %v538_v51  ;;  %v3404_v51 = vld [vmem:[%s4303_s3 + $0x48] sm:$0xff]   ;;  %v3430_v53 = vld [vmem:[%s4303_s3 + $0x160] sm:$0xff]  }
  0x28   : > { %3044 = vmatpush3.bf16.msra.mxu0 %v3387_v17  ;;  %3079 = vmatprep.mubr.bf16.mxu1 %v592_v7  ;;  %v492_v17 = vld [vmem:[%s3607_s18 + $0x68] sm:$0xff] }
  0x29   : > { %3076 = vmatpush3.bf16.msra.mxu1 %v3388_v19  ;;  %3045 = vmatprep.subr.bf16.mxu0 %v3389_v27  ;;  %v493_v19 = vld [vmem:[%s3607_s18 + $0x70] sm:$0xff]  ;;  %v504_v1 = vld [vmem:[%s444_s25 + $0x8] sm:$0xff]  ;;  %s2595_s25 = sshll.u32 %s3588_s22, 2 }
  0x2a   : > { %3077 = vmatprep.subr.bf16.mxu1 %v3390_v41  ;;  %v3774_v31 = vpack.c.bf16 %v494_v22, %v493_v19  ;;  %v3409_v22 = vld [vmem:[%s4303_s3 + $0x130] sm:$0xff]   ;;  %s4226_s13 = scalar_lea.vmem %s4306_s6, %s2595_s25 }
  0x2c   : > { %3046 = vmatpush3.bf16.msra.mxu0 %v3389_v27  ;;  %v3760_v27 = vpack.c.bf16 %v492_v17, %v491_v16  ;;  %v566_v37 = vshrl.u32 %v3774_v31, 16  ;;  %v569_v45 = vshll.u32 %v3774_v31, 16  ;;  %v3407_v16 = vld [vmem:[%s4303_s3 + $0x138] sm:$0xff]  }
  0x2d   : > { %3078 = vmatpush3.bf16.msra.mxu1 %v3390_v41  ;;  %3095 = vmatprep.subr.bf16.mxu0 %v3391_v50  ;;  %v3799_v41 = vsel %vm3647_vm2, 0, %v557_v34  ;;  %v3408_v17 = vld [vmem:[%s4303_s3 + $0x1f8] sm:$0xff]   ;;  %v3417_v34 = vld [vmem:[%s4303_s3 + $0x110] sm:$0xff]  }
  0x2e   : > { %3127 = vmatprep.subr.bf16.mxu1 %v3392_v54  ;;  %v559_v30 = vshrl.u32 %v3760_v27, 16  ;;  %v562_v36 = vshll.u32 %v3760_v27, 16  ;;  %v568_v49 = vrot.slane %v566_v37, 7  ;;  %v618_v12 = vrot.slane %v569_v45, 1 }
  0x2f   : > { %3048 = vmatmul.mubr.bf16.vlgmr.msra.gmra.mxu0 %v3700_v57 }
  0x30   : > { %3080 = vmatmul.mubr.bf16.vlgmr.msra.gmra.mxu1 %v593_v42  ;;  %3096 = vmatpush3.bf16.msra.mxu0 %v3391_v50  ;;  %v561_v35 = vrot.slane %v559_v30, 7  ;;  %v3400_v42 = vld [vmem:[%s4303_s3 + $0x58] sm:$0xff]   ;;  %v608_v50 = vrot.slane %v534_v47, 1  ;;  %v612_v47 = vrot.slane %v548_v8, 1  ;;  %v571_v60 = vor.u32 %v569_v45, %v568_v49  ;;  %v3406_v8 = vld [vmem:[%s4303_s3 + $0x40] sm:$0xff]   ;;  %v3425_v49 = vld [vmem:[%s4303_s3 + $0xb0] sm:$0xff]  }
  0x31   : > { %3128 = vmatpush3.bf16.msra.mxu1 %v3392_v54  ;;  %3097 = vmatprep.subr.bf16.mxu0 %v3393_v3  ;;  %v3402_v54 = vld [vmem:[%s4303_s3 + $0x50] sm:$0xff]   ;;  %v616_v7 = vrot.slane %v562_v36, 1  ;;  %v3422_v45 = vld [vmem:[%s4303_s3 + $0x1c0] sm:$0xff]  }
  0x32   : > { %3129 = vmatprep.subr.bf16.mxu1 %v3394_v4  ;;  %3051 = vmatprep.mubr.bf16.mxu0 %v3732_v10  ;;  %v564_v48 = vor.u32 %v562_v36, %v561_v35  ;;  %v3818_v55 = vor.u32 %v608_v50, %v531_v46  ;;  %v614_v46 = vrot.slane %v555_v26, 1  ;;  %v3837_v61 = vor.u32 %v612_v47, %v545_v5  ;;  %v3405_v5 = vld [vmem:[%s4303_s3 + $0x180] sm:$0xff]   ;;  %v3411_v26 = vld [vmem:[%s4303_s3 + $0x128] sm:$0xff]   ;;  %v3418_v35 = vld [vmem:[%s4303_s3 + $0x1d0] sm:$0xff]  }
  0x33   : > { %3083 = vmatprep.mubr.bf16.mxu1 %v3700_v57  ;;  %v3866_v13 = vor.u32 %v616_v7, %v559_v30  ;;  %v3412_v30 = vld [vmem:[%s4303_s3 + $0x1e8] sm:$0xff]   ;;  %v3426_v50 = vld [vmem:[%s4303_s3 + $0x170] sm:$0xff]   ;;  %v3446_v7 = vld [vmem:[%s4303_s3 + $0x200] sm:$0xff]  }
  0x34   : > { %3098 = vmatpush3.bf16.msra.mxu0 %v3393_v3  ;;  %v3825_v56 = vsel %vm3647_vm2, 0, %v564_v48  ;;  %v3844_v63 = vor.u32 %v614_v46, %v552_v9  ;;  %v3855_v3 = vsel %vm3647_vm2, 0, %v571_v60  ;;  %v3424_v48 = vld [vmem:[%s4303_s3 + $0x178] sm:$0xff]   ;;  %v3434_v47 = vld [vmem:[%s4303_s3 + $0x150] sm:$0xff]   ;;  %v3437_v46 = vld [vmem:[%s4303_s3 + $0x80] sm:$0xff]   ;;  %v635_v60 = vsel %vm3998_vm5, %v3720_v6, 0 }
  0x35   : > { %3130 = vmatpush3.bf16.msra.mxu1 %v3394_v4  ;;  %3099 = vmatprep.subr.bf16.mxu0 %v3395_v11  ;;  %v505_v4 = vstv %s472_s21  ;;  %v637_v6 = vsel %vm3998_vm5, %v3665_v40, 0  ;;  %v639_v40 = vsel %vm3998_vm5, %v3832_v58, 0 }
  0x36   : > { %3131 = vmatprep.subr.bf16.mxu1 %v3396_v14  ;;  %v506_v9 = vmul.f32 %v505_v4, %v503_v0  ;;  %v3441_v0 = vld [vmem:[%s4303_s3 + $0x228] sm:$0xff]   ;;  %v641_v58 = vsel %vm3998_vm5, %v3844_v63, 0 }
  0x37   : > { %3052 = vmatmul.mubr.bf16.gmra.mxu0 %v3771_v29 }
  0x38   : > { %3084 = vmatmul.mubr.bf16.gmra.mxu1 %v3732_v10  ;;  %3100 = vmatpush3.bf16.msra.mxu0 %v3395_v11  ;;  %v507_v11 = vmul.f32 %v505_v4, %v504_v1  ;;  %v640_v1 = vsel %vm3998_vm5, %v3837_v61, 0  ;;  %v3444_v61 = vld [vmem:[%s4303_s3 + $0x210] sm:$0xff]   ;;  %v642_v4 = vsel %vm3998_vm5, %v3866_v13, 0 }
  0x39   : > { %3132 = vmatpush3.bf16.msra.mxu1 %v3396_v14  ;;  %3101 = vmatprep.subr.bf16.mxu0 %v3397_v32  ;;  %v3869_v14 = vor.u32 %v618_v12, %v566_v37  ;;  %v3419_v37 = vld [vmem:[%s4303_s3 + $0x108] sm:$0xff]  }
  0x3a   : > { %3133 = vmatprep.subr.bf16.mxu1 %v3398_v20  ;;  %3055 = vmatprep.mubr.bf16.mxu0 %v3784_v33  ;;  %v3878_v19 = vpack.c.bf16 %v507_v11, %v506_v9 }
  0x3b   : > { %3087 = vmatprep.mubr.bf16.mxu1 %v3771_v29  ;;  %v643_v63 = vsel %vm3998_vm5, %v3869_v14, 0 }
  0x3c   : > { %3102 = vmatpush3.bf16.msra.mxu0 %v3397_v32  ;;  %v576_v23 = vshll.u32 %v3878_v19, 16  ;;  %v3414_v32 = vld [vmem:[%s4303_s3 + $0x1e0] sm:$0xff]  }
  0x3d   : > { %3134 = vmatpush3.bf16.msra.mxu1 %v3398_v20  ;;  %3103 = vmatprep.subr.bf16.mxu0 %v3399_v39  ;;  %v3416_v20 = vld [vmem:[%s4303_s3 + $0x1d8] sm:$0xff]  }
  0x3e   : > { %3135 = vmatprep.subr.bf16.mxu1 %v3400_v42  ;;  %v620_v25 = vrot.slane %v576_v23, 1 }
  0x3f   : > { %3056 = vmatmul.mubr.bf16.gmra.mxu0 %v3799_v41 }
  0x40   : > { %3088 = vmatmul.mubr.bf16.gmra.mxu1 %v3784_v33  ;;  %3104 = vmatpush3.bf16.msra.mxu0 %v3399_v39  ;;  %v3420_v39 = vld [vmem:[%s4303_s3 + $0x1c8] sm:$0xff]  }
  0x41   : > { %3136 = vmatpush3.bf16.msra.mxu1 %v3400_v42  ;;  %3105 = vmatprep.subr.bf16.mxu0 %v3401_v52  ;;  %v3421_v42 = vld [vmem:[%s4303_s3 + $0x100] sm:$0xff]  }
  0x42   : > { %3137 = vmatprep.subr.bf16.mxu1 %v3402_v54  ;;  %3059 = vmatprep.mubr.bf16.mxu0 %v3825_v56 }
  0x43   : > { %3091 = vmatprep.mubr.bf16.mxu1 %v3799_v41 }
  0x44   : > { %3106 = vmatpush3.bf16.msra.mxu0 %v3401_v52  ;;  %v3428_v52 = vld [vmem:[%s4303_s3 + $0x168] sm:$0xff]  }
  0x45   : > { %3138 = vmatpush3.bf16.msra.mxu1 %v3402_v54  ;;  %3107 = vmatprep.subr.bf16.mxu0 %v3403_v62  ;;  %v3432_v54 = vld [vmem:[%s4303_s3 + $0x158] sm:$0xff]  }
  0x46   : > { %3139 = vmatprep.subr.bf16.mxu1 %v3404_v51 }
  0x47   : > { %3060 = vmatmul.mubr.bf16.gmra.mxu0 %v3855_v3 }
  0x48   : > { %3092 = vmatmul.mubr.bf16.gmra.mxu1 %v3825_v56  ;;  %3108 = vmatpush3.bf16.msra.mxu0 %v3403_v62  ;;  %v636_v62 = vsel %vm3998_vm5, %v3767_v21, 0  ;;  %v3440_v21 = vld [vmem:[%s4303_s3 + $0x230] sm:$0xff]  }
  0x49   : > { %3140 = vmatpush3.bf16.msra.mxu1 %v3404_v51  ;;  %3109 = vmatprep.subr.bf16.mxu0 %v3405_v5  ;;  %v3439_v51 = vld [vmem:[%s4303_s3 + $0x238] sm:$0xff]  }
  0x4a   : > { %3141 = vmatprep.subr.bf16.mxu1 %v3406_v8  ;;  %3111 = vmatprep.mubr.bf16.mxu0 %v3700_v57  ;;  %v573_v57 = vshrl.u32 %v3878_v19, 16 }
  0x4b   : > { %3143 = vmatprep.mubr.bf16.mxu1 %v3672_v43 }
  0x4c   : > { %3110 = vmatpush3.bf16.msra.mxu0 %v3405_v5  ;;  %v3891_v43 = vor.u32 %v620_v25, %v573_v57  ;;  %v3445_v5 = vld [vmem:[%s4303_s3 + $0x208] sm:$0xff]  }
  0x4d   : > { %3142 = vmatpush3.bf16.msra.mxu1 %v3406_v8  ;;  %3159 = vmatprep.subr.bf16.mxu0 %v3407_v16 }
  0x4e   : > { %3191 = vmatprep.subr.bf16.mxu1 %v3408_v17  ;;  %v644_v8 = vsel %vm3998_vm5, %v3891_v43, 0 }
  0x4f   : > { %3112 = vmatmul.mubr.bf16.vlgmr.msra.gmra.mxu0 %v3732_v10  ;;  %v3413_v10 = vld [vmem:[%s4303_s3 + $0x120] sm:$0xff]  }
  0x50   : > { %3144 = vmatmul.mubr.bf16.vlgmr.msra.gmra.mxu1 %v3619_v15  ;;  %3160 = vmatpush3.bf16.msra.mxu0 %v3407_v16 }
  0x51   : > { %3192 = vmatpush3.bf16.msra.mxu1 %v3408_v17  ;;  %3161 = vmatprep.subr.bf16.mxu0 %v3409_v22 }
  0x52   : > { %3193 = vmatprep.subr.bf16.mxu1 %v3410_v24  ;;  %3115 = vmatprep.mubr.bf16.mxu0 %v3771_v29  ;;  %v3415_v29 = vld [vmem:[%s4303_s3 + $0x118] sm:$0xff]  }
  0x53   : > { %3147 = vmatprep.mubr.bf16.mxu1 %v3626_v18 }
  0x54   : > { %3162 = vmatpush3.bf16.msra.mxu0 %v3409_v22 }
  0x55   : > { %3194 = vmatpush3.bf16.msra.mxu1 %v3410_v24  ;;  %3163 = vmatprep.subr.bf16.mxu0 %v3411_v26 }
  0x56   : > { %3195 = vmatprep.subr.bf16.mxu1 %v3412_v30 }
  0x57   : > { %3116 = vmatmul.mubr.bf16.gmra.mxu0 %v3784_v33  ;;  %v575_v33 = vrot.slane %v573_v57, 7 }
  0x58   : > { %3148 = vmatmul.mubr.bf16.gmra.mxu1 %v3656_v38  ;;  %3164 = vmatpush3.bf16.msra.mxu0 %v3411_v26 }
  0x59   : > { %3196 = vmatpush3.bf16.msra.mxu1 %v3412_v30  ;;  %3165 = vmatprep.subr.bf16.mxu0 %v3413_v10  ;;  %v578_v36 = vor.u32 %v576_v23, %v575_v33 }
  0x5a   : > { %3197 = vmatprep.subr.bf16.mxu1 %v3414_v32  ;;  %3119 = vmatprep.mubr.bf16.mxu0 %v3799_v41 }
  0x5b   : > { %3151 = vmatprep.mubr.bf16.mxu1 %v3674_v44  ;;  %v601_v41 = vsel %vm3647_vm2, 0, %v578_v36 }
  0x5c   : > { %3166 = vmatpush3.bf16.msra.mxu0 %v3413_v10 }
  0x5d   : > { %3198 = vmatpush3.bf16.msra.mxu1 %v3414_v32  ;;  %3167 = vmatprep.subr.bf16.mxu0 %v3415_v29 }
  0x5e   : > { %3199 = vmatprep.subr.bf16.mxu1 %v3416_v20 }
  0x5f   : > { %3120 = vmatmul.mubr.bf16.gmra.mxu0 %v3825_v56  ;;  %v3436_v56 = vld [vmem:[%s4303_s3 + $0x148] sm:$0xff]  }
  0x60   : > { %3152 = vmatmul.mubr.bf16.gmra.mxu1 %v3704_v59  ;;  %3168 = vmatpush3.bf16.msra.mxu0 %v3415_v29 }
  0x61   : > { %3200 = vmatpush3.bf16.msra.mxu1 %v3416_v20  ;;  %3169 = vmatprep.subr.bf16.mxu0 %v3417_v34 }
  0x62   : > { %3201 = vmatprep.subr.bf16.mxu1 %v3418_v35  ;;  %3123 = vmatprep.mubr.bf16.mxu0 %v3855_v3  ;;  %v3443_v3 = vld [vmem:[%s4303_s3 + $0x218] sm:$0xff]  }
  0x63   : > { %3155 = vmatprep.mubr.bf16.mxu1 %v3711_v2 }
  0x64   : > { %3170 = vmatpush3.bf16.msra.mxu0 %v3417_v34 }
  0x65   : > { %3202 = vmatpush3.bf16.msra.mxu1 %v3418_v35  ;;  %3171 = vmatprep.subr.bf16.mxu0 %v3419_v37 }
  0x66   : > { %3203 = vmatprep.subr.bf16.mxu1 %v3420_v39 }
  0x67   : > { %3124 = vmatmul.mubr.bf16.gmra.mxu0 %v601_v41 }
  0x68   : > { %3156 = vmatmul.mubr.bf16.gmra.mxu1 %v3760_v27  ;;  %3172 = vmatpush3.bf16.msra.mxu0 %v3419_v37 }
  0x69   : > { %3204 = vmatpush3.bf16.msra.mxu1 %v3420_v39  ;;  %3173 = vmatprep.subr.bf16.mxu0 %v3421_v42 }
  0x6a   : > { %3205 = vmatprep.subr.bf16.mxu1 %v3422_v45  ;;  %3175 = vmatprep.mubr.bf16.mxu0 %v3619_v15  ;;  %v3427_v15 = vld [vmem:[%s4303_s3 + $0xa8] sm:$0xff]  }
  0x6b   : > { %3207 = vmatprep.mubr.bf16.mxu1 %v3626_v18 }
  0x6c   : > { %3174 = vmatpush3.bf16.msra.mxu0 %v3421_v42 }
  0x6d   : > { %3206 = vmatpush3.bf16.msra.mxu1 %v3422_v45  ;;  %3223 = vmatprep.subr.bf16.mxu0 %v3423_v28 }
  0x6e   : > { %3255 = vmatprep.subr.bf16.mxu1 %v3424_v48 }
  0x6f   : > { %3176 = vmatmul.mubr.bf16.vlgmr.msra.gmra.mxu0 %v3626_v18  ;;  %v3429_v18 = vld [vmem:[%s4303_s3 + $0xa0] sm:$0xff]  }
  0x70   : > { %3208 = vmatmul.mubr.bf16.vlgmr.msra.gmra.mxu1 %v3656_v38  ;;  %3224 = vmatpush3.bf16.msra.mxu0 %v3423_v28 }
  0x71   : > { %3256 = vmatpush3.bf16.msra.mxu1 %v3424_v48  ;;  %3225 = vmatprep.subr.bf16.mxu0 %v3425_v49 }
  0x72   : > { %3257 = vmatprep.subr.bf16.mxu1 %v3426_v50  ;;  %3179 = vmatprep.mubr.bf16.mxu0 %v3656_v38  ;;  %v3431_v38 = vld [vmem:[%s4303_s3 + $0x98] sm:$0xff]  }
  0x73   : > { %3211 = vmatprep.mubr.bf16.mxu1 %v3674_v44 }
  0x74   : > { %3226 = vmatpush3.bf16.msra.mxu0 %v3425_v49 }
  0x75   : > { %3258 = vmatpush3.bf16.msra.mxu1 %v3426_v50  ;;  %3227 = vmatprep.subr.bf16.mxu0 %v3427_v15 }
  0x76   : > { %3259 = vmatprep.subr.bf16.mxu1 %v3428_v52 }
  0x77   : > { %3180 = vmatmul.mubr.bf16.gmra.mxu0 %v3674_v44  ;;  %v3433_v44 = vld [vmem:[%s4303_s3 + $0x90] sm:$0xff]  }
  0x78   : > { %3212 = vmatmul.mubr.bf16.gmra.mxu1 %v3704_v59  ;;  %3228 = vmatpush3.bf16.msra.mxu0 %v3427_v15 }
  0x79   : > { %3260 = vmatpush3.bf16.msra.mxu1 %v3428_v52  ;;  %3229 = vmatprep.subr.bf16.mxu0 %v3429_v18 }
  0x7a   : > { %3261 = vmatprep.subr.bf16.mxu1 %v3430_v53  ;;  %3183 = vmatprep.mubr.bf16.mxu0 %v3704_v59  ;;  %v3435_v59 = vld [vmem:[%s4303_s3 + $0x88] sm:$0xff]  }
  0x7b   : > { %3215 = vmatprep.mubr.bf16.mxu1 %v3711_v2 }
  0x7c   : > { %3230 = vmatpush3.bf16.msra.mxu0 %v3429_v18 }
  0x7d   : > { %3262 = vmatpush3.bf16.msra.mxu1 %v3430_v53  ;;  %3231 = vmatprep.subr.bf16.mxu0 %v3431_v38 }
  0x7e   : > { %3263 = vmatprep.subr.bf16.mxu1 %v3432_v54 }
  0x7f   : > { %3184 = vmatmul.mubr.bf16.gmra.mxu0 %v3711_v2 }
  0x80   : > { %3216 = vmatmul.mubr.bf16.gmra.mxu1 %v3760_v27  ;;  %3232 = vmatpush3.bf16.msra.mxu0 %v3431_v38 }
  0x81   : > { %3264 = vmatpush3.bf16.msra.mxu1 %v3432_v54  ;;  %3233 = vmatprep.subr.bf16.mxu0 %v3433_v44 }
  0x82   : > { %3265 = vmatprep.subr.bf16.mxu1 %v3434_v47  ;;  %3187 = vmatprep.mubr.bf16.mxu0 %v3760_v27  ;;  %v3438_v27 = vld [vmem:[%s4303_s3 + $0x140] sm:$0xff]  }
  0x83   : > { %3219 = vmatprep.mubr.bf16.mxu1 %v3774_v31 }
  0x84   : > { %3234 = vmatpush3.bf16.msra.mxu0 %v3433_v44 }
  0x85   : > { %3266 = vmatpush3.bf16.msra.mxu1 %v3434_v47  ;;  %3235 = vmatprep.subr.bf16.mxu0 %v3435_v59 }
  0x86   : > { %3267 = vmatprep.subr.bf16.mxu1 %v3436_v56 }
  0x87   : > { %3188 = vmatmul.mubr.bf16.gmra.mxu0 %v3774_v31  ;;  %v638_v31 = vsel %vm3998_vm5, %v3818_v55, 0  ;;  %v3442_v55 = vld [vmem:[%s4303_s3 + $0x220] sm:$0xff]  }
  0x88   : > { %3220 = vmatmul.mubr.bf16.gmra.mxu1 %v3878_v19  ;;  %3236 = vmatpush3.bf16.msra.mxu0 %v3435_v59 }
  0x89   : > { %3268 = vmatpush3.bf16.msra.mxu1 %v3436_v56  ;;  %3237 = vmatprep.subr.bf16.mxu0 %v3437_v46 }
  0x8a   : > { %3269 = vmatprep.subr.bf16.mxu1 %v3438_v27  ;;  %3239 = vmatprep.mubr.bf16.mxu0 %v635_v60 }
  0x8b   : > { %3271 = vmatprep.mubr.bf16.mxu1 %v636_v62 }
  0x8c   : > { %3238 = vmatpush3.bf16.msra.mxu0 %v3437_v46 }
  0x8d   : > { %3270 = vmatpush3.bf16.msra.mxu1 %v3438_v27  ;;  %3287 = vmatprep.subr.bf16.mxu0 %v3439_v51 }
  0x8e   : > { %3319 = vmatprep.subr.bf16.mxu1 %v3439_v51 }
  0x8f   : > { %3240 = vmatmul.mubr.bf16.vlgmr.msra.gmra.mxu0 %v636_v62 }
  0x90   : > { %3272 = vmatmul.mubr.bf16.vlgmr.msra.gmra.mxu1 %v637_v6  ;;  %3288 = vmatpush3.bf16.msra.mxu0 %v3439_v51 }
  0x91   : > { %3327 = vmatpush3.bf16.msra.mxu1 %v3439_v51  ;;  %3289 = vmatprep.subr.bf16.mxu0 %v3440_v21 }
  0x92   : > { %3320 = vmatprep.subr.bf16.mxu1 %v3440_v21  ;;  %3243 = vmatprep.mubr.bf16.mxu0 %v637_v6 }
  0x93   : > { %3275 = vmatprep.mubr.bf16.mxu1 %v638_v31 }
  0x94   : > { %3290 = vmatpush3.bf16.msra.mxu0 %v3440_v21 }
  0x95   : > { %3328 = vmatpush3.bf16.msra.mxu1 %v3440_v21  ;;  %3291 = vmatprep.subr.bf16.mxu0 %v3441_v0 }
  0x96   : > { %3321 = vmatprep.subr.bf16.mxu1 %v3441_v0 }
  0x97   : > { %3244 = vmatmul.mubr.bf16.gmra.mxu0 %v638_v31 }
  0x98   : > { %3276 = vmatmul.mubr.bf16.gmra.mxu1 %v639_v40  ;;  %3292 = vmatpush3.bf16.msra.mxu0 %v3441_v0 }
  0x99   : > { %3329 = vmatpush3.bf16.msra.mxu1 %v3441_v0  ;;  %3293 = vmatprep.subr.bf16.mxu0 %v3442_v55 }
  0x9a   : > { %3322 = vmatprep.subr.bf16.mxu1 %v3442_v55  ;;  %3247 = vmatprep.mubr.bf16.mxu0 %v639_v40 }
  0x9b   : > { %3279 = vmatprep.mubr.bf16.mxu1 %v640_v1 }
  0x9c   : > { %3294 = vmatpush3.bf16.msra.mxu0 %v3442_v55 }
  0x9d   : > { %3330 = vmatpush3.bf16.msra.mxu1 %v3442_v55  ;;  %3295 = vmatprep.subr.bf16.mxu0 %v3443_v3 }
  0x9e   : > { %3323 = vmatprep.subr.bf16.mxu1 %v3443_v3 }
  0x9f   : > { %3248 = vmatmul.mubr.bf16.gmra.mxu0 %v640_v1 }
  0xa0   : > { %3280 = vmatmul.mubr.bf16.gmra.mxu1 %v641_v58  ;;  %3296 = vmatpush3.bf16.msra.mxu0 %v3443_v3 }
  0xa1   : > { %3331 = vmatpush3.bf16.msra.mxu1 %v3443_v3  ;;  %3297 = vmatprep.subr.bf16.mxu0 %v3444_v61 }
  0xa2   : > { %3324 = vmatprep.subr.bf16.mxu1 %v3444_v61  ;;  %3251 = vmatprep.mubr.bf16.mxu0 %v641_v58 }
  0xa3   : > { %3283 = vmatprep.mubr.bf16.mxu1 %v642_v4 }
  0xa4   : > { %3298 = vmatpush3.bf16.msra.mxu0 %v3444_v61 }
  0xa5   : > { %3332 = vmatpush3.bf16.msra.mxu1 %v3444_v61  ;;  %3299 = vmatprep.subr.bf16.mxu0 %v3445_v5 }
  0xa6   : > { %3325 = vmatprep.subr.bf16.mxu1 %v3445_v5 }
  0xa7   : > { %3252 = vmatmul.mubr.bf16.gmra.mxu0 %v642_v4 }
  0xa8   : > { %3284 = vmatmul.mubr.bf16.gmra.mxu1 %v643_v63  ;;  %3300 = vmatpush3.bf16.msra.mxu0 %v3445_v5 }
  0xa9   : > { %3333 = vmatpush3.bf16.msra.mxu1 %v3445_v5  ;;  %3301 = vmatprep.subr.bf16.mxu0 %v3446_v7 }
  0xaa   : > { %3326 = vmatprep.subr.bf16.mxu1 %v3446_v7  ;;  %3303 = vmatprep.mubr.bf16.mxu0 %v637_v6 }
  0xab   : > { %3311 = vmatprep.mubr.bf16.mxu1 %v641_v58 }
  0xac   : > { %3302 = vmatpush3.bf16.msra.mxu0 %v3446_v7 }
  0xad   : > { %3334 = vmatpush3.bf16.msra.mxu1 %v3446_v7 }
  0xaf   : > { %3304 = vmatmul.mubr.bf16.vlgmr.msra.gmra.mxu0 %v638_v31 }
  0xb0   : > { %3312 = vmatmul.mubr.bf16.vlgmr.msra.gmra.mxu1 %v642_v4  ;;  %3307 = vmatprep.mubr.bf16.mxu0 %v639_v40 }
  0xb1   : > { %3315 = vmatprep.mubr.bf16.mxu1 %v643_v63 }
  0xb7   : > { %3308 = vmatmul.mubr.bf16.gmra.mxu0 %v640_v1 }
  0xb8   : > { %3316 = vmatmul.mubr.bf16.gmra.mxu1 %v644_v8 }
  0xef   : > { %v3049_v9 = vpop.f32.mrf.mxu0 }
  0xf0   : > { %v3081_v11 = vpop.f32.mrf.mxu1 }
  0xf1   : > { %v914_v12 = vadd.f32 %v3081_v11, %v3049_v9  ;;  %v760_v13 = vpop.f32.mrf.mxu0 }
  0xf2   : > { %v905_v14 = vpop.f32.mrf.mxu1 }
  0xf3   : > { %v906_v16 = vadd.f32 %v905_v14, %v760_v13  ;;  %v3050_v17 = vpop.f32.mrf.mxu0 }
  0xf4   : > { %v3082_v19 = vpop.f32.mrf.mxu1 }
  0xf5   : > { %v917_v22 = vadd.f32 %v3082_v19, %v3050_v17  ;;  %v763_v23 = vpop.f32.mrf.mxu0 }
  0xf6   : > { %v908_v24 = vpop.f32.mrf.mxu1 }
  0xf7   : > { %v909_v57 = vadd.f32 %v908_v24, %v763_v23  ;;  %v3053_v25 = vpop.f32.mrf.mxu0 }
  0xf8   : > { %v3085_v26 = vpop.f32.mrf.mxu1 }
  0xf9   : > { %v930_v30 = vadd.f32 %v3085_v26, %v3053_v25  ;;  %v776_v10 = vpop.f32.mrf.mxu0 }
  0xfa   : > { %v921_v32 = vpop.f32.mrf.mxu1 }
  0xfb   : > { %v922_v43 = vadd.f32 %v921_v32, %v776_v10  ;;  %v3054_v29 = vpop.f32.mrf.mxu0 }
  0xfc   : > { %v3086_v20 = vpop.f32.mrf.mxu1 }
  0xfd   : > { %v933_v33 = vadd.f32 %v3086_v20, %v3054_v29  ;;  %v779_v34 = vpop.f32.mrf.mxu0 }
  0xfe   : > { %v924_v35 = vpop.f32.mrf.mxu1 }
  0xff   : > { %v925_v36 = vadd.f32 %v924_v35, %v779_v34  ;;  %v3057_v37 = vpop.f32.mrf.mxu0 }
 0x100   : > { %v3089_v39 = vpop.f32.mrf.mxu1 }
 0x101   : > { %v946_v41 = vadd.f32 %v3089_v39, %v3057_v37  ;;  %v792_v42 = vpop.f32.mrf.mxu0 }
 0x102   : > { %v937_v45 = vpop.f32.mrf.mxu1 }
 0x103   : > { %v938_v28 = vadd.f32 %v937_v45, %v792_v42  ;;  %v3058_v48 = vpop.f32.mrf.mxu0 }
 0x104   : > { %v3090_v49 = vpop.f32.mrf.mxu1 }
 0x105   : > { %v949_v50 = vadd.f32 %v3090_v49, %v3058_v48  ;;  %v795_v15 = vpop.f32.mrf.mxu0 }
 0x106   : > { %v940_v52 = vpop.f32.mrf.mxu1 }
 0x107   : > { %v941_v18 = vadd.f32 %v940_v52, %v795_v15  ;;  %v3061_v53 = vpop.f32.mrf.mxu0 }
 0x108   : > { %v3093_v38 = vpop.f32.mrf.mxu1 }
 0x109   : > { %v962_v54 = vadd.f32 %v3093_v38, %v3061_v53  ;;  %v808_v44 = vpop.f32.mrf.mxu0 }
 0x10a   : > { %v953_v47 = vpop.f32.mrf.mxu1 }
 0x10b   : > { %v954_v59 = vadd.f32 %v953_v47, %v808_v44  ;;  %v3062_v56 = vpop.f32.mrf.mxu0 }
 0x10c   : > { %v3094_v2 = vpop.f32.mrf.mxu1 }
 0x10d   : > { %v965_v46 = vadd.f32 %v3094_v2, %v3062_v56  ;;  %v811_v27 = vpop.f32.mrf.mxu0 }
 0x10e   : > { %v956_v60 = vpop.f32.mrf.mxu1 }
 0x10f   : > { %v957_v62 = vadd.f32 %v956_v60, %v811_v27  ;;  %v3113_v51 = vpop.f32.mrf.mxu0 }
 0x110   : > { %v1132_v6 = vadd.f32 %v3113_v51, %v914_v12  ;;  %v3145_v21 = vpop.f32.mrf.mxu1 }
 0x111   : > { %v1067_v31 = vpop.f32.mrf.mxu0 }
 0x112   : > { %v4064_v0 = vadd.f32 %v3145_v21, %v1132_v6  ;;  %v1130_v40 = vadd.f32 %v1067_v31, %v906_v16  ;;  %v1245_v55 = vpop.f32.mrf.mxu1 }
 0x113   : > { %v3114_v1 = vpop.f32.mrf.mxu0 }
 0x114   : > { %v4066_v3 = vadd.f32 %v1245_v55, %v1130_v40  ;;  %v1133_v58 = vadd.f32 %v3114_v1, %v917_v22  ;;  %v3146_v61 = vpop.f32.mrf.mxu1 }
 0x115   : > { %v1070_v4 = vpop.f32.mrf.mxu0 }
 0x116   : > { %v4068_v5 = vadd.f32 %v3146_v61, %v1133_v58  ;;  %v1131_v63 = vadd.f32 %v1070_v4, %v909_v57  ;;  %v1248_v7 = vpop.f32.mrf.mxu1 }
 0x117   : > { %v3117_v8 = vpop.f32.mrf.mxu0 }
 0x118   : > { %v4070_v9 = vadd.f32 %v1248_v7, %v1131_v63  ;;  %v1136_v11 = vadd.f32 %v3117_v8, %v930_v30  ;;  %v3149_v12 = vpop.f32.mrf.mxu1 }
 0x119   : > { %v1083_v13 = vpop.f32.mrf.mxu0 }
 0x11a   : > { %v4072_v14 = vadd.f32 %v3149_v12, %v1136_v11  ;;  %v1134_v16 = vadd.f32 %v1083_v13, %v922_v43  ;;  %v1261_v17 = vpop.f32.mrf.mxu1 }
 0x11b   : > { %v3118_v19 = vpop.f32.mrf.mxu0 }
 0x11c   : > { %v4074_v23 = vadd.f32 %v1261_v17, %v1134_v16  ;;  %v1137_v22 = vadd.f32 %v3118_v19, %v933_v33  ;;  %v3150_v24 = vpop.f32.mrf.mxu1 }
 0x11d   : > { %v1086_v25 = vpop.f32.mrf.mxu0 }
 0x11e   : > { %v4076_v26 = vadd.f32 %v3150_v24, %v1137_v22  ;;  %v1135_v57 = vadd.f32 %v1086_v25, %v925_v36  ;;  %v1264_v10 = vpop.f32.mrf.mxu1 }
 0x11f   : > { %v3121_v32 = vpop.f32.mrf.mxu0 }
 0x120   : > { %v4078_v29 = vadd.f32 %v1264_v10, %v1135_v57  ;;  %v1140_v30 = vadd.f32 %v3121_v32, %v946_v41  ;;  %v3153_v20 = vpop.f32.mrf.mxu1 }
 0x121   : > { %v1099_v34 = vpop.f32.mrf.mxu0 }
 0x122   : > { %v4080_v35 = vadd.f32 %v3153_v20, %v1140_v30  ;;  %v1138_v43 = vadd.f32 %v1099_v34, %v938_v28  ;;  %v1277_v37 = vpop.f32.mrf.mxu1 }
 0x123   : > { %v3122_v39 = vpop.f32.mrf.mxu0 }
 0x124   : > { %v4082_v42 = vadd.f32 %v1277_v37, %v1138_v43  ;;  %v1141_v33 = vadd.f32 %v3122_v39, %v949_v50  ;;  %v3154_v45 = vpop.f32.mrf.mxu1 }
 0x125   : > { %v1102_v48 = vpop.f32.mrf.mxu0 }
 0x126   : > { %v4084_v49 = vadd.f32 %v3154_v45, %v1141_v33  ;;  %v1139_v36 = vadd.f32 %v1102_v48, %v941_v18  ;;  %v1280_v15 = vpop.f32.mrf.mxu1 }
 0x127   : > { %v3125_v52 = vpop.f32.mrf.mxu0 }
 0x128   : > { %v4086_v53 = vadd.f32 %v1280_v15, %v1139_v36  ;;  %v1144_v41 = vadd.f32 %v3125_v52, %v962_v54  ;;  %v3157_v38 = vpop.f32.mrf.mxu1 }
 0x129   : > { %v1115_v44 = vpop.f32.mrf.mxu0 }
 0x12a   : > { %v4088_v47 = vadd.f32 %v3157_v38, %v1144_v41  ;;  %v1142_v28 = vadd.f32 %v1115_v44, %v954_v59  ;;  %v1293_v56 = vpop.f32.mrf.mxu1 }
 0x12b   : > { %v3126_v2 = vpop.f32.mrf.mxu0 }
 0x12c   : > { %v4090_v27 = vadd.f32 %v1293_v56, %v1142_v28  ;;  %v1145_v50 = vadd.f32 %v3126_v2, %v965_v46  ;;  %v3158_v60 = vpop.f32.mrf.mxu1 }
 0x12d   : > { %v1118_v51 = vpop.f32.mrf.mxu0 }
 0x12e   : > { %v4092_v6 = vadd.f32 %v3158_v60, %v1145_v50  ;;  %v1143_v18 = vadd.f32 %v1118_v51, %v957_v62  ;;  %v1296_v21 = vpop.f32.mrf.mxu1 }
 0x12f   : > { %v3177_v31 = vpop.f32.mrf.mxu0 }
 0x130   : > { %v4094_v40 = vadd.f32 %v1296_v21, %v1143_v18  ;;  %v4096_v54 = vpop.f32.mrf.mxu1 }
 0x131   : > { %v1423_v55 = vpop.f32.mrf.mxu0 }
 0x132   : > { %v4098_v1 = vpop.f32.mrf.mxu1 }
 0x133   : > { %v3178_v59 = vpop.f32.mrf.mxu0 }
 0x134   : > { %v4100_v58 = vpop.f32.mrf.mxu1 }
 0x135   : > { %v1426_v61 = vpop.f32.mrf.mxu0 }
 0x136   : > { %v4102_v4 = vpop.f32.mrf.mxu1 }
 0x137   : > { %v3181_v46 = vpop.f32.mrf.mxu0 }
 0x138   : > { %v4104_v63 = vpop.f32.mrf.mxu1 }
 0x139   : > { %v1439_v7 = vpop.f32.mrf.mxu0 }
 0x13a   : > { %v1617_v62 = vpop.f32.mrf.mxu1 }
 0x13b   : > { %v4106_v8 = vpop.f32.mrf.mxu0 }
 0x13c   : > { %v4108_v11 = vpop.f32.mrf.mxu1 }
 0x13d   : > { %v4110_v12 = vpop.f32.mrf.mxu0 }
 0x13e   : > { %v4112_v13 = vpop.f32.mrf.mxu1 }
 0x13f   : > { %v3185_v16 = vpop.f32.mrf.mxu0 }
 0x140   : > { %v4114_v17 = vpop.f32.mrf.mxu1 }
 0x141   : > { %v1455_v19 = vpop.f32.mrf.mxu0 }
 0x142   : > { %v4116_v22 = vpop.f32.mrf.mxu1 }
 0x143   : > { %v3186_v24 = vpop.f32.mrf.mxu0 }
 0x144   : > { %v3218_v25 = vpop.f32.mrf.mxu1 }
 0x145   : > { %v1458_v57 = vpop.f32.mrf.mxu0 }
 0x146   : > { %v4118_v10 = vpop.f32.mrf.mxu1 }
 0x147   : > { %v3189_v32 = vpop.f32.mrf.mxu0 }
 0x148   : > { %v4120_v30 = vpop.f32.mrf.mxu1 }
 0x149   : > { %v1471_v20 = vpop.f32.mrf.mxu0 }
 0x14a   : > { %v4122_v34 = vpop.f32.mrf.mxu1 }
 0x14b   : > { %v3190_v43 = vpop.f32.mrf.mxu0 }
 0x14c   : > { %v4124_v37 = vpop.f32.mrf.mxu1 }
 0x14d   : > { %4313 = vst [vmem:[#allocation2_spill] sm:$0xff] %v4124_v37  ;;  %v1474_v39 = vpop.f32.mrf.mxu0 }
 0x14e   : > { %v4126_v33 = vpop.f32.mrf.mxu1 }
 0x14f   : > { %4314 = vst [vmem:[#allocation3_spill] sm:$0xff] %v4126_v33  ;;  %v3241_v45 = vpop.f32.mrf.mxu0 }
 0x150   : > { %v4128_v48 = vpop.f32.mrf.mxu1 }
 0x151   : > { %4315 = vst [vmem:[#allocation4_spill] sm:$0xff] %v4128_v48  ;;  %v1779_v36 = vpop.f32.mrf.mxu0 }
 0x152   : > { %v4130_v15 = vpop.f32.mrf.mxu1 }
 0x153   : > { %4316 = vst [vmem:[#allocation5_spill] sm:$0xff] %v4130_v15  ;;  %v3242_v52 = vpop.f32.mrf.mxu0 }
 0x154   : > { %v4132_v41 = vpop.f32.mrf.mxu1 }
 0x155   : > { %4317 = vst [vmem:[#allocation6_spill] sm:$0xff] %v4132_v41  ;;  %v1782_v38 = vpop.f32.mrf.mxu0 }
 0x156   : > { %v4134_v44 = vpop.f32.mrf.mxu1 }
 0x157   : > { %4318 = vst [vmem:[#allocation7_spill] sm:$0xff] %v4134_v44  ;;  %v4136_v28 = vpop.f32.mrf.mxu0 }
 0x158   : > { %4319 = vst [vmem:[#allocation8_spill] sm:$0xff] %v4136_v28  ;;  %v4138_v56 = vpop.f32.mrf.mxu1 }
 0x159   : > { %4320 = vst [vmem:[#allocation9_spill] sm:$0xff] %v4138_v56  ;;  %v4140_v2 = vpop.f32.mrf.mxu0 }
 0x15a   : > { %4321 = vst [vmem:[#allocation10_spill] sm:$0xff] %v4140_v2  ;;  %v4142_v50 = vpop.f32.mrf.mxu1 }
 0x15b   : > { %4322 = vst [vmem:[#allocation11_spill] sm:$0xff] %v4142_v50  ;;  %v4144_v60 = vpop.f32.mrf.mxu0  ;;  %v1488_v50 = vadd.f32 %v3177_v31, %v4064_v0  ;;  %v1497_v0 = vadd.f32 %v3186_v24, %v4084_v49 }
 0x15c   : > { %4323 = vst [vmem:[#allocation12_spill] sm:$0xff] %v4144_v60  ;;  %v4146_v51 = vpop.f32.mrf.mxu1  ;;  %v1486_v60 = vadd.f32 %v1423_v55, %v4066_v3 }
 0x15d   : > { %4324 = vst [vmem:[#allocation13_spill] sm:$0xff] %v4146_v51  ;;  %v4148_v18 = vpop.f32.mrf.mxu0  ;;  %v1489_v51 = vadd.f32 %v3178_v59, %v4068_v5  ;;  %v1666_v3 = vadd.f32 %v4096_v54, %v1488_v50  ;;  %v1491_v54 = vadd.f32 %v4110_v12, %v4078_v29 }
 0x15e   : > { %4325 = vst [vmem:[#allocation14_spill] sm:$0xff] %v4148_v18  ;;  %v4150_v21 = vpop.f32.mrf.mxu1  ;;  %v1487_v18 = vadd.f32 %v1426_v61, %v4070_v9  ;;  %v1664_v5 = vadd.f32 %v4098_v1, %v1486_v60  ;;  %v1494_v61 = vadd.f32 %v1455_v19, %v4082_v42  ;;  %v1500_v1 = vadd.f32 %v3189_v32, %v4088_v47 }
 0x15f   : > { %4326 = vst [vmem:[#allocation15_spill] sm:$0xff] %v4150_v21  ;;  %v3249_v41 = vpop.f32.mrf.mxu0  ;;  %v1492_v21 = vadd.f32 %v3181_v46, %v4072_v14  ;;  %v1667_v9 = vadd.f32 %v4100_v58, %v1489_v51  ;;  %v1493_v46 = vadd.f32 %v4106_v8, %v4076_v26  ;;  %v1498_v58 = vadd.f32 %v1471_v20, %v4090_v27  ;;  %v4330_v20 = vld [vmem:[#allocation2_spill] sm:$0xff] }
 0x160   : > { %v4152_v15 = vpop.f32.mrf.mxu1  ;;  %v1665_v14 = vadd.f32 %v4102_v4, %v1487_v18  ;;  %v1501_v42 = vadd.f32 %v3190_v43, %v4092_v6  ;;  %v1842_v19 = vadd.f32 %v1779_v36, %v1664_v5  ;;  %v1672_v29 = vadd.f32 %v4116_v22, %v1494_v61 }
 0x161   : > { %4327 = vst [vmem:[#allocation16_spill] sm:$0xff] %v4152_v15  ;;  %v1811_v44 = vpop.f32.mrf.mxu0  ;;  %v1490_v15 = vadd.f32 %v1439_v7, %v4074_v23  ;;  %v1670_v23 = vadd.f32 %v4104_v63, %v1492_v21  ;;  %v1675_v7 = vadd.f32 %v3218_v25, %v1497_v0  ;;  %v1845_v26 = vadd.f32 %v3242_v52, %v1667_v9  ;;  %v4337_v60 = vld [vmem:[#allocation10_spill] sm:$0xff] }
 0x162   : > { %v4154_v48 = vpop.f32.mrf.mxu1  ;;  %v1843_v8 = vadd.f32 %v1782_v38, %v1665_v14  ;;  %v1669_v6 = vadd.f32 %v4112_v13, %v1491_v54  ;;  %v1676_v25 = vadd.f32 %v4122_v34, %v1498_v58  ;;  %v1679_v43 = vadd.f32 %v4330_v20, %v1501_v42  ;;  %v4344_v20 = vld [vmem:[#allocation11_spill] sm:$0xff] }
 0x163   : > { %4328 = vst [vmem:[#allocation17_spill] sm:$0xff] %v4154_v48  ;;  %v3250_v28 = vpop.f32.mrf.mxu0  ;;  %v1668_v59 = vadd.f32 %v1617_v62, %v1490_v15  ;;  %v1850_v22 = vadd.f32 %v1811_v44, %v1672_v29  ;;  %v4332_v15 = vld [vmem:[#allocation4_spill] sm:$0xff] }
 0x164   : > { %v4156_v56 = vpop.f32.mrf.mxu1  ;;  %v1853_v12 = vadd.f32 %v3250_v28, %v1675_v7  ;;  %v4334_v28 = vld [vmem:[#allocation6_spill] sm:$0xff] }
 0x165   : > { %4329 = vst [vmem:[#allocation18_spill] sm:$0xff] %v4156_v56  ;;  %v1814_v2 = vpop.f32.mrf.mxu0  ;;  %v1496_v56 = vadd.f32 %v3185_v16, %v4080_v35  ;;  %v1495_v35 = vadd.f32 %v1458_v57, %v4086_v53  ;;  %v1499_v53 = vadd.f32 %v1474_v39, %v4094_v40  ;;  %v1844_v16 = vadd.f32 %v3241_v45, %v1666_v3  ;;  %v4331_v39 = vld [vmem:[#allocation3_spill] sm:$0xff]  ;;  %v4340_v3 = vld [vmem:[#allocation12_spill] sm:$0xff]  ;;  %v4341_v9 = vld [vmem:[#allocation14_spill] sm:$0xff] }
 0x166   : > { %v4162_v33 = vpop.f32.mrf.mxu1  ;;  %v1678_v40 = vadd.f32 %v4120_v30, %v1500_v1  ;;  %v4336_v30 = vld [vmem:[#allocation8_spill] sm:$0xff]  ;;  %v1846_v51 = vadd.f32 %v4337_v60, %v1668_v59  ;;  %v1847_v14 = vadd.f32 %v4341_v9, %v1669_v6 }
 0x167   : > { %v4166_v37 = vpop.f32.mrf.mxu0  ;;  %v1674_v63 = vadd.f32 %v4114_v17, %v1496_v56  ;;  %v1673_v47 = vadd.f32 %v4118_v10, %v1495_v35  ;;  %v1671_v17 = vadd.f32 %v4108_v11, %v1493_v46  ;;  %v1677_v45 = vadd.f32 %v4331_v39, %v1499_v53  ;;  %v4335_v56 = vld [vmem:[#allocation7_spill] sm:$0xff]  ;;  %v4345_v39 = vld [vmem:[#allocation13_spill] sm:$0xff] }
 0x168   : > { %v4168_v48 = vpop.f32.mrf.mxu1  ;;  %v2022_v52 = vadd.f32 %v4332_v15, %v1844_v16  ;;  %v2023_v11 = vadd.f32 %v4334_v28, %v1845_v26  ;;  %v2021_v13 = vadd.f32 %v4335_v56, %v1843_v8  ;;  %v1848_v34 = vadd.f32 %v4336_v30, %v1670_v23  ;;  %v4338_v18 = vld [vmem:[#allocation16_spill] sm:$0xff]  ;;  %v4346_v15 = vld [vmem:[#allocation15_spill] sm:$0xff] }
 0x169   : > { %v4172_v31 = vpop.f32.mrf.mxu0  ;;  %v1852_v27 = vadd.f32 %v3249_v41, %v1674_v63  ;;  %v1851_v36 = vadd.f32 %v1814_v2, %v1673_v47  ;;  %v4333_v41 = vld [vmem:[#allocation5_spill] sm:$0xff]  ;;  %v1849_v5 = vadd.f32 %v4340_v3, %v1671_v17  ;;  %v1856_v7 = vadd.f32 %v4166_v37, %v1678_v40 }
 0x16a   : > { %v4178_v55 = vpop.f32.mrf.mxu1  ;;  %v2020_v38 = vadd.f32 %v4333_v41, %v1842_v19  ;;  %v4342_v54 = vld [vmem:[#allocation17_spill] sm:$0xff] }
 0x16b   : > { %v3254_v49 = vpop.f32.mrf.mxu0  ;;  %v2030_v21 = vadd.f32 %v4338_v18, %v1852_v27  ;;  %v2028_v1 = vadd.f32 %v4342_v54, %v1850_v22  ;;  %v2029_v23 = vadd.f32 %v4162_v33, %v1851_v36  ;;  %v4343_v40 = vld [vmem:[#allocation9_spill] sm:$0xff]  ;;  %v2027_v22 = vadd.f32 %v4345_v39, %v1849_v5 }
 0x16c   : > { %v4189_v4 = vpop.f32.mrf.mxu1  ;;  %v4339_v0 = vld [vmem:[#allocation18_spill] sm:$0xff]  ;;  %v1857_v19 = vadd.f32 %v3254_v49, %v1679_v43  ;;  %v1854_v49 = vadd.f32 %v4172_v31, %v1676_v25  ;;  %v2024_v43 = vadd.f32 %v4344_v20, %v1846_v51  ;;  %v2034_v31 = vadd.f32 %v4168_v48, %v1856_v7 }
 0x16d   : > { %v1830_v62 = vpop.f32.mrf.mxu0  ;;  %v2031_v44 = vadd.f32 %v4339_v0, %v1853_v12 }
 0x16e   : > { %v4194_v24 = vpop.f32.mrf.mxu1  ;;  %v2032_v56 = vadd.f32 %v4178_v55, %v1854_v49 }
 0x16f   : > { %v3305_v57 = vpop.f32.mrf.mxu0 }
 0x170   : > { %v3313_v32 = vpop.f32.mrf.mxu1  ;;  %v4215_v61 = vadd.f32 %v3305_v57, %v2022_v52  ;;  %v1855_v57 = vadd.f32 %v1830_v62, %v1677_v45  ;;  %v2025_v52 = vadd.f32 %v4346_v15, %v1847_v14  ;;  %v2035_v62 = vadd.f32 %v4189_v4, %v1857_v19 }
 0x171   : > { %v2135_v10 = vpop.f32.mrf.mxu0  ;;  %v4221_v58 = vadd.f32 %v3313_v32, %v2030_v21  ;;  %v2026_v32 = vadd.f32 %v4343_v40, %v1848_v34 }
 0x172   : > { %v2167_v50 = vpop.f32.mrf.mxu1  ;;  %v4231_v42 = vadd.f32 %v2135_v10, %v2020_v38 }
 0x173   : > { %v3306_v2 = vpop.f32.mrf.mxu0  ;;  %v4237_v26 = vadd.f32 %v2167_v50, %v2028_v1 }
 0x174   : > { %v4217_v35 = vadd.f32 %v3306_v2, %v2023_v11  ;;  %v3314_v46 = vpop.f32.mrf.mxu1 }
 0x175   : > { %v4228_v59 = vadd.f32 %v3314_v46, %v2031_v44  ;;  %v2138_v63 = vpop.f32.mrf.mxu0 }
 0x176   : > { %v2848_v53 = vpack.c.bf16 %v4217_v35, %v4215_v61  ;;  %v4235_v33 = vadd.f32 %v2138_v63, %v2021_v13  ;;  %v2170_v16 = vpop.f32.mrf.mxu1  ;;  %v2033_v13 = vadd.f32 %v4194_v24, %v1855_v57 }
 0x177   : > { %v2868_v8 = vpack.c.bf16 %v4228_v59, %v4221_v58  ;;  %v4241_v29 = vadd.f32 %v2170_v16, %v2029_v23  ;;  %v3309_v47 = vpop.f32.mrf.mxu0 }
 0x178   : > { %2880 = vst [vmem:[%s4226_s13 + $0x8] sm:$0xff] %v2848_v53   ;;  %v2843_v37 = vpack.c.bf16 %v4235_v33, %v4231_v42  ;;  %v2294_v27 = vadd.f32 %v4235_v33, %v4231_v42  ;;  %v3317_v12 = vpop.f32.mrf.mxu1  ;;  %v2204_v45 = vadd.f32 %v3309_v47, %v2026_v32 }
 0x179   : > { %2884 = vst [vmem:[%s4226_s13 + $0x28] sm:$0xff] %v2868_v8   ;;  %v2863_v17 = vpack.c.bf16 %v4241_v29, %v4237_v26  ;;  %v2151_v6 = vpop.f32.mrf.mxu0  ;;  %v2212_v50 = vadd.f32 %v3317_v12, %v2034_v31 }
 0x17a   : > { %2844 = vst [vmem:[%s4226_s13] sm:$0xff] %v2843_v37   ;;  %v2295_v36 = vadd.f32 %v2294_v27, %v4215_v61  ;;  %v2183_v10 = vpop.f32.mrf.mxu1  ;;  %v2202_v41 = vadd.f32 %v2151_v6, %v2024_v43 }
 0x17b   : > { %2883 = vst [vmem:[%s4226_s13 + $0x20] sm:$0xff] %v2863_v17   ;;  %v3310_v25 = vpop.f32.mrf.mxu0  ;;  %v2210_v18 = vadd.f32 %v2183_v10, %v2032_v56 }
 0x17c   : > { %v2296_v38 = vadd.f32 %v2295_v36, %v4217_v35  ;;  %v2205_v28 = vadd.f32 %v3310_v25, %v2027_v22  ;;  %v3318_v11 = vpop.f32.mrf.mxu1 }
 0x17d   : > { %v2213_v30 = vadd.f32 %v3318_v11, %v2035_v62  ;;  %v2154_v48 = vpop.f32.mrf.mxu0 }
 0x17e   : > { %v2297_v4 = vadd.f32 %v2296_v38, %v2202_v41  ;;  %v2858_v34 = vpack.c.bf16 %v2205_v28, %v2204_v45  ;;  %v2203_v60 = vadd.f32 %v2154_v48, %v2025_v52  ;;  %v2186_v51 = vpop.f32.mrf.mxu1 }
 0x17f   : > { %v2878_v21 = vpack.c.bf16 %v2213_v30, %v2212_v50  ;;  %v2211_v0 = vadd.f32 %v2186_v51, %v2033_v13 }
 0x180   : > { %2882 = vst [vmem:[%s4226_s13 + $0x18] sm:$0xff] %v2858_v34   ;;  %v2853_v44 = vpack.c.bf16 %v2203_v60, %v2202_v41  ;;  %v2298_v2 = vadd.f32 %v2297_v4, %v2203_v60 }
 0x181   : > { %2886 = vst [vmem:[%s4226_s13 + $0x38] sm:$0xff] %v2878_v21   ;;  %v2873_v3 = vpack.c.bf16 %v2211_v0, %v2210_v18 }
 0x182   : > { %2881 = vst [vmem:[%s4226_s13 + $0x10] sm:$0xff] %v2853_v44   ;;  %v2299_v55 = vadd.f32 %v2298_v2, %v2204_v45 }
 0x183   : > { %2885 = vst [vmem:[%s4226_s13 + $0x30] sm:$0xff] %v2873_v3  }
 0x184   : > { %v2300_v24 = vadd.f32 %v2299_v55, %v2205_v28 }
 0x186   : > { %v2301_v5 = vadd.f32 %v2300_v24, %v4237_v26 }
 0x188   : > { %v2302_v9 = vadd.f32 %v2301_v5, %v4241_v29 }
 0x18a   : > { %v2303_v14 = vadd.f32 %v2302_v9, %v4221_v58 }
 0x18c   : > { %v2304_v46 = vadd.f32 %v2303_v14, %v4228_v59 }
 0x18e   : > { %v2305_v54 = vadd.f32 %v2304_v46, %v2210_v18 }
 0x190   : > { %v2306_v1 = vadd.f32 %v2305_v54, %v2211_v0 }
 0x192   : > { %v2307_v23 = vadd.f32 %v2306_v1, %v2212_v50 }
 0x194   : > { %v2308_v63 = vadd.f32 %v2307_v23, %v2213_v30 }
 0x196   : > { %v2309_v7 = vrot.slane %v2308_v63, 4 }
 0x198   : > { %v2310_v53 = vadd.f32 %v2309_v7, %v2308_v63 }
 0x19a   : > { %v2311_v16 = vrot.slane %v2310_v53, 2 }
 0x19c   : > { %v2312_v19 = vadd.f32 %v2311_v16, %v2310_v53 }
 0x19e   : > { %v2313_v8 = vrot.slane %v2312_v19, 1 }
 0x1a0   : > { %v2314_v47 = vadd.f32 %v2313_v8, %v2312_v19 }
 0x1a2   : > { %v2315_v37 = vmul.f32 0.0078125, %v2314_v47 }
 0x1a4   : > { %v2316_v27 = vsub.f32 %v4231_v42, %v2315_v37  ;;  %v2317_v12 = vsub.f32 %v4235_v33, %v2315_v37  ;;  %v2318_v49 = vsub.f32 %v4215_v61, %v2315_v37  ;;  %v2319_v57 = vsub.f32 %v4217_v35, %v2315_v37 }
 0x1a5   : > { %v2320_v17 = vsub.f32 %v2202_v41, %v2315_v37  ;;  %v2321_v6 = vsub.f32 %v2203_v60, %v2315_v37  ;;  %v2322_v40 = vsub.f32 %v2204_v45, %v2315_v37  ;;  %v2323_v32 = vsub.f32 %v2205_v28, %v2315_v37 }
 0x1a6   : > { %v2324_v20 = vsub.f32 %v4237_v26, %v2315_v37  ;;  %v2325_v43 = vsub.f32 %v4241_v29, %v2315_v37  ;;  %v2326_v39 = vsub.f32 %v4221_v58, %v2315_v37  ;;  %v2327_v22 = vsub.f32 %v4228_v59, %v2315_v37 }
 0x1a7   : > { %v2328_v36 = vsub.f32 %v2210_v18, %v2315_v37  ;;  %v2329_v42 = vsub.f32 %v2211_v0, %v2315_v37  ;;  %v2330_v10 = vsub.f32 %v2212_v50, %v2315_v37  ;;  %v2331_v33 = vsub.f32 %v2213_v30, %v2315_v37 }
 0x1a8   : > { %v2332_v15 = vmul.f32 %v2316_v27, %v2316_v27  ;;  %v2333_v61 = vmul.f32 %v2317_v12, %v2317_v12  ;;  %v2334_v52 = vmul.f32 %v2318_v49, %v2318_v49  ;;  %v2335_v31 = vmul.f32 %v2319_v57, %v2319_v57 }
 0x1a9   : > { %v2336_v25 = vmul.f32 %v2320_v17, %v2320_v17  ;;  %v2337_v41 = vmul.f32 %v2321_v6, %v2321_v6  ;;  %v2338_v38 = vmul.f32 %v2322_v40, %v2322_v40  ;;  %v2339_v28 = vmul.f32 %v2323_v32, %v2323_v32 }
 0x1aa   : > { %v2348_v35 = vadd.f32 %v2333_v61, %v2332_v15  ;;  %v2340_v11 = vmul.f32 %v2324_v20, %v2324_v20  ;;  %v2341_v56 = vmul.f32 %v2325_v43, %v2325_v43  ;;  %v2342_v50 = vmul.f32 %v2326_v39, %v2326_v39 }
 0x1ab   : > { %v2343_v48 = vmul.f32 %v2327_v22, %v2327_v22  ;;  %v2344_v34 = vmul.f32 %v2328_v36, %v2328_v36  ;;  %v2345_v51 = vmul.f32 %v2329_v42, %v2329_v42  ;;  %v2346_v21 = vmul.f32 %v2330_v10, %v2330_v10 }
 0x1ac   : > { %v2349_v62 = vadd.f32 %v2348_v35, %v2334_v52  ;;  %v2347_v44 = vmul.f32 %v2331_v33, %v2331_v33 }
 0x1ae   : > { %v2350_v45 = vadd.f32 %v2349_v62, %v2335_v31 }
 0x1b0   : > { %v2351_v26 = vadd.f32 %v2350_v45, %v2336_v25 }
 0x1b2   : > { %v2352_v29 = vadd.f32 %v2351_v26, %v2337_v41 }
 0x1b4   : > { %v2353_v58 = vadd.f32 %v2352_v29, %v2338_v38 }
 0x1b6   : > { %v2354_v59 = vadd.f32 %v2353_v58, %v2339_v28 }
 0x1b8   : > { %v2355_v13 = vadd.f32 %v2354_v59, %v2340_v11 }
 0x1ba   : > { %v2356_v30 = vadd.f32 %v2355_v13, %v2341_v56 }
 0x1bc   : > { %v2357_v4 = vadd.f32 %v2356_v30, %v2342_v50 }
 0x1be   : > { %v2358_v60 = vadd.f32 %v2357_v4, %v2343_v48 }
 0x1c0   : > { %v2359_v18 = vadd.f32 %v2358_v60, %v2344_v34 }
 0x1c2   : > { %v2360_v0 = vadd.f32 %v2359_v18, %v2345_v51 }
 0x1c4   : > { %v2361_v2 = vadd.f32 %v2360_v0, %v2346_v21 }
 0x1c6   : > { %v2362_v3 = vadd.f32 %v2361_v2, %v2347_v44 }
 0x1c8   : > { %v2363_v55 = vrot.slane %v2362_v3, 4 }
 0x1ca   : > { %v2364_v24 = vadd.f32 %v2363_v55, %v2362_v3 }
 0x1cc   : > { %v2365_v5 = vrot.slane %v2364_v24, 2 }
 0x1ce   : > { %v2366_v9 = vadd.f32 %v2365_v5, %v2364_v24 }
 0x1d0   : > { %v2367_v14 = vrot.slane %v2366_v9, 1 }
 0x1d2   : > { %v2368_v46 = vadd.f32 %v2367_v14, %v2366_v9 }
 0x1d4   : > { %v2370_v54 = vsel %vm589_vm0, %v2315_v37, %v2368_v46 }
 0x1d5   : > { %2371 = vst [vmem:[%s467_s8] sm:$0x3] %v2370_v54 }
 0x1d6 PF: > { %s18_s28 = sadd.s32 1, %s3485_s28   ;;  %s4347_s24 = smov %s3477_s26 }
 0x1d7   : > { %p15_p12 = scmp.ge.s32.totalorder %s18_s28, 6   ;;  %s4348_s25 = smov %s3481_s27 }
 0x1d8   : > { %s4349_s26 = smov %s4352_s4  ;;  %s4350_s27 = smov %s4356_s5 }
 0x1d9   :  { %17 = sbr.rel (!%p15_p12) target bundleno = 3 (0x3), region = 100 }

// kernel: conv_block_forward.4
= control target key start
LH: loop header
LB: loop body
LE: loop exit
PB: predicated region body
PF: predicated region fallthrough
CT: control target
= control target key end

     0   :  { %s3670_s24 = smov 0   ;;  %s3672_s25 = smov 0   ;;  %s4531_s0 = inlined_call_operand.vmem [shape: bf16[2,16,16,128], index: 0, kind: input, shape index: {}, may-alias: {0,1,2}]   ;;  %s4532_s1 = inlined_call_operand.vmem [shape: bf16[2,16,16,128], index: 1, kind: input, shape index: {}, may-alias: {0,1,2}]   ;;  %s4533_s2 = inlined_call_operand.vmem [shape: bf16[2,16,16,128], index: 2, kind: input, shape index: {}, may-alias: {0,1,2}]   ;;  %s4534_s3 = inlined_call_operand.vmem [shape: bf16[9,128,128], index: 3, kind: input, shape index: {}]   ;;  %s4535_s4 = inlined_call_operand.vmem [shape: f32[1,128], index: 4, kind: input, shape index: {}]   ;;  %s4536_s5 = inlined_call_operand.vmem [shape: f32[1,128], index: 5, kind: input, shape index: {}]   ;;  %s4537_s6 = inlined_call_operand.vmem [shape: bf16[2,16,16,128], index: 6, kind: output, shape index: {0}]   ;;  %s4538_s7 = inlined_call_operand.vmem [shape: f32[2,2,2,128], index: 7, kind: output, shape index: {1}]  }
   0x1   :  { %s3674_s26 = smov 0   ;;  %s3676_s27 = smov 0  }
   0x2   :  { %s3678_s28 = smov 0  }
   0x3 LB: > { %s27_s29 = sadd.s32 1, %s3620_s26  ;;  %s30_s30 = sadd.s32 1, %s3624_s27  ;;  %s3628_s28 = sphi %s3678_s28, %s18_s28   ;;  %s3624_s27 = sphi %s3676_s27, %s4581_s27   ;;  %s3620_s26 = sphi %s3674_s26, %s4580_s26   ;;  %s3616_s25 = sphi %s3672_s25, %s4579_s25   ;;  %s3612_s24 = sphi %s3670_s24, %s4578_s24  }
   0x4   : > { %p28_p0 = scmp.ge.s32.totalorder %s27_s29, 2  ;;  %p2664_p1 = scmp.ge.s32.totalorder %s3628_s28, 1 }
   0x5   : > { %p328_p2 = scmp.lt.s32.totalorder %s3628_s28, 5 }
   0x6   : > { %s4583_s29 = smov (%p28_p0, %s27_s29), 0  ;;  %s4585_s30 = smov (!%p28_p0, %s30_s30), %s3624_s27 }
   0x7   : > { %p329_p3 = pnand %p2664_p1, %p328_p2  ;;  %p32_p4 = scmp.ge.s32.totalorder %s4585_s30, 2 }
   0x9   : > { %s4587_s30 = smov (%p32_p4, %s4585_s30), 0  ;;  %332 = sbr.rel (%p329_p3) target bundleno = 470 (0x1d6), region = 44 }
   0xe   : > { %v3518_v0 = vld [vmem:[%s4534_s3 + $0xf8] sm:$0xff]   ;;  %s3706_s10 = sshll.u32 %s3612_s24, 3  ;;  %p408_p5 = scmp.lt.s32.totalorder %s3616_s25, 1  ;;  %v3520_v2 = vld [vmem:[%s4534_s3 + $0xf0] sm:$0xff]   ;;  %v3522_v4 = vld [vmem:[%s4534_s3 + $0xe8] sm:$0xff]   ;;  %vm683_vm0 = vcmask 1040384  }
   0xf   : > { %v3519_v1 = vld [vmem:[%s4534_s3 + $0x38] sm:$0xff]   ;;  %3174 = vmatprep.subr.bf16.mxu0 %v3518_v0  ;;  %p424_p6 = scmp.lt.s32.totalorder %s3706_s10, 15  ;;  %v3521_v3 = vld [vmem:[%s4534_s3 + $0x30] sm:$0xff]   ;;  %v3523_v5 = vld [vmem:[%s4534_s3 + $0x28] sm:$0xff]   ;;  %s2666_s14 = sadd.s32 4294967295, %s3706_s10  ;;  %vm726_vm3 = vcmask 1047552  }
  0x10   : > { %3206 = vmatprep.subr.bf16.mxu1 %v3519_v1  ;;  %3175 = vmatpush3.bf16.msra.mxu0 %v3518_v0  ;;  %s4589_s25 = smov (!%p408_p5, %s3616_s25), 1  ;;  %v3524_v6 = vld [vmem:[%s4534_s3 + $0xe0] sm:$0xff]   ;;  %p406_p7 = scmp.gt.s32.totalorder %s2666_s14, 0  ;;  %v3526_v8 = vld [vmem:[%s4534_s3 + $0xd8] sm:$0xff]   ;;  %v3528_v10 = vld [vmem:[%s4534_s3 + $0xd0] sm:$0xff]  }
  0x11   : > { %3207 = vmatpush3.bf16.msra.mxu1 %v3519_v1  ;;  %3176 = vmatprep.subr.bf16.mxu0 %v3520_v2  ;;  %s425_s19 = scalar_select %p424_p6, %s3706_s10, 15  ;;  %v3525_v7 = vld [vmem:[%s4534_s3 + $0x20] sm:$0xff]   ;;  %v3527_v9 = vld [vmem:[%s4534_s3 + $0x18] sm:$0xff]   ;;  %v3529_v11 = vld [vmem:[%s4534_s3 + $0x10] sm:$0xff]   ;;  %vm684_vm1 = vsmask.f32 256 }
  0x12   : > { %3208 = vmatprep.subr.bf16.mxu1 %v3521_v3  ;;  %s3728_s22 = sshll.u32 %s4589_s25, 5  ;;  %p2667_p8 = scmp.lt.s32.totalorder %s2666_s14, 15  ;;  %v3765_v13 = vld [vmem:[%s4535_s4] ss:$0 sm:$0xff]  ;;  %v3530_v17 = vld [vmem:[%s4534_s3 + $0xc8] sm:$0xff]   ;;  %v3534_v58 = vld [vmem:[%s4534_s3 + $0x1b8] sm:$0xff]  }
  0x13   : > { %s2676_s23 = sshll.u32 %s425_s19, 1  ;;  %s4591_s14 = smov (!%p406_p7, %s2666_s14), 0  ;;  %v3775_v20 = vld [vmem:[%s4536_s5] ss:$0 sm:$0xff]  ;;  %v3531_v23 = vld [vmem:[%s4534_s3 + $0x8] sm:$0xff]   ;;  %v3834_v59 = vld [vmem:[%s4534_s3 + $0x78] sm:$0xff]  }
  0x14   : > { %3177 = vmatpush3.bf16.msra.mxu0 %v3520_v2  ;;  %s3731_s8 = sadd.s32 %s2676_s23, %s3728_s22  ;;  %s4593_s14 = smov (!%p2667_p8, %s4591_s14), 15  ;;  %v3532_v36 = vld [vmem:[%s4534_s3 + $0xc0] sm:$0xff]   ;;  %vm3848_vm2 = vmand %vm683_vm0, %vm684_vm1  ;;  %vm727_vm4 = vsmask.f32 7424 }
  0x15   : > { %3209 = vmatpush3.bf16.msra.mxu1 %v3521_v3  ;;  %3178 = vmatprep.subr.bf16.mxu0 %v3522_v4  ;;  %s2678_s15 = sshll.u32 %s3731_s8, 2  ;;  %s2672_s16 = sshll.u32 %s4593_s14, 1  ;;  %v3533_v45 = vld [vmem:[%s4534_s3] sm:$0xff]   ;;  %vm4219_vm5 = vmand %vm726_vm3, %vm727_vm4 }
  0x16   : > { %3210 = vmatprep.subr.bf16.mxu1 %v3523_v5  ;;  %s3752_s23 = scalar_lea.vmem %s4532_s1, %s2678_s15  ;;  %p469_p9 = scmp.gt.s32.totalorder %s3612_s24, 0 }
  0x17   : > { %v2941_v12 = vld [vmem:[%s3752_s23] sm:$0xff]   ;;  %s414_s19 = sadd.s32 %s3728_s22, %s2672_s16  ;;  %v3016_v16 = vld [vmem:[%s3752_s23 + $0x8] sm:$0xff]   ;;  %s2919_s20 = sadd.s32 8, %s3706_s10  ;;  %v3017_v34 = vld [vmem:[%s3752_s23 + $0x10] sm:$0xff]  }
  0x18   : > { %3179 = vmatpush3.bf16.msra.mxu0 %v3522_v4  ;;  %v2942_v14 = vunpack.c.l.bf16 %v2941_v12  ;;  %v2943_v15 = vunpack.c.h.bf16 %v2941_v12  ;;  %s2674_s9 = sshll.u32 %s414_s19, 2  ;;  %v2946_v18 = vunpack.c.l.bf16 %v3016_v16  ;;  %v2947_v19 = vunpack.c.h.bf16 %v3016_v16  ;;  %p462_p10 = scmp.lt.s32.totalorder %s3612_s24, 1  ;;  %v3018_v35 = vld [vmem:[%s3752_s23 + $0x18] sm:$0xff]   ;;  %v3019_v4 = vld [vmem:[%s3752_s23 + $0x20] sm:$0xff]   ;;  %v3536_v16 = vld [vmem:[%s4534_s3 + $0x1b0] sm:$0xff]  }
  0x19   : > { %3211 = vmatpush3.bf16.msra.mxu1 %v3523_v5  ;;  %3180 = vmatprep.subr.bf16.mxu0 %v3524_v6  ;;  %s416_s16 = scalar_lea.vmem %s4531_s0, %s2674_s9  ;;  %v2950_v43 = vunpack.c.l.bf16 %v3017_v34  ;;  %v2951_v44 = vunpack.c.h.bf16 %v3017_v34  ;;  %v2954_v49 = vunpack.c.l.bf16 %v3018_v35  ;;  %v2955_v53 = vunpack.c.h.bf16 %v3018_v35  ;;  %p3821_p11 = scmp.lt.s32.totalorder %s2919_s20, 15  ;;  %v3566_v5 = vld [vmem:[%s4534_s3 + $0xb8] sm:$0xff]  }
  0x1a   : > { %3212 = vmatprep.subr.bf16.mxu1 %v3525_v7  ;;  %v533_v21 = vmul.f32 %v2942_v14, %v3765_v13  ;;  %v534_v22 = vmul.f32 %v2943_v15, %v3765_v13  ;;  %s3787_s19 = scalar_select %p469_p9, 1.0, 0.0  ;;  %v2937_v24 = vld [vmem:[%s416_s16] sm:$0xff]   ;;  %v535_v25 = vmul.f32 %v2946_v18, %v3765_v13  ;;  %v536_v26 = vmul.f32 %v2947_v19, %v3765_v13 }
  0x1b   : > { %v2938_v29 = vunpack.c.l.bf16 %v2937_v24  ;;  %v2939_v30 = vunpack.c.h.bf16 %v2937_v24  ;;  %s463_s14 = scalar_select %p462_p10, %s3612_s24, 1  ;;  %v537_v51 = vmul.f32 %v2950_v43, %v3765_v13  ;;  %v538_v52 = vmul.f32 %v2951_v44, %v3765_v13 }
  0x1c   : > { %3181 = vmatpush3.bf16.msra.mxu0 %v3524_v6  ;;  %v549_v27 = vadd.f32 %v3775_v20, %v533_v21  ;;  %v550_v28 = vadd.f32 %v3775_v20, %v534_v22  ;;  %v497_v31 = vstv %s3787_s19  ;;  %v551_v32 = vadd.f32 %v3775_v20, %v535_v25  ;;  %s2690_s16 = sshll.u32 %s4589_s25, 1  ;;  %s4595_s20 = smov (!%p3821_p11, %s2919_s20), 15  ;;  %v3020_v21 = vld [vmem:[%s3752_s23 + $0x28] sm:$0xff]  }
  0x1d   : > { %3213 = vmatpush3.bf16.msra.mxu1 %v3525_v7  ;;  %3182 = vmatprep.subr.bf16.mxu0 %v3526_v8  ;;  %v552_v33 = vadd.f32 %v3775_v20, %v536_v26  ;;  %v484_v39 = vmul.f32 %v2938_v29, %v3765_v13  ;;  %v485_v40 = vmul.f32 %v2939_v30, %v3765_v13  ;;  %s3836_s9 = sadd.s32 %s2690_s16, %s463_s14  ;;  %v2958_v18 = vunpack.c.l.bf16 %v3019_v4  ;;  %v3021_v26 = vld [vmem:[%s3752_s23 + $0x30] sm:$0xff]   ;;  %s4597_s20 = smov (!%p3821_p11, %s4595_s20), 15 }
  0x1e   : > { %3214 = vmatprep.subr.bf16.mxu1 %v3527_v9  ;;  %v565_v37 = vmax.f32 %v549_v27, 0.0  ;;  %v566_v38 = vmax.f32 %v550_v28, 0.0  ;;  %v567_v41 = vmax.f32 %v551_v32, 0.0  ;;  %v553_v62 = vadd.f32 %v3775_v20, %v537_v51  ;;  %s3916_s16 = sshll.u32 %s4597_s20, 1  ;;  %s4449_s25 = scalar_lea.vmem %s4537_s6, %s2678_s15 }
  0x1f   : > { %v568_v42 = vmax.f32 %v552_v33, 0.0  ;;  %v493_v47 = vadd.f32 %v3775_v20, %v484_v39  ;;  %v494_v48 = vadd.f32 %v3775_v20, %v485_v40  ;;  %v554_v63 = vadd.f32 %v3775_v20, %v538_v52  ;;  %v3537_v40 = vld [vmem:[%s4534_s3 + $0x70] sm:$0xff]   ;;  %s442_s19 = sadd.s32 %s3916_s16, %s3728_s22  ;;  %s2691_s8 = sshll.u32 %s3836_s9, 1 }
  0x20   : > { %3183 = vmatpush3.bf16.msra.mxu0 %v3526_v8  ;;  %v3811_v46 = vpack.c.bf16 %v566_v38, %v565_v37  ;;  %v539_v3 = vmul.f32 %v2954_v49, %v3765_v13  ;;  %v569_v8 = vmax.f32 %v553_v62, 0.0  ;;  %v540_v12 = vmul.f32 %v2955_v53, %v3765_v13  ;;  %v3022_v49 = vld [vmem:[%s3752_s23 + $0x38] sm:$0xff]   ;;  %s3967_s10 = sshll.u32 %s442_s19, 2  ;;  %s467_s14 = scalar_lea.vmem %s4538_s7, %s2691_s8 }
  0x21   : > { %3215 = vmatpush3.bf16.msra.mxu1 %v3527_v9  ;;  %3184 = vmatprep.subr.bf16.mxu0 %v3528_v10  ;;  %v3815_v50 = vpack.c.bf16 %v568_v42, %v567_v41  ;;  %v495_v56 = vmax.f32 %v493_v47, 0.0  ;;  %v496_v57 = vmax.f32 %v494_v48, 0.0  ;;  %v570_v9 = vmax.f32 %v554_v63, 0.0  ;;  %s444_s23 = scalar_lea.vmem %s4533_s2, %s3967_s10 }
  0x22   : > { %3216 = vmatprep.subr.bf16.mxu1 %v3529_v11  ;;  %v611_v54 = vshrl.u32 %v3811_v46, 16  ;;  %v614_v55 = vshll.u32 %v3811_v46, 16  ;;  %v555_v14 = vadd.f32 %v3775_v20, %v539_v3  ;;  %v2959_v19 = vunpack.c.h.bf16 %v3019_v4  ;;  %s472_s22 = scalar_select %p462_p10, 1.0, 0.0 }
  0x23   : > { %v618_v60 = vshrl.u32 %v3815_v50, 16  ;;  %v621_v61 = vshll.u32 %v3815_v50, 16  ;;  %v498_v1 = vmul.f32 %v497_v31, %v495_v56  ;;  %v499_v2 = vmul.f32 %v497_v31, %v496_v57  ;;  %v3538_v56 = vld [vmem:[%s4534_s3 + $0x1a8] sm:$0xff]  }
  0x24   : > { %3185 = vmatpush3.bf16.msra.mxu0 %v3528_v10  ;;  %v613_v0 = vrot.slane %v611_v54, 7  ;;  %v556_v25 = vadd.f32 %v3775_v20, %v540_v12  ;;  %v571_v30 = vmax.f32 %v555_v14, 0.0  ;;  %v541_v33 = vmul.f32 %v2958_v18, %v3765_v13  ;;  %v3539_v14 = vld [vmem:[%s4534_s3 + $0x68] sm:$0xff]  }
  0x25   : > { %3217 = vmatpush3.bf16.msra.mxu1 %v3529_v11  ;;  %3186 = vmatprep.subr.bf16.mxu0 %v3530_v17  ;;  %v620_v6 = vrot.slane %v618_v60, 7  ;;  %v3854_v7 = vrot.slane %v621_v61, 1  ;;  %v3864_v11 = vpack.c.bf16 %v499_v2, %v498_v1  ;;  %v542_v34 = vmul.f32 %v2959_v19, %v3765_v13  ;;  %v3540_v1 = vld [vmem:[%s4534_s3 + $0x1a0] sm:$0xff]  }
  0x26   : > { %3218 = vmatprep.subr.bf16.mxu1 %v3531_v23  ;;  %v616_v10 = vor.u32 %v614_v55, %v613_v0  ;;  %v572_v32 = vmax.f32 %v556_v25, 0.0  ;;  %v2963_v37 = vunpack.c.h.bf16 %v3020_v21  ;;  %v2966_v38 = vunpack.c.l.bf16 %v3021_v26 }
  0x27   : > { %v623_v15 = vor.u32 %v621_v61, %v620_v6  ;;  %v607_v24 = vshll.u32 %v3864_v11, 16  ;;  %v557_v42 = vadd.f32 %v3775_v20, %v541_v33  ;;  %v558_v43 = vadd.f32 %v3775_v20, %v542_v34 }
  0x28   : > { %3187 = vmatpush3.bf16.msra.mxu0 %v3530_v17  ;;  %v3871_v17 = vpack.c.bf16 %v570_v9, %v569_v8  ;;  %v687_v22 = vsel %vm3848_vm2, 0, %v616_v10  ;;  %v3900_v41 = vpack.c.bf16 %v572_v32, %v571_v30  ;;  %v544_v47 = vmul.f32 %v2963_v37, %v3765_v13 }
  0x29   : > { %3219 = vmatpush3.bf16.msra.mxu1 %v3531_v23  ;;  %3188 = vmatprep.subr.bf16.mxu0 %v3532_v36  ;;  %v604_v23 = vshrl.u32 %v3864_v11, 16  ;;  %v3883_v27 = vsel %vm3848_vm2, 0, %v623_v15  ;;  %v2967_v48 = vunpack.c.h.bf16 %v3021_v26  ;;  %v573_v57 = vmax.f32 %v557_v42, 0.0  ;;  %v3541_v26 = vld [vmem:[%s4534_s3 + $0x60] sm:$0xff]  }
  0x2a   : > { %3220 = vmatprep.subr.bf16.mxu1 %v3533_v45  ;;  %3190 = vmatprep.mubr.bf16.mxu0 %v687_v22  ;;  %v625_v28 = vshrl.u32 %v3871_v17, 16  ;;  %v628_v29 = vshll.u32 %v3871_v17, 16  ;;  %v632_v52 = vshrl.u32 %v3900_v41, 16  ;;  %v635_v53 = vshll.u32 %v3900_v41, 16 }
  0x2b   : > { %v606_v31 = vrot.slane %v604_v23, 7  ;;  %v574_v61 = vmax.f32 %v558_v43, 0.0  ;;  %v560_v63 = vadd.f32 %v3775_v20, %v544_v47  ;;  %v545_v2 = vmul.f32 %v2966_v38, %v3765_v13 }
  0x2c   : > { %3189 = vmatpush3.bf16.msra.mxu0 %v3532_v36  ;;  %v627_v35 = vrot.slane %v625_v28, 7  ;;  %v2962_v36 = vunpack.c.l.bf16 %v3020_v21  ;;  %v634_v0 = vrot.slane %v632_v52, 7  ;;  %v546_v3 = vmul.f32 %v2967_v48, %v3765_v13 }
  0x2d   : > { %3221 = vmatpush3.bf16.msra.mxu1 %v3533_v45  ;;  %3238 = vmatprep.subr.bf16.mxu0 %v3534_v58  ;;  %v609_v39 = vor.u32 %v607_v24, %v606_v31  ;;  %v2970_v4 = vunpack.c.l.bf16 %v3022_v49  ;;  %v3934_v6 = vpack.c.bf16 %v574_v61, %v573_v57  ;;  %v576_v9 = vmax.f32 %v560_v63, 0.0  ;;  %v3545_v61 = vld [vmem:[%s4534_s3 + $0x50] sm:$0xff]  }
  0x2e   : > { %3270 = vmatprep.subr.bf16.mxu1 %v3834_v59  ;;  %v630_v44 = vor.u32 %v628_v29, %v627_v35  ;;  %v543_v45 = vmul.f32 %v2962_v36, %v3765_v13  ;;  %v2971_v10 = vunpack.c.h.bf16 %v3022_v49  ;;  %v637_v12 = vor.u32 %v635_v53, %v634_v0  ;;  %v3543_v49 = vld [vmem:[%s4534_s3 + $0x58] sm:$0xff]  }
  0x2f   : > { %3191 = vmatmul.mubr.bf16.vlgmr.msra.gmra.mxu0 %v3883_v27  ;;  %v686_v51 = vsel %vm3848_vm2, 0, %v609_v39  ;;  %v561_v15 = vadd.f32 %v3775_v20, %v545_v2  ;;  %v639_v18 = vshrl.u32 %v3934_v6, 16  ;;  %v642_v19 = vshll.u32 %v3934_v6, 16  ;;  %v2973_v2 = vld [vmem:[%s444_s23] sm:$0xff]  }
  0x30   : > { %3239 = vmatpush3.bf16.msra.mxu0 %v3534_v58  ;;  %3222 = vmatprep.mubr.bf16.mxu1 %v686_v51  ;;  %v3920_v58 = vsel %vm3848_vm2, 0, %v630_v44  ;;  %v559_v62 = vadd.f32 %v3775_v20, %v543_v45  ;;  %v3952_v25 = vsel %vm3848_vm2, 0, %v637_v12  ;;  %v548_v32 = vmul.f32 %v2971_v10, %v3765_v13 }
  0x31   : > { %3240 = vmatprep.subr.bf16.mxu0 %v3536_v16  ;;  %3223 = vmatmul.mubr.bf16.vlgmr.msra.gmra.mxu1 %v687_v22  ;;  %v547_v22 = vmul.f32 %v2970_v4, %v3765_v13  ;;  %v577_v30 = vmax.f32 %v561_v15, 0.0  ;;  %v641_v33 = vrot.slane %v639_v18, 7  ;;  %v2975_v4 = vunpack.c.h.bf16 %v2973_v2  ;;  %v3548_v15 = vld [vmem:[%s4534_s3 + $0x180] sm:$0xff]  }
  0x32   : > { %3194 = vmatprep.mubr.bf16.mxu0 %v3920_v58  ;;  %3271 = vmatpush3.bf16.msra.mxu1 %v3834_v59  ;;  %v575_v8 = vmax.f32 %v559_v62, 0.0  ;;  %v562_v59 = vadd.f32 %v3775_v20, %v546_v3  ;;  %v564_v38 = vadd.f32 %v3775_v20, %v548_v32  ;;  %v2974_v3 = vunpack.c.l.bf16 %v2973_v2 }
  0x33   : > { %3226 = vmatprep.mubr.bf16.mxu1 %v3883_v27  ;;  %3272 = vmatprep.subr.bf16.mxu1 %v3537_v40  ;;  %v563_v36 = vadd.f32 %v3775_v20, %v547_v22  ;;  %v644_v42 = vor.u32 %v642_v19, %v641_v33  ;;  %v594_v12 = vmul.f32 %v2975_v4, %v3765_v13  ;;  %v3564_v4 = vld [vmem:[%s4534_s3 + $0x100] sm:$0xff]  }
  0x34   : > { %3241 = vmatpush3.bf16.msra.mxu0 %v3536_v16  ;;  %v696_v16 = vrot.slane %v607_v24, 1  ;;  %v3947_v21 = vpack.c.bf16 %v576_v9, %v575_v8  ;;  %v3542_v24 = vld [vmem:[%s4534_s3 + $0x198] sm:$0xff]   ;;  %v578_v31 = vmax.f32 %v562_v59, 0.0  ;;  %v593_v10 = vmul.f32 %v2974_v3, %v3765_v13  ;;  %v3563_v3 = vld [vmem:[%s4534_s3 + $0x1c8] sm:$0xff]  }
  0x35   : > { %3242 = vmatprep.subr.bf16.mxu0 %v3538_v56  ;;  %v579_v44 = vmax.f32 %v563_v36, 0.0  ;;  %v3993_v47 = vsel %vm3848_vm2, 0, %v644_v42  ;;  %v698_v59 = vrot.slane %v614_v55, 1  ;;  %v596_v22 = vadd.f32 %v3775_v20, %v594_v12  ;;  %v3570_v12 = vld [vmem:[%s4534_s3 + $0xa8] sm:$0xff]  }
  0x36   : > { %3273 = vmatpush3.bf16.msra.mxu1 %v3537_v40  ;;  %v646_v34 = vshrl.u32 %v3947_v21, 16  ;;  %v649_v35 = vshll.u32 %v3947_v21, 16  ;;  %v3969_v37 = vpack.c.bf16 %v578_v31, %v577_v30  ;;  %v3974_v39 = vor.u32 %v696_v16, %v604_v23  ;;  %v3544_v23 = vld [vmem:[%s4534_s3 + $0x190] sm:$0xff]  }
  0x37   : > { %3195 = vmatmul.mubr.bf16.gmra.mxu0 %v3952_v25  ;;  %3274 = vmatprep.subr.bf16.mxu1 %v3539_v14  ;;  %v3979_v40 = vor.u32 %v3854_v7, %v618_v60  ;;  %v580_v7 = vmax.f32 %v564_v38, 0.0  ;;  %v595_v16 = vadd.f32 %v3775_v20, %v593_v10  ;;  %v702_v13 = vrot.slane %v628_v29, 1  ;;  %v3550_v20 = vld [vmem:[%s4534_s3 + $0x138] sm:$0xff]   ;;  %v3549_v38 = vld [vmem:[%s4534_s3 + $0x40] sm:$0xff]   ;;  %v3569_v10 = vld [vmem:[%s4534_s3 + $0x170] sm:$0xff]  }
  0x38   : > { %3243 = vmatpush3.bf16.msra.mxu0 %v3538_v56  ;;  %v648_v43 = vrot.slane %v646_v34, 7  ;;  %v653_v45 = vshrl.u32 %v3969_v37, 16  ;;  %v656_v60 = vshll.u32 %v3969_v37, 16  ;;  %3198 = vmatprep.mubr.bf16.mxu0 %v3993_v47  ;;  %v599_v55 = vstv %s472_s22 }
  0x39   : > { %3244 = vmatprep.subr.bf16.mxu0 %v3540_v1  ;;  %3227 = vmatmul.mubr.bf16.gmra.mxu1 %v3920_v58  ;;  %v4008_v56 = vpack.c.bf16 %v580_v7, %v579_v44  ;;  %v4056_v30 = vor.u32 %v698_v59, %v611_v54  ;;  %v597_v29 = vmax.f32 %v595_v16, 0.0  ;;  %v598_v31 = vmax.f32 %v596_v22, 0.0  ;;  %v3552_v44 = vld [vmem:[%s4534_s3 + $0x130] sm:$0xff]   ;;  %v3578_v16 = vld [vmem:[%s4534_s3 + $0x88] sm:$0xff]  }
  0x3a   : > { %3275 = vmatpush3.bf16.msra.mxu1 %v3539_v14  ;;  %3230 = vmatprep.mubr.bf16.mxu1 %v3952_v25  ;;  %v651_v48 = vor.u32 %v649_v35, %v648_v43  ;;  %v655_v51 = vrot.slane %v653_v45, 7  ;;  %v4063_v32 = vor.u32 %v702_v13, %v625_v28  ;;  %v704_v54 = vrot.slane %v635_v53, 1  ;;  %v3576_v59 = vld [vmem:[%s4534_s3 + $0x90] sm:$0xff]   ;;  %v3579_v22 = vld [vmem:[%s4534_s3 + $0x148] sm:$0xff]   ;;  %v3580_v13 = vld [vmem:[%s4534_s3 + $0x80] sm:$0xff]  }
  0x3b   : > { %3276 = vmatprep.subr.bf16.mxu1 %v3541_v26  ;;  %v660_v63 = vshrl.u32 %v4008_v56, 16  ;;  %v663_v0 = vshll.u32 %v4008_v56, 16  ;;  %v600_v33 = vmul.f32 %v599_v55, %v597_v29  ;;  %v601_v36 = vmul.f32 %v599_v55, %v598_v31  ;;  %v3582_v55 = vld [vmem:[%s4534_s3 + $0x238] sm:$0xff]  }
  0x3c   : > { %3245 = vmatpush3.bf16.msra.mxu0 %v3540_v1  ;;  %v4012_v57 = vsel %vm3848_vm2, 0, %v651_v48  ;;  %v658_v62 = vor.u32 %v656_v60, %v655_v51  ;;  %v3546_v1 = vld [vmem:[%s4534_s3 + $0x188] sm:$0xff]   ;;  %v706_v28 = vrot.slane %v642_v19, 1  ;;  %v4076_v42 = vor.u32 %v704_v54, %v632_v52  ;;  %v3551_v52 = vld [vmem:[%s4534_s3 + $0x1f8] sm:$0xff]   ;;  %v3557_v51 = vld [vmem:[%s4534_s3 + $0x1e0] sm:$0xff]  }
  0x3d   : > { %3246 = vmatprep.subr.bf16.mxu0 %v3542_v24  ;;  %v662_v9 = vrot.slane %v660_v63, 7  ;;  %v708_v43 = vrot.slane %v649_v35, 1  ;;  %v4091_v19 = vpack.c.bf16 %v601_v36, %v600_v33  ;;  %v3587_v33 = vld [vmem:[%s4534_s3 + $0x210] sm:$0xff]  }
  0x3e   : > { %3277 = vmatpush3.bf16.msra.mxu1 %v3541_v26  ;;  %v4027_v8 = vsel %vm3848_vm2, 0, %v658_v62  ;;  %v4083_v53 = vor.u32 %v706_v28, %v639_v18  ;;  %v733_v29 = vsel %vm4219_vm5, %v4076_v42, 0  ;;  %v3589_v28 = vld [vmem:[%s4534_s3 + $0x200] sm:$0xff]  }
  0x3f   : > { %3199 = vmatmul.mubr.bf16.gmra.mxu0 %v4012_v57  ;;  %3278 = vmatprep.subr.bf16.mxu1 %v3543_v49  ;;  %v665_v14 = vor.u32 %v663_v0, %v662_v9  ;;  %v4095_v35 = vor.u32 %v708_v43, %v646_v34  ;;  %v3553_v34 = vld [vmem:[%s4534_s3 + $0x1f0] sm:$0xff]   ;;  %v3567_v9 = vld [vmem:[%s4534_s3 + $0x178] sm:$0xff]  }
  0x40   : > { %3247 = vmatpush3.bf16.msra.mxu0 %v3542_v24  ;;  %3202 = vmatprep.mubr.bf16.mxu0 %v4027_v8  ;;  %v3547_v24 = vld [vmem:[%s4534_s3 + $0x48] sm:$0xff]   ;;  %v734_v31 = vsel %vm4219_vm5, %v4083_v53, 0 }
  0x41   : > { %3248 = vmatprep.subr.bf16.mxu0 %v3544_v23  ;;  %3231 = vmatmul.mubr.bf16.gmra.mxu1 %v3993_v47  ;;  %v4049_v26 = vsel %vm3848_vm2, 0, %v665_v14  ;;  %v3572_v14 = vld [vmem:[%s4534_s3 + $0xa0] sm:$0xff]   ;;  %v735_v36 = vsel %vm4219_vm5, %v4095_v35, 0 }
  0x42   : > { %3279 = vmatpush3.bf16.msra.mxu1 %v3543_v49  ;;  %3234 = vmatprep.mubr.bf16.mxu1 %v4012_v57  ;;  %v3555_v49 = vld [vmem:[%s4534_s3 + $0x1e8] sm:$0xff]  }
  0x43   : > { %3280 = vmatprep.subr.bf16.mxu1 %v3545_v61 }
  0x44   : > { %3249 = vmatpush3.bf16.msra.mxu0 %v3544_v23  ;;  %v712_v23 = vrot.slane %v663_v0, 1 }
  0x45   : > { %3250 = vmatprep.subr.bf16.mxu0 %v3546_v1 }
  0x46   : > { %3281 = vmatpush3.bf16.msra.mxu1 %v3545_v61  ;;  %v3558_v61 = vld [vmem:[%s4534_s3 + $0x118] sm:$0xff]  }
  0x47   : > { %3203 = vmatmul.mubr.bf16.gmra.mxu0 %v4049_v26  ;;  %3282 = vmatprep.subr.bf16.mxu1 %v3547_v24 }
  0x48   : > { %3251 = vmatpush3.bf16.msra.mxu0 %v3546_v1  ;;  %3254 = vmatprep.mubr.bf16.mxu0 %v3883_v27  ;;  %v710_v27 = vrot.slane %v656_v60, 1  ;;  %v667_v60 = vshrl.u32 %v4091_v19, 16  ;;  %v3562_v1 = vld [vmem:[%s4534_s3 + $0x108] sm:$0xff]  }
  0x49   : > { %3252 = vmatprep.subr.bf16.mxu0 %v3548_v15  ;;  %3235 = vmatmul.mubr.bf16.gmra.mxu1 %v4027_v8 }
  0x4a   : > { %3283 = vmatpush3.bf16.msra.mxu1 %v3547_v24  ;;  %3286 = vmatprep.mubr.bf16.mxu1 %v3864_v11  ;;  %v4099_v18 = vor.u32 %v710_v27, %v653_v45  ;;  %v670_v11 = vshll.u32 %v4091_v19, 16  ;;  %v4112_v45 = vor.u32 %v712_v23, %v660_v63  ;;  %v669_v62 = vrot.slane %v667_v60, 7  ;;  %v3561_v63 = vld [vmem:[%s4534_s3 + $0x1d0] sm:$0xff]  }
  0x4b   : > { %3284 = vmatprep.subr.bf16.mxu1 %v3549_v38  ;;  %v730_v24 = vsel %vm4219_vm5, %v4056_v30, 0  ;;  %v732_v30 = vsel %vm4219_vm5, %v4063_v32, 0  ;;  %v3586_v32 = vld [vmem:[%s4534_s3 + $0x218] sm:$0xff]  }
  0x4c   : > { %3253 = vmatpush3.bf16.msra.mxu0 %v3548_v15  ;;  %v714_v7 = vrot.slane %v670_v11, 1  ;;  %v672_v0 = vor.u32 %v670_v11, %v669_v62  ;;  %v3574_v15 = vld [vmem:[%s4534_s3 + $0x98] sm:$0xff]   ;;  %v736_v54 = vsel %vm4219_vm5, %v4099_v18, 0  ;;  %v737_v42 = vsel %vm4219_vm5, %v4112_v45, 0 }
  0x4d   : > { %3302 = vmatprep.subr.bf16.mxu0 %v3550_v20 }
  0x4e   : > { %3285 = vmatpush3.bf16.msra.mxu1 %v3549_v38  ;;  %v4118_v48 = vor.u32 %v714_v7, %v667_v60  ;;  %v695_v2 = vsel %vm3848_vm2, 0, %v672_v0  ;;  %v3588_v38 = vld [vmem:[%s4534_s3 + $0x208] sm:$0xff]  }
  0x4f   : > { %3255 = vmatmul.mubr.bf16.vlgmr.msra.gmra.mxu0 %v3920_v58  ;;  %3334 = vmatprep.subr.bf16.mxu1 %v3551_v52  ;;  %v3554_v58 = vld [vmem:[%s4534_s3 + $0x128] sm:$0xff]  }
  0x50   : > { %3303 = vmatpush3.bf16.msra.mxu0 %v3550_v20  ;;  %3258 = vmatprep.mubr.bf16.mxu0 %v3952_v25  ;;  %v3556_v25 = vld [vmem:[%s4534_s3 + $0x120] sm:$0xff]   ;;  %v3584_v20 = vld [vmem:[%s4534_s3 + $0x228] sm:$0xff]   ;;  %v738_v43 = vsel %vm4219_vm5, %v4118_v48, 0 }
  0x51   : > { %3304 = vmatprep.subr.bf16.mxu0 %v3552_v44  ;;  %3287 = vmatmul.mubr.bf16.vlgmr.msra.gmra.mxu1 %v3811_v46 }
  0x52   : > { %3335 = vmatpush3.bf16.msra.mxu1 %v3551_v52  ;;  %3290 = vmatprep.mubr.bf16.mxu1 %v3815_v50 }
  0x53   : > { %3336 = vmatprep.subr.bf16.mxu1 %v3553_v34 }
  0x54   : > { %3305 = vmatpush3.bf16.msra.mxu0 %v3552_v44 }
  0x55   : > { %3306 = vmatprep.subr.bf16.mxu0 %v3554_v58 }
  0x56   : > { %3337 = vmatpush3.bf16.msra.mxu1 %v3553_v34 }
  0x57   : > { %3259 = vmatmul.mubr.bf16.gmra.mxu0 %v3993_v47  ;;  %3338 = vmatprep.subr.bf16.mxu1 %v3555_v49  ;;  %v3559_v47 = vld [vmem:[%s4534_s3 + $0x1d8] sm:$0xff]  }
  0x58   : > { %3307 = vmatpush3.bf16.msra.mxu0 %v3554_v58  ;;  %3262 = vmatprep.mubr.bf16.mxu0 %v4012_v57  ;;  %v3560_v57 = vld [vmem:[%s4534_s3 + $0x110] sm:$0xff]  }
  0x59   : > { %3308 = vmatprep.subr.bf16.mxu0 %v3556_v25  ;;  %3291 = vmatmul.mubr.bf16.gmra.mxu1 %v3871_v17 }
  0x5a   : > { %3339 = vmatpush3.bf16.msra.mxu1 %v3555_v49  ;;  %3294 = vmatprep.mubr.bf16.mxu1 %v3900_v41 }
  0x5b   : > { %3340 = vmatprep.subr.bf16.mxu1 %v3557_v51 }
  0x5c   : > { %3309 = vmatpush3.bf16.msra.mxu0 %v3556_v25 }
  0x5d   : > { %3310 = vmatprep.subr.bf16.mxu0 %v3558_v61 }
  0x5e   : > { %3341 = vmatpush3.bf16.msra.mxu1 %v3557_v51 }
  0x5f   : > { %3263 = vmatmul.mubr.bf16.gmra.mxu0 %v4027_v8  ;;  %3342 = vmatprep.subr.bf16.mxu1 %v3559_v47  ;;  %v3565_v8 = vld [vmem:[%s4534_s3 + $0x1c0] sm:$0xff]  }
  0x60   : > { %3311 = vmatpush3.bf16.msra.mxu0 %v3558_v61  ;;  %3266 = vmatprep.mubr.bf16.mxu0 %v4049_v26  ;;  %v3581_v26 = vld [vmem:[%s4534_s3 + $0x140] sm:$0xff]  }
  0x61   : > { %3312 = vmatprep.subr.bf16.mxu0 %v3560_v57  ;;  %3295 = vmatmul.mubr.bf16.gmra.mxu1 %v3934_v6 }
  0x62   : > { %3343 = vmatpush3.bf16.msra.mxu1 %v3559_v47  ;;  %3298 = vmatprep.mubr.bf16.mxu1 %v3947_v21 }
  0x63   : > { %3344 = vmatprep.subr.bf16.mxu1 %v3561_v63 }
  0x64   : > { %3313 = vmatpush3.bf16.msra.mxu0 %v3560_v57 }
  0x65   : > { %3314 = vmatprep.subr.bf16.mxu0 %v3562_v1 }
  0x66   : > { %3345 = vmatpush3.bf16.msra.mxu1 %v3561_v63 }
  0x67   : > { %3267 = vmatmul.mubr.bf16.gmra.mxu0 %v695_v2  ;;  %3346 = vmatprep.subr.bf16.mxu1 %v3563_v3 }
  0x68   : > { %3315 = vmatpush3.bf16.msra.mxu0 %v3562_v1  ;;  %3318 = vmatprep.mubr.bf16.mxu0 %v3811_v46  ;;  %v3568_v46 = vld [vmem:[%s4534_s3 + $0xb0] sm:$0xff]  }
  0x69   : > { %3316 = vmatprep.subr.bf16.mxu0 %v3564_v4  ;;  %3299 = vmatmul.mubr.bf16.gmra.mxu1 %v3969_v37 }
  0x6a   : > { %3347 = vmatpush3.bf16.msra.mxu1 %v3563_v3  ;;  %3350 = vmatprep.mubr.bf16.mxu1 %v3815_v50 }
  0x6b   : > { %3348 = vmatprep.subr.bf16.mxu1 %v3565_v8 }
  0x6c   : > { %3317 = vmatpush3.bf16.msra.mxu0 %v3564_v4 }
  0x6d   : > { %3366 = vmatprep.subr.bf16.mxu0 %v3566_v5 }
  0x6e   : > { %3349 = vmatpush3.bf16.msra.mxu1 %v3565_v8 }
  0x6f   : > { %3319 = vmatmul.mubr.bf16.vlgmr.msra.gmra.mxu0 %v3815_v50  ;;  %3398 = vmatprep.subr.bf16.mxu1 %v3567_v9  ;;  %v3571_v50 = vld [vmem:[%s4534_s3 + $0x168] sm:$0xff]  }
  0x70   : > { %3367 = vmatpush3.bf16.msra.mxu0 %v3566_v5  ;;  %3322 = vmatprep.mubr.bf16.mxu0 %v3871_v17 }
  0x71   : > { %3368 = vmatprep.subr.bf16.mxu0 %v3568_v46  ;;  %3351 = vmatmul.mubr.bf16.vlgmr.msra.gmra.mxu1 %v3871_v17  ;;  %v3573_v17 = vld [vmem:[%s4534_s3 + $0x160] sm:$0xff]  }
  0x72   : > { %3399 = vmatpush3.bf16.msra.mxu1 %v3567_v9  ;;  %3354 = vmatprep.mubr.bf16.mxu1 %v3900_v41 }
  0x73   : > { %3400 = vmatprep.subr.bf16.mxu1 %v3569_v10 }
  0x74   : > { %3369 = vmatpush3.bf16.msra.mxu0 %v3568_v46 }
  0x75   : > { %3370 = vmatprep.subr.bf16.mxu0 %v3570_v12 }
  0x76   : > { %3401 = vmatpush3.bf16.msra.mxu1 %v3569_v10 }
  0x77   : > { %3323 = vmatmul.mubr.bf16.gmra.mxu0 %v3900_v41  ;;  %3402 = vmatprep.subr.bf16.mxu1 %v3571_v50  ;;  %v3575_v41 = vld [vmem:[%s4534_s3 + $0x158] sm:$0xff]  }
  0x78   : > { %3371 = vmatpush3.bf16.msra.mxu0 %v3570_v12  ;;  %3326 = vmatprep.mubr.bf16.mxu0 %v3934_v6 }
  0x79   : > { %3372 = vmatprep.subr.bf16.mxu0 %v3572_v14  ;;  %3355 = vmatmul.mubr.bf16.gmra.mxu1 %v3934_v6  ;;  %v3577_v6 = vld [vmem:[%s4534_s3 + $0x150] sm:$0xff]  }
  0x7a   : > { %3403 = vmatpush3.bf16.msra.mxu1 %v3571_v50  ;;  %3358 = vmatprep.mubr.bf16.mxu1 %v3947_v21 }
  0x7b   : > { %3404 = vmatprep.subr.bf16.mxu1 %v3573_v17 }
  0x7c   : > { %3373 = vmatpush3.bf16.msra.mxu0 %v3572_v14 }
  0x7d   : > { %3374 = vmatprep.subr.bf16.mxu0 %v3574_v15 }
  0x7e   : > { %3405 = vmatpush3.bf16.msra.mxu1 %v3573_v17 }
  0x7f   : > { %3327 = vmatmul.mubr.bf16.gmra.mxu0 %v3947_v21  ;;  %3406 = vmatprep.subr.bf16.mxu1 %v3575_v41 }
  0x80   : > { %3375 = vmatpush3.bf16.msra.mxu0 %v3574_v15  ;;  %3330 = vmatprep.mubr.bf16.mxu0 %v3969_v37 }
  0x81   : > { %3376 = vmatprep.subr.bf16.mxu0 %v3576_v59  ;;  %3359 = vmatmul.mubr.bf16.gmra.mxu1 %v3969_v37  ;;  %v729_v37 = vsel %vm4219_vm5, %v3974_v39, 0  ;;  %v3583_v39 = vld [vmem:[%s4534_s3 + $0x230] sm:$0xff]  }
  0x82   : > { %3407 = vmatpush3.bf16.msra.mxu1 %v3575_v41  ;;  %3362 = vmatprep.mubr.bf16.mxu1 %v4008_v56 }
  0x83   : > { %3408 = vmatprep.subr.bf16.mxu1 %v3577_v6 }
  0x84   : > { %3377 = vmatpush3.bf16.msra.mxu0 %v3576_v59 }
  0x85   : > { %3378 = vmatprep.subr.bf16.mxu0 %v3578_v16 }
  0x86   : > { %3409 = vmatpush3.bf16.msra.mxu1 %v3577_v6 }
  0x87   : > { %3331 = vmatmul.mubr.bf16.gmra.mxu0 %v4008_v56  ;;  %3410 = vmatprep.subr.bf16.mxu1 %v3579_v22  ;;  %v731_v56 = vsel %vm4219_vm5, %v3979_v40, 0  ;;  %v3585_v40 = vld [vmem:[%s4534_s3 + $0x220] sm:$0xff]  }
  0x88   : > { %3379 = vmatpush3.bf16.msra.mxu0 %v3578_v16  ;;  %3382 = vmatprep.mubr.bf16.mxu0 %v729_v37 }
  0x89   : > { %3380 = vmatprep.subr.bf16.mxu0 %v3580_v13  ;;  %3363 = vmatmul.mubr.bf16.gmra.mxu1 %v4091_v19 }
  0x8a   : > { %3411 = vmatpush3.bf16.msra.mxu1 %v3579_v22  ;;  %3414 = vmatprep.mubr.bf16.mxu1 %v730_v24 }
  0x8b   : > { %3412 = vmatprep.subr.bf16.mxu1 %v3581_v26 }
  0x8c   : > { %3381 = vmatpush3.bf16.msra.mxu0 %v3580_v13 }
  0x8d   : > { %3430 = vmatprep.subr.bf16.mxu0 %v3582_v55 }
  0x8e   : > { %3413 = vmatpush3.bf16.msra.mxu1 %v3581_v26 }
  0x8f   : > { %3383 = vmatmul.mubr.bf16.vlgmr.msra.gmra.mxu0 %v730_v24  ;;  %3462 = vmatprep.subr.bf16.mxu1 %v3582_v55 }
  0x90   : > { %3431 = vmatpush3.bf16.msra.mxu0 %v3582_v55  ;;  %3386 = vmatprep.mubr.bf16.mxu0 %v731_v56 }
  0x91   : > { %3432 = vmatprep.subr.bf16.mxu0 %v3583_v39  ;;  %3415 = vmatmul.mubr.bf16.vlgmr.msra.gmra.mxu1 %v731_v56 }
  0x92   : > { %3470 = vmatpush3.bf16.msra.mxu1 %v3582_v55  ;;  %3418 = vmatprep.mubr.bf16.mxu1 %v732_v30 }
  0x93   : > { %3463 = vmatprep.subr.bf16.mxu1 %v3583_v39 }
  0x94   : > { %3433 = vmatpush3.bf16.msra.mxu0 %v3583_v39 }
  0x95   : > { %3434 = vmatprep.subr.bf16.mxu0 %v3584_v20 }
  0x96   : > { %3471 = vmatpush3.bf16.msra.mxu1 %v3583_v39 }
  0x97   : > { %3387 = vmatmul.mubr.bf16.gmra.mxu0 %v732_v30  ;;  %3464 = vmatprep.subr.bf16.mxu1 %v3584_v20 }
  0x98   : > { %3435 = vmatpush3.bf16.msra.mxu0 %v3584_v20  ;;  %3390 = vmatprep.mubr.bf16.mxu0 %v733_v29 }
  0x99   : > { %3436 = vmatprep.subr.bf16.mxu0 %v3585_v40  ;;  %3419 = vmatmul.mubr.bf16.gmra.mxu1 %v733_v29 }
  0x9a   : > { %3472 = vmatpush3.bf16.msra.mxu1 %v3584_v20  ;;  %3422 = vmatprep.mubr.bf16.mxu1 %v734_v31 }
  0x9b   : > { %3465 = vmatprep.subr.bf16.mxu1 %v3585_v40 }
  0x9c   : > { %3437 = vmatpush3.bf16.msra.mxu0 %v3585_v40 }
  0x9d   : > { %3438 = vmatprep.subr.bf16.mxu0 %v3586_v32 }
  0x9e   : > { %3473 = vmatpush3.bf16.msra.mxu1 %v3585_v40 }
  0x9f   : > { %3391 = vmatmul.mubr.bf16.gmra.mxu0 %v734_v31  ;;  %3466 = vmatprep.subr.bf16.mxu1 %v3586_v32 }
  0xa0   : > { %3439 = vmatpush3.bf16.msra.mxu0 %v3586_v32  ;;  %3394 = vmatprep.mubr.bf16.mxu0 %v735_v36 }
  0xa1   : > { %3440 = vmatprep.subr.bf16.mxu0 %v3587_v33  ;;  %3423 = vmatmul.mubr.bf16.gmra.mxu1 %v735_v36 }
  0xa2   : > { %3474 = vmatpush3.bf16.msra.mxu1 %v3586_v32  ;;  %3426 = vmatprep.mubr.bf16.mxu1 %v736_v54 }
  0xa3   : > { %3467 = vmatprep.subr.bf16.mxu1 %v3587_v33 }
  0xa4   : > { %3441 = vmatpush3.bf16.msra.mxu0 %v3587_v33 }
  0xa5   : > { %3442 = vmatprep.subr.bf16.mxu0 %v3588_v38 }
  0xa6   : > { %3475 = vmatpush3.bf16.msra.mxu1 %v3587_v33 }
  0xa7   : > { %3395 = vmatmul.mubr.bf16.gmra.mxu0 %v736_v54  ;;  %3468 = vmatprep.subr.bf16.mxu1 %v3588_v38 }
  0xa8   : > { %3443 = vmatpush3.bf16.msra.mxu0 %v3588_v38  ;;  %3446 = vmatprep.mubr.bf16.mxu0 %v731_v56 }
  0xa9   : > { %3444 = vmatprep.subr.bf16.mxu0 %v3589_v28  ;;  %3427 = vmatmul.mubr.bf16.gmra.mxu1 %v737_v42 }
  0xaa   : > { %3476 = vmatpush3.bf16.msra.mxu1 %v3588_v38  ;;  %3454 = vmatprep.mubr.bf16.mxu1 %v735_v36 }
  0xab   : > { %3469 = vmatprep.subr.bf16.mxu1 %v3589_v28 }
  0xac   : > { %3445 = vmatpush3.bf16.msra.mxu0 %v3589_v28 }
  0xae   : > { %3477 = vmatpush3.bf16.msra.mxu1 %v3589_v28 }
  0xaf   : > { %3447 = vmatmul.mubr.bf16.vlgmr.msra.gmra.mxu0 %v732_v30 }
  0xb0   : > { %3450 = vmatprep.mubr.bf16.mxu0 %v733_v29 }
  0xb1   : > { %3455 = vmatmul.mubr.bf16.vlgmr.msra.gmra.mxu1 %v736_v54 }
  0xb2   : > { %3458 = vmatprep.mubr.bf16.mxu1 %v737_v42 }
  0xb7   : > { %3451 = vmatmul.mubr.bf16.gmra.mxu0 %v734_v31 }
  0xb9   : > { %3459 = vmatmul.mubr.bf16.gmra.mxu1 %v738_v43 }
  0xef   : > { %v3192_v53 = vpop.f32.mrf.mxu0 }
  0xf1   : > { %v854_v27 = vpop.f32.mrf.mxu0  ;;  %v3224_v19 = vpop.f32.mrf.mxu1 }
  0xf2   : > { %v1008_v35 = vadd.f32 %v3224_v19, %v3192_v53 }
  0xf3   : > { %v3193_v52 = vpop.f32.mrf.mxu0  ;;  %v999_v44 = vpop.f32.mrf.mxu1 }
  0xf4   : > { %v1000_v11 = vadd.f32 %v999_v44, %v854_v27 }
  0xf5   : > { %v857_v18 = vpop.f32.mrf.mxu0  ;;  %v3225_v23 = vpop.f32.mrf.mxu1 }
  0xf6   : > { %v1011_v60 = vadd.f32 %v3225_v23, %v3193_v52 }
  0xf7   : > { %v3196_v7 = vpop.f32.mrf.mxu0  ;;  %v1002_v34 = vpop.f32.mrf.mxu1 }
  0xf8   : > { %v1003_v45 = vadd.f32 %v1002_v34, %v857_v18 }
  0xf9   : > { %v870_v58 = vpop.f32.mrf.mxu0  ;;  %v3228_v49 = vpop.f32.mrf.mxu1 }
  0xfa   : > { %v1024_v25 = vadd.f32 %v3228_v49, %v3196_v7 }
  0xfb   : > { %v3197_v51 = vpop.f32.mrf.mxu0  ;;  %v1015_v61 = vpop.f32.mrf.mxu1 }
  0xfc   : > { %v1016_v48 = vadd.f32 %v1015_v61, %v870_v58 }
  0xfd   : > { %v873_v47 = vpop.f32.mrf.mxu0  ;;  %v3229_v62 = vpop.f32.mrf.mxu1 }
  0xfe   : > { %v1027_v57 = vadd.f32 %v3229_v62, %v3197_v51 }
  0xff   : > { %v3200_v63 = vpop.f32.mrf.mxu0  ;;  %v1018_v0 = vpop.f32.mrf.mxu1 }
 0x100   : > { %v1019_v1 = vadd.f32 %v1018_v0, %v873_v47 }
 0x101   : > { %v886_v2 = vpop.f32.mrf.mxu0  ;;  %v3232_v3 = vpop.f32.mrf.mxu1 }
 0x102   : > { %v1040_v4 = vadd.f32 %v3232_v3, %v3200_v63 }
 0x103   : > { %v3201_v8 = vpop.f32.mrf.mxu0  ;;  %v1031_v5 = vpop.f32.mrf.mxu1 }
 0x104   : > { %v1032_v9 = vadd.f32 %v1031_v5, %v886_v2 }
 0x105   : > { %v889_v46 = vpop.f32.mrf.mxu0  ;;  %v3233_v10 = vpop.f32.mrf.mxu1 }
 0x106   : > { %v1043_v12 = vadd.f32 %v3233_v10, %v3201_v8 }
 0x107   : > { %v3204_v50 = vpop.f32.mrf.mxu0  ;;  %v1034_v14 = vpop.f32.mrf.mxu1 }
 0x108   : > { %v1035_v17 = vadd.f32 %v1034_v14, %v889_v46 }
 0x109   : > { %v902_v15 = vpop.f32.mrf.mxu0  ;;  %v3236_v41 = vpop.f32.mrf.mxu1 }
 0x10a   : > { %v1056_v59 = vadd.f32 %v3236_v41, %v3204_v50 }
 0x10b   : > { %v3205_v6 = vpop.f32.mrf.mxu0  ;;  %v1047_v16 = vpop.f32.mrf.mxu1 }
 0x10c   : > { %v1048_v21 = vadd.f32 %v1047_v16, %v902_v15 }
 0x10d   : > { %v905_v22 = vpop.f32.mrf.mxu0  ;;  %v3237_v13 = vpop.f32.mrf.mxu1 }
 0x10e   : > { %v1059_v37 = vadd.f32 %v3237_v13, %v3205_v6 }
 0x10f   : > { %v3256_v26 = vpop.f32.mrf.mxu0  ;;  %v1050_v24 = vpop.f32.mrf.mxu1 }
 0x110   : > { %v1226_v55 = vadd.f32 %v3256_v26, %v1008_v35  ;;  %v1051_v39 = vadd.f32 %v1050_v24, %v905_v22 }
 0x111   : > { %v1161_v56 = vpop.f32.mrf.mxu0  ;;  %v3288_v30 = vpop.f32.mrf.mxu1 }
 0x112   : > { %v1224_v20 = vadd.f32 %v1161_v56, %v1000_v11  ;;  %v4288_v40 = vadd.f32 %v3288_v30, %v1226_v55 }
 0x113   : > { %v3257_v29 = vpop.f32.mrf.mxu0  ;;  %v1339_v31 = vpop.f32.mrf.mxu1 }
 0x114   : > { %v1227_v32 = vadd.f32 %v3257_v29, %v1011_v60  ;;  %v4290_v33 = vadd.f32 %v1339_v31, %v1224_v20 }
 0x115   : > { %v1164_v36 = vpop.f32.mrf.mxu0  ;;  %v3289_v54 = vpop.f32.mrf.mxu1 }
 0x116   : > { %v1225_v38 = vadd.f32 %v1164_v36, %v1003_v45  ;;  %v4292_v28 = vadd.f32 %v3289_v54, %v1227_v32 }
 0x117   : > { %v3260_v42 = vpop.f32.mrf.mxu0  ;;  %v1342_v43 = vpop.f32.mrf.mxu1 }
 0x118   : > { %v1230_v53 = vadd.f32 %v3260_v42, %v1024_v25  ;;  %v4294_v27 = vadd.f32 %v1342_v43, %v1225_v38 }
 0x119   : > { %v1177_v52 = vpop.f32.mrf.mxu0  ;;  %v3292_v19 = vpop.f32.mrf.mxu1 }
 0x11a   : > { %v1228_v35 = vadd.f32 %v1177_v52, %v1016_v48  ;;  %v4296_v18 = vadd.f32 %v3292_v19, %v1230_v53 }
 0x11b   : > { %v3261_v44 = vpop.f32.mrf.mxu0  ;;  %v1355_v11 = vpop.f32.mrf.mxu1 }
 0x11c   : > { %v1231_v23 = vadd.f32 %v3261_v44, %v1027_v57  ;;  %v4298_v60 = vadd.f32 %v1355_v11, %v1228_v35 }
 0x11d   : > { %v1180_v7 = vpop.f32.mrf.mxu0  ;;  %v3293_v34 = vpop.f32.mrf.mxu1 }
 0x11e   : > { %v1229_v45 = vadd.f32 %v1180_v7, %v1019_v1  ;;  %v4300_v58 = vadd.f32 %v3293_v34, %v1231_v23 }
 0x11f   : > { %v3264_v49 = vpop.f32.mrf.mxu0  ;;  %v1358_v51 = vpop.f32.mrf.mxu1 }
 0x120   : > { %v1234_v25 = vadd.f32 %v3264_v49, %v1040_v4  ;;  %v4302_v61 = vadd.f32 %v1358_v51, %v1229_v45 }
 0x121   : > { %v1193_v47 = vpop.f32.mrf.mxu0  ;;  %v3296_v62 = vpop.f32.mrf.mxu1 }
 0x122   : > { %v1232_v48 = vadd.f32 %v1193_v47, %v1032_v9  ;;  %v4304_v63 = vadd.f32 %v3296_v62, %v1234_v25 }
 0x123   : > { %v3265_v0 = vpop.f32.mrf.mxu0  ;;  %v1371_v2 = vpop.f32.mrf.mxu1 }
 0x124   : > { %v1235_v57 = vadd.f32 %v3265_v0, %v1043_v12  ;;  %v4306_v3 = vadd.f32 %v1371_v2, %v1232_v48 }
 0x125   : > { %v1196_v8 = vpop.f32.mrf.mxu0  ;;  %v3297_v5 = vpop.f32.mrf.mxu1 }
 0x126   : > { %v1233_v1 = vadd.f32 %v1196_v8, %v1035_v17  ;;  %v4308_v46 = vadd.f32 %v3297_v5, %v1235_v57 }
 0x127   : > { %v3268_v10 = vpop.f32.mrf.mxu0  ;;  %v1374_v50 = vpop.f32.mrf.mxu1 }
 0x128   : > { %v1238_v4 = vadd.f32 %v3268_v10, %v1056_v59  ;;  %v4310_v14 = vadd.f32 %v1374_v50, %v1233_v1 }
 0x129   : > { %v1209_v15 = vpop.f32.mrf.mxu0  ;;  %v3300_v41 = vpop.f32.mrf.mxu1 }
 0x12a   : > { %v1236_v9 = vadd.f32 %v1209_v15, %v1048_v21  ;;  %v4312_v6 = vadd.f32 %v3300_v41, %v1238_v4 }
 0x12b   : > { %v3269_v16 = vpop.f32.mrf.mxu0  ;;  %v1387_v22 = vpop.f32.mrf.mxu1 }
 0x12c   : > { %v1239_v12 = vadd.f32 %v3269_v16, %v1059_v37  ;;  %v4314_v13 = vadd.f32 %v1387_v22, %v1236_v9 }
 0x12d   : > { %v1212_v26 = vpop.f32.mrf.mxu0  ;;  %v3301_v24 = vpop.f32.mrf.mxu1 }
 0x12e   : > { %v1237_v17 = vadd.f32 %v1212_v26, %v1051_v39  ;;  %v4316_v55 = vadd.f32 %v3301_v24, %v1239_v12 }
 0x12f   : > { %v3320_v56 = vpop.f32.mrf.mxu0  ;;  %v1390_v30 = vpop.f32.mrf.mxu1 }
 0x130   : > { %v4318_v59 = vadd.f32 %v1390_v30, %v1237_v17 }
 0x131   : > { %v1517_v20 = vpop.f32.mrf.mxu0  ;;  %v4320_v29 = vpop.f32.mrf.mxu1 }
 0x133   : > { %v3321_v21 = vpop.f32.mrf.mxu0  ;;  %v1695_v31 = vpop.f32.mrf.mxu1 }
 0x135   : > { %v1520_v32 = vpop.f32.mrf.mxu0  ;;  %v4322_v36 = vpop.f32.mrf.mxu1 }
 0x137   : > { %v3324_v37 = vpop.f32.mrf.mxu0  ;;  %v4324_v54 = vpop.f32.mrf.mxu1 }
 0x139   : > { %v1533_v38 = vpop.f32.mrf.mxu0  ;;  %v4326_v42 = vpop.f32.mrf.mxu1 }
 0x13b   : > { %v3325_v39 = vpop.f32.mrf.mxu0  ;;  %v4328_v43 = vpop.f32.mrf.mxu1 }
 0x13d   : > { %v1536_v53 = vpop.f32.mrf.mxu0  ;;  %v4330_v52 = vpop.f32.mrf.mxu1 }
 0x13f   : > { %v3328_v19 = vpop.f32.mrf.mxu0  ;;  %v4332_v35 = vpop.f32.mrf.mxu1 }
 0x141   : > { %v1549_v44 = vpop.f32.mrf.mxu0  ;;  %v4334_v11 = vpop.f32.mrf.mxu1 }
 0x143   : > { %v3329_v23 = vpop.f32.mrf.mxu0  ;;  %v4336_v7 = vpop.f32.mrf.mxu1 }
 0x145   : > { %v1552_v34 = vpop.f32.mrf.mxu0  ;;  %v4338_v45 = vpop.f32.mrf.mxu1 }
 0x147   : > { %v3332_v49 = vpop.f32.mrf.mxu0  ;;  %v4340_v51 = vpop.f32.mrf.mxu1 }
 0x149   : > { %v1565_v25 = vpop.f32.mrf.mxu0  ;;  %v4342_v47 = vpop.f32.mrf.mxu1 }
 0x14b   : > { %v3333_v62 = vpop.f32.mrf.mxu0  ;;  %v4344_v48 = vpop.f32.mrf.mxu1 }
 0x14d   : > { %v4346_v0 = vpop.f32.mrf.mxu0  ;;  %v4348_v2 = vpop.f32.mrf.mxu1 }
 0x14e   : > { %4544 = vst [vmem:[#allocation2_spill] sm:$0xff] %v4346_v0  ;;  %4545 = vst [vmem:[#allocation3_spill] sm:$0xff] %v4348_v2 }
 0x14f   : > { %v3384_v57 = vpop.f32.mrf.mxu0  ;;  %v4350_v8 = vpop.f32.mrf.mxu1 }
 0x150   : > { %4546 = vst [vmem:[#allocation4_spill] sm:$0xff] %v4350_v8 }
 0x151   : > { %v1873_v5 = vpop.f32.mrf.mxu0  ;;  %v4352_v1 = vpop.f32.mrf.mxu1 }
 0x152   : > { %4547 = vst [vmem:[#allocation5_spill] sm:$0xff] %v4352_v1 }
 0x153   : > { %v3385_v10 = vpop.f32.mrf.mxu0  ;;  %v4354_v50 = vpop.f32.mrf.mxu1 }
 0x154   : > { %4548 = vst [vmem:[#allocation6_spill] sm:$0xff] %v4354_v50 }
 0x155   : > { %v1876_v4 = vpop.f32.mrf.mxu0  ;;  %v4356_v15 = vpop.f32.mrf.mxu1 }
 0x156   : > { %4549 = vst [vmem:[#allocation7_spill] sm:$0xff] %v4356_v15 }
 0x157   : > { %v4358_v41 = vpop.f32.mrf.mxu0  ;;  %v4360_v9 = vpop.f32.mrf.mxu1 }
 0x158   : > { %4550 = vst [vmem:[#allocation8_spill] sm:$0xff] %v4358_v41  ;;  %4551 = vst [vmem:[#allocation9_spill] sm:$0xff] %v4360_v9 }
 0x159   : > { %v4362_v16 = vpop.f32.mrf.mxu0  ;;  %v4364_v22 = vpop.f32.mrf.mxu1 }
 0x15a   : > { %4552 = vst [vmem:[#allocation10_spill] sm:$0xff] %v4362_v16  ;;  %4553 = vst [vmem:[#allocation11_spill] sm:$0xff] %v4364_v22  ;;  %v1582_v22 = vadd.f32 %v3320_v56, %v4288_v40 }
 0x15b   : > { %v4366_v12 = vpop.f32.mrf.mxu0  ;;  %v4368_v26 = vpop.f32.mrf.mxu1 }
 0x15c   : > { %4554 = vst [vmem:[#allocation12_spill] sm:$0xff] %v4366_v12  ;;  %4555 = vst [vmem:[#allocation13_spill] sm:$0xff] %v4368_v26  ;;  %v1580_v26 = vadd.f32 %v1517_v20, %v4290_v33  ;;  %v1760_v40 = vadd.f32 %v4320_v29, %v1582_v22  ;;  %v1590_v33 = vadd.f32 %v3328_v19, %v4304_v63 }
 0x15d   : > { %v4370_v24 = vpop.f32.mrf.mxu0  ;;  %v4372_v17 = vpop.f32.mrf.mxu1  ;;  %v1591_v20 = vadd.f32 %v3329_v23, %v4308_v46  ;;  %v1589_v63 = vadd.f32 %v1552_v34, %v4310_v14  ;;  %v1594_v46 = vadd.f32 %v3332_v49, %v4312_v6 }
 0x15e   : > { %4556 = vst [vmem:[#allocation14_spill] sm:$0xff] %v4370_v24  ;;  %4557 = vst [vmem:[#allocation15_spill] sm:$0xff] %v4372_v17  ;;  %v1583_v17 = vadd.f32 %v3321_v21, %v4292_v28  ;;  %v1758_v56 = vadd.f32 %v1695_v31, %v1580_v26 }
 0x15f   : > { %v3392_v30 = vpop.f32.mrf.mxu0  ;;  %v4374_v8 = vpop.f32.mrf.mxu1  ;;  %v1767_v23 = vadd.f32 %v4340_v51, %v1589_v63  ;;  %v1772_v34 = vadd.f32 %v4342_v47, %v1594_v46  ;;  %v4567_v26 = vld [vmem:[#allocation8_spill] sm:$0xff] }
 0x160   : > { %4558 = vst [vmem:[#allocation16_spill] sm:$0xff] %v4374_v8  ;;  %v1581_v8 = vadd.f32 %v1520_v32, %v4294_v27  ;;  %v1761_v21 = vadd.f32 %v4322_v36, %v1583_v17  ;;  %v1587_v27 = vadd.f32 %v3325_v39, %v4300_v58  ;;  %v1588_v32 = vadd.f32 %v1549_v44, %v4306_v3 }
 0x161   : > { %v1905_v50 = vpop.f32.mrf.mxu0  ;;  %v4376_v2 = vpop.f32.mrf.mxu1  ;;  %v1592_v58 = vadd.f32 %v1565_v25, %v4314_v13  ;;  %v1768_v3 = vadd.f32 %v4334_v11, %v1590_v33  ;;  %v4561_v25 = vld [vmem:[#allocation2_spill] sm:$0xff] }
 0x162   : > { %4559 = vst [vmem:[#allocation17_spill] sm:$0xff] %v4376_v2  ;;  %v1586_v2 = vadd.f32 %v3324_v37, %v4296_v18  ;;  %v1585_v18 = vadd.f32 %v1536_v53, %v4302_v61  ;;  %v1759_v37 = vadd.f32 %v4324_v54, %v1581_v8  ;;  %v1939_v61 = vadd.f32 %v3385_v10, %v1761_v21  ;;  %v4564_v8 = vld [vmem:[#allocation3_spill] sm:$0xff]  ;;  %v4565_v10 = vld [vmem:[#allocation6_spill] sm:$0xff] }
 0x163   : > { %v3393_v41 = vpop.f32.mrf.mxu0  ;;  %v4378_v9 = vpop.f32.mrf.mxu1  ;;  %v1769_v54 = vadd.f32 %v4338_v45, %v1591_v20  ;;  %v1936_v53 = vadd.f32 %v1873_v5, %v1758_v56  ;;  %v1765_v6 = vadd.f32 %v4330_v52, %v1587_v27  ;;  %v1946_v11 = vadd.f32 %v3392_v30, %v1768_v3  ;;  %v4562_v52 = vld [vmem:[#allocation5_spill] sm:$0xff]  ;;  %v4569_v33 = vld [vmem:[#allocation12_spill] sm:$0xff] }
 0x164   : > { %4560 = vst [vmem:[#allocation18_spill] sm:$0xff] %v4378_v9  ;;  %v1584_v9 = vadd.f32 %v1533_v38, %v4298_v60  ;;  %v1764_v29 = vadd.f32 %v4326_v42, %v1586_v2  ;;  %v1938_v38 = vadd.f32 %v3384_v57, %v1760_v40  ;;  %v1595_v42 = vadd.f32 %v3333_v62, %v4316_v55  ;;  %v4568_v40 = vld [vmem:[#allocation10_spill] sm:$0xff] }
 0x165   : > { %v1908_v16 = vpop.f32.mrf.mxu0  ;;  %v4380_v15 = vpop.f32.mrf.mxu1  ;;  %v1763_v19 = vadd.f32 %v4332_v35, %v1585_v18  ;;  %v1937_v44 = vadd.f32 %v1876_v4, %v1759_v37  ;;  %v1947_v49 = vadd.f32 %v3393_v41, %v1769_v54  ;;  %v1770_v55 = vadd.f32 %v4344_v48, %v1592_v58  ;;  %v4563_v35 = vld [vmem:[#allocation7_spill] sm:$0xff]  ;;  %v4566_v41 = vld [vmem:[#allocation9_spill] sm:$0xff]  ;;  %v4573_v54 = vld [vmem:[#allocation4_spill] sm:$0xff] }
 0x166   : > { %v1762_v36 = vadd.f32 %v4328_v43, %v1584_v9  ;;  %v1766_v43 = vadd.f32 %v4336_v7, %v1588_v32  ;;  %v1593_v62 = vadd.f32 %v4561_v25, %v4318_v59  ;;  %v2116_v2 = vadd.f32 %v4562_v52, %v1938_v38  ;;  %v4576_v25 = vld [vmem:[#allocation15_spill] sm:$0xff] }
 0x167   : > { %v4384_v12 = vpop.f32.mrf.mxu0  ;;  %v4387_v24 = vpop.f32.mrf.mxu1  ;;  %v2117_v57 = vadd.f32 %v4563_v35, %v1939_v61  ;;  %v1773_v5 = vadd.f32 %v4564_v8, %v1595_v42  ;;  %v2114_v51 = vadd.f32 %v4565_v10, %v1936_v53  ;;  %v1945_v47 = vadd.f32 %v1908_v16, %v1767_v23  ;;  %v4571_v16 = vld [vmem:[#allocation14_spill] sm:$0xff] }
 0x168   : > { %v1944_v4 = vadd.f32 %v1905_v50, %v1766_v43  ;;  %v2115_v22 = vadd.f32 %v4566_v41, %v1937_v44  ;;  %v1942_v48 = vadd.f32 %v4567_v26, %v1764_v29  ;;  %v1940_v56 = vadd.f32 %v4568_v40, %v1762_v36 }
 0x169   : > { %v4391_v1 = vpop.f32.mrf.mxu0  ;;  %v4394_v0 = vpop.f32.mrf.mxu1  ;;  %v1943_v20 = vadd.f32 %v4569_v33, %v1765_v6  ;;  %v4570_v21 = vld [vmem:[#allocation17_spill] sm:$0xff]  ;;  %v2125_v18 = vadd.f32 %v4380_v15, %v1947_v49  ;;  %v1941_v32 = vadd.f32 %v4571_v16, %v1763_v19  ;;  %v2123_v58 = vadd.f32 %v4387_v24, %v1945_v47 }
 0x16a   : > { %v2124_v27 = vadd.f32 %v4570_v21, %v1946_v11  ;;  %v1771_v42 = vadd.f32 %v4573_v54, %v1593_v62  ;;  %v1950_v53 = vadd.f32 %v4384_v12, %v1772_v34  ;;  %v4574_v12 = vld [vmem:[#allocation11_spill] sm:$0xff]  ;;  %v4575_v49 = vld [vmem:[#allocation13_spill] sm:$0xff] }
 0x16b   : > { %v4399_v28 = vpop.f32.mrf.mxu0  ;;  %v4405_v60 = vpop.f32.mrf.mxu1  ;;  %v4572_v36 = vld [vmem:[#allocation18_spill] sm:$0xff]  ;;  %v2120_v34 = vadd.f32 %v4574_v12, %v1942_v48  ;;  %v2121_v62 = vadd.f32 %v4576_v25, %v1943_v20 }
 0x16c   : > { %v2122_v15 = vadd.f32 %v4572_v36, %v1944_v4  ;;  %v1951_v24 = vadd.f32 %v4399_v28, %v1773_v5  ;;  %v4577_v28 = vld [vmem:[#allocation16_spill] sm:$0xff]  ;;  %v2128_v41 = vadd.f32 %v4394_v0, %v1950_v53 }
 0x16d   : > { %v4411_v31 = vpop.f32.mrf.mxu0  ;;  %v4415_v39 = vpop.f32.mrf.mxu1  ;;  %v2119_v35 = vadd.f32 %v4577_v28, %v1941_v32 }
 0x16f   : > { %v3448_v14 = vpop.f32.mrf.mxu0  ;;  %v4423_v13 = vpop.f32.mrf.mxu1 }
 0x170   : > { %v4436_v17 = vadd.f32 %v3448_v14, %v2116_v2 }
 0x171   : > { %v2229_v45 = vpop.f32.mrf.mxu0  ;;  %v3456_v7 = vpop.f32.mrf.mxu1 }
 0x172   : > { %v4452_v37 = vadd.f32 %v2229_v45, %v2114_v51  ;;  %v4460_v38 = vadd.f32 %v3456_v7, %v2124_v27  ;;  %v2118_v45 = vadd.f32 %v4575_v49, %v1940_v56  ;;  %v1949_v7 = vadd.f32 %v4411_v31, %v1771_v42 }
 0x173   : > { %v3449_v9 = vpop.f32.mrf.mxu0  ;;  %v2261_v59 = vpop.f32.mrf.mxu1 }
 0x174   : > { %v4438_v30 = vadd.f32 %v3449_v9, %v2117_v57  ;;  %v4472_v43 = vadd.f32 %v2261_v59, %v2122_v15  ;;  %v1948_v57 = vadd.f32 %v4391_v1, %v1770_v55  ;;  %v2127_v40 = vadd.f32 %v4423_v13, %v1949_v7 }
 0x175   : > { %v2232_v50 = vpop.f32.mrf.mxu0  ;;  %v3457_v63 = vpop.f32.mrf.mxu1 }
 0x176   : > { %v2984_v29 = vpack.c.bf16 %v4438_v30, %v4436_v17  ;;  %v4456_v46 = vadd.f32 %v2232_v50, %v2115_v22  ;;  %v4462_v61 = vadd.f32 %v3457_v63, %v2125_v18  ;;  %v2129_v22 = vadd.f32 %v4415_v39, %v1951_v24 }
 0x177   : > { %v3452_v3 = vpop.f32.mrf.mxu0  ;;  %v2264_v19 = vpop.f32.mrf.mxu1  ;;  %v2126_v59 = vadd.f32 %v4405_v60, %v1948_v57 }
 0x178   : > { %3023 = vst [vmem:[%s4449_s25 + $0x8] sm:$0xff] %v2984_v29   ;;  %v2979_v14 = vpack.c.bf16 %v4456_v46, %v4452_v37  ;;  %v2388_v6 = vadd.f32 %v4456_v46, %v4452_v37  ;;  %v3004_v44 = vpack.c.bf16 %v4462_v61, %v4460_v38  ;;  %v4476_v23 = vadd.f32 %v2264_v19, %v2123_v58 }
 0x179   : > { %v2245_v11 = vpop.f32.mrf.mxu0  ;;  %v3460_v2 = vpop.f32.mrf.mxu1  ;;  %v2298_v10 = vadd.f32 %v3452_v3, %v2120_v34 }
 0x17a   : > { %2980 = vst [vmem:[%s4449_s25] sm:$0xff] %v2979_v14   ;;  %v2389_v52 = vadd.f32 %v2388_v6, %v4436_v17  ;;  %3027 = vst [vmem:[%s4449_s25 + $0x28] sm:$0xff] %v3004_v44   ;;  %v2999_v8 = vpack.c.bf16 %v4476_v23, %v4472_v43  ;;  %v2296_v51 = vadd.f32 %v2245_v11, %v2118_v45 }
 0x17b   : > { %v3453_v5 = vpop.f32.mrf.mxu0  ;;  %v2277_v47 = vpop.f32.mrf.mxu1  ;;  %v2306_v56 = vadd.f32 %v3460_v2, %v2128_v41 }
 0x17c   : > { %v2390_v4 = vadd.f32 %v2389_v52, %v4438_v30  ;;  %v2299_v9 = vadd.f32 %v3453_v5, %v2121_v62  ;;  %3026 = vst [vmem:[%s4449_s25 + $0x20] sm:$0xff] %v2999_v8   ;;  %v2304_v39 = vadd.f32 %v2277_v47, %v2126_v59 }
 0x17d   : > { %v2248_v1 = vpop.f32.mrf.mxu0  ;;  %v3461_v26 = vpop.f32.mrf.mxu1 }
 0x17e   : > { %v2391_v31 = vadd.f32 %v2390_v4, %v2296_v51  ;;  %v2994_v55 = vpack.c.bf16 %v2299_v9, %v2298_v10  ;;  %v2297_v48 = vadd.f32 %v2248_v1, %v2119_v35  ;;  %v2307_v33 = vadd.f32 %v3461_v26, %v2129_v22 }
 0x17f   : > { %v2280_v21 = vpop.f32.mrf.mxu1 }
 0x180   : > { %3025 = vst [vmem:[%s4449_s25 + $0x18] sm:$0xff] %v2994_v55   ;;  %v2989_v20 = vpack.c.bf16 %v2297_v48, %v2296_v51  ;;  %v2392_v0 = vadd.f32 %v2391_v31, %v2297_v48  ;;  %v3014_v27 = vpack.c.bf16 %v2307_v33, %v2306_v56  ;;  %v2305_v18 = vadd.f32 %v2280_v21, %v2127_v40 }
 0x182   : > { %3024 = vst [vmem:[%s4449_s25 + $0x10] sm:$0xff] %v2989_v20   ;;  %v2393_v50 = vadd.f32 %v2392_v0, %v2298_v10  ;;  %3029 = vst [vmem:[%s4449_s25 + $0x38] sm:$0xff] %v3014_v27   ;;  %v3009_v16 = vpack.c.bf16 %v2305_v18, %v2304_v39 }
 0x184   : > { %v2394_v32 = vadd.f32 %v2393_v50, %v2299_v9  ;;  %3028 = vst [vmem:[%s4449_s25 + $0x30] sm:$0xff] %v3009_v16  }
 0x186   : > { %v2395_v60 = vadd.f32 %v2394_v32, %v4472_v43 }
 0x188   : > { %v2396_v29 = vadd.f32 %v2395_v60, %v4476_v23 }
 0x18a   : > { %v2397_v13 = vadd.f32 %v2396_v29, %v4460_v38 }
 0x18c   : > { %v2398_v63 = vadd.f32 %v2397_v13, %v4462_v61 }
 0x18e   : > { %v2399_v36 = vadd.f32 %v2398_v63, %v2304_v39 }
 0x190   : > { %v2400_v15 = vadd.f32 %v2399_v36, %v2305_v18 }
 0x192   : > { %v2401_v58 = vadd.f32 %v2400_v15, %v2306_v56 }
 0x194   : > { %v2402_v3 = vadd.f32 %v2401_v58, %v2307_v33 }
 0x196   : > { %v2403_v54 = vrot.slane %v2402_v3, 4 }
 0x198   : > { %v2404_v42 = vadd.f32 %v2403_v54, %v2402_v3 }
 0x19a   : > { %v2405_v53 = vrot.slane %v2404_v42, 2 }
 0x19c   : > { %v2406_v14 = vadd.f32 %v2405_v53, %v2404_v42 }
 0x19e   : > { %v2407_v6 = vrot.slane %v2406_v14, 1 }
 0x1a0   : > { %v2408_v19 = vadd.f32 %v2407_v6, %v2406_v14 }
 0x1a2   : > { %v2409_v24 = vmul.f32 0.0078125, %v2408_v19 }
 0x1a4   : > { %v2410_v44 = vsub.f32 %v4452_v37, %v2409_v24  ;;  %v2411_v11 = vsub.f32 %v4456_v46, %v2409_v24  ;;  %v2412_v12 = vsub.f32 %v4436_v17, %v2409_v24  ;;  %v2413_v34 = vsub.f32 %v4438_v30, %v2409_v24 }
 0x1a5   : > { %v2414_v49 = vsub.f32 %v2296_v51, %v2409_v24  ;;  %v2415_v45 = vsub.f32 %v2297_v48, %v2409_v24  ;;  %v2416_v25 = vsub.f32 %v2298_v10, %v2409_v24  ;;  %v2417_v62 = vsub.f32 %v2299_v9, %v2409_v24 }
 0x1a6   : > { %v2418_v52 = vsub.f32 %v4472_v43, %v2409_v24  ;;  %v2419_v2 = vsub.f32 %v4476_v23, %v2409_v24  ;;  %v2420_v28 = vsub.f32 %v4460_v38, %v2409_v24  ;;  %v2421_v35 = vsub.f32 %v4462_v61, %v2409_v24 }
 0x1a7   : > { %v2422_v57 = vsub.f32 %v2304_v39, %v2409_v24  ;;  %v2423_v37 = vsub.f32 %v2305_v18, %v2409_v24  ;;  %v2424_v7 = vsub.f32 %v2306_v56, %v2409_v24  ;;  %v2425_v46 = vsub.f32 %v2307_v33, %v2409_v24 }
 0x1a8   : > { %v2426_v8 = vmul.f32 %v2410_v44, %v2410_v44  ;;  %v2427_v17 = vmul.f32 %v2411_v11, %v2411_v11  ;;  %v2428_v5 = vmul.f32 %v2412_v12, %v2412_v12  ;;  %v2429_v51 = vmul.f32 %v2413_v34, %v2413_v34 }
 0x1a9   : > { %v2430_v10 = vmul.f32 %v2414_v49, %v2414_v49  ;;  %v2431_v9 = vmul.f32 %v2415_v45, %v2415_v45  ;;  %v2432_v41 = vmul.f32 %v2416_v25, %v2416_v25  ;;  %v2433_v22 = vmul.f32 %v2417_v62, %v2417_v62 }
 0x1aa   : > { %v2442_v30 = vadd.f32 %v2427_v17, %v2426_v8  ;;  %v2434_v1 = vmul.f32 %v2418_v52, %v2418_v52  ;;  %v2435_v31 = vmul.f32 %v2419_v2, %v2419_v2  ;;  %v2436_v26 = vmul.f32 %v2420_v28, %v2420_v28 }
 0x1ab   : > { %v2437_v59 = vmul.f32 %v2421_v35, %v2421_v35  ;;  %v2438_v56 = vmul.f32 %v2422_v57, %v2422_v57  ;;  %v2439_v20 = vmul.f32 %v2423_v37, %v2423_v37  ;;  %v2440_v21 = vmul.f32 %v2424_v7, %v2424_v7 }
 0x1ac   : > { %v2443_v4 = vadd.f32 %v2442_v30, %v2428_v5  ;;  %v2441_v27 = vmul.f32 %v2425_v46, %v2425_v46 }
 0x1ae   : > { %v2444_v47 = vadd.f32 %v2443_v4, %v2429_v51 }
 0x1b0   : > { %v2445_v43 = vadd.f32 %v2444_v47, %v2430_v10 }
 0x1b2   : > { %v2446_v23 = vadd.f32 %v2445_v43, %v2431_v9 }
 0x1b4   : > { %v2447_v38 = vadd.f32 %v2446_v23, %v2432_v41 }
 0x1b6   : > { %v2448_v61 = vadd.f32 %v2447_v38, %v2433_v22 }
 0x1b8   : > { %v2449_v55 = vadd.f32 %v2448_v61, %v2434_v1 }
 0x1ba   : > { %v2450_v48 = vadd.f32 %v2449_v55, %v2435_v31 }
 0x1bc   : > { %v2451_v40 = vadd.f32 %v2450_v48, %v2436_v26 }
 0x1be   : > { %v2452_v33 = vadd.f32 %v2451_v40, %v2437_v59 }
 0x1c0   : > { %v2453_v0 = vadd.f32 %v2452_v33, %v2438_v56 }
 0x1c2   : > { %v2454_v39 = vadd.f32 %v2453_v0, %v2439_v20 }
 0x1c4   : > { %v2455_v18 = vadd.f32 %v2454_v39, %v2440_v21 }
 0x1c6   : > { %v2456_v50 = vadd.f32 %v2455_v18, %v2441_v27 }
 0x1c8   : > { %v2457_v16 = vrot.slane %v2456_v50, 4 }
 0x1ca   : > { %v2458_v32 = vadd.f32 %v2457_v16, %v2456_v50 }
 0x1cc   : > { %v2459_v60 = vrot.slane %v2458_v32, 2 }
 0x1ce   : > { %v2460_v29 = vadd.f32 %v2459_v60, %v2458_v32 }
 0x1d0   : > { %v2461_v13 = vrot.slane %v2460_v29, 1 }
 0x1d2   : > { %v2462_v63 = vadd.f32 %v2461_v13, %v2460_v29 }
 0x1d4   : > { %v2464_v36 = vsel %vm683_vm0, %v2409_v24, %v2462_v63 }
 0x1d5   : > { %2465 = vst [vmem:[%s467_s14] sm:$0x3] %v2464_v36 }
 0x1d6 PF: > { %s18_s28 = sadd.s32 1, %s3628_s28   ;;  %s4578_s24 = smov %s3620_s26 }
 0x1d7   : > { %p15_p12 = scmp.ge.s32.totalorder %s18_s28, 6   ;;  %s4579_s25 = smov %s3624_s27 }
 0x1d8   : > { %s4580_s26 = smov %s4583_s29  ;;  %s4581_s27 = smov %s4587_s30 }
 0x1d9   :  { %17 = sbr.rel (!%p15_p12) target bundleno = 3 (0x3), region = 100 }

</bundles_post_ra>
